<compile_context>
chip_gen: v7x
topology: tpu7x:2x2x1
jax: 0.10.0
libtpu: 0.0.40
codegen_flags: <defaults>
</compile_context>

<pallas_src>
import functools

import jax
import jax.numpy as jnp
import numpy as np
from jax import lax
from jax.experimental import pallas as pl
from jax.experimental.pallas import tpu as pltpu

CP = 128  # padded channel / K width (lane dimension)


def _pool3x3_s3_relu(y, rows, w, cp):
    """y: (rows*w, cp), row-major over (rows, w); rows % 3 == 0, w % 3 == 0.

    Floor-mode 3x3/stride-3 max-pool over the (rows, w) grid followed by ReLU.
    Uses only lane-preserving reshapes, static tap indexing and elementwise
    maxima.  Returns (rows//3, w//3, cp).
    """
    z = y.reshape(rows, w // 3, 3, cp)
    pw = jnp.maximum(jnp.maximum(z[:, :, 0, :], z[:, :, 1, :]), z[:, :, 2, :])
    zz = pw.reshape(rows // 3, 3, w // 3, cp)
    ph = jnp.maximum(jnp.maximum(zz[:, 0], zz[:, 1]), zz[:, 2])
    return jnp.maximum(ph, 0.0)


def _fused_kernel(xp_ref, w1_ref, b1_ref, w2_ref, b2_ref, mask_ref, o_ref,
                  *, nb, h, w):
    """Fused conv1+pool1+relu+conv2+pool2+relu for `nb` images.

    xp_ref:   (nb*h*w, CP)        bf16  stage-1 im2col patches (K=9*Cin padded)
    w1_ref:   (CP, CP)            bf16  conv1 weights, im2col layout, K/Cout padded
    b1_ref:   (1, CP)             f32
    w2_ref:   (9, CP, CP)         bf16  conv2 per-tap weights, channels padded
    b2_ref:   (1, CP)             f32
    mask_ref: (9, nb*ho1*wo1, CP) f32   per-tap 'same'-padding border masks (0/1)
    o_ref:    (nb*ho2*wo2, CP)    f32   lane-dense output slab
    """
    ho1, wo1 = h // 3, w // 3
    ho2, wo2 = ho1 // 3, wo1 // 3
    n2 = nb * ho1 * wo1

    # ---- stage 1: conv1 (single matmul over prebuilt patches) + pool + relu ----
    y1 = jnp.dot(xp_ref[...], w1_ref[...],
                 preferred_element_type=jnp.float32) + b1_ref[...]
    r1 = _pool3x3_s3_relu(y1, nb * h, w, CP).reshape(n2, CP)      # (n2, CP) f32

    # ---- stage 2: conv2 as 9 roll+mask per-tap matmuls, f32 accumulation ----
    acc = jnp.zeros((n2, CP), jnp.float32)
    for t in range(9):
        dh, dw = t // 3 - 1, t % 3 - 1
        off = dh * wo1 + dw
        if off == 0:
            lhs = r1                             # centre tap: no shift, mask is all-ones
        else:
            # lhs[r] = r1[r + off] for valid rows; rows that would cross an
            # image border (or wrap around the slab) are zeroed by the mask.
            lhs = pltpu.roll(r1, (-off) % n2, axis=0) * mask_ref[t]
        acc = acc + jnp.dot(lhs.astype(jnp.bfloat16), w2_ref[t],
                            preferred_element_type=jnp.float32)
    y2 = acc + b2_ref[...]
    r2 = _pool3x3_s3_relu(y2, nb * ho1, wo1, CP)                  # (nb*ho2, wo2, CP)
    o_ref[...] = r2.reshape(nb * ho2 * wo2, CP).astype(o_ref.dtype)


def model_tanh_forward(x_nchw, params, *, images_per_step=2):
    """Forward pass of ModelTanh (NCHW in / NCHW out, like the PyTorch module)."""
    N, cin, H, W = x_nchw.shape
    c1 = params["w1"].shape[-1]          # 32
    c2 = params["w2"].shape[-1]          # 64
    nb = images_per_step
    ho1, wo1 = H // 3, W // 3
    ho2, wo2 = ho1 // 3, wo1 // 3
    k1 = 9 * cin

    # TODO(synk): floor-mode pooling for H,W not divisible by 9 (e.g. the 112x112
    # input in the original script) needs extra edge handling in this tiling.
    assert H % 9 == 0 and W % 9 == 0, "kernel assumes H, W divisible by 9"
    assert N % nb == 0, "batch must be divisible by images_per_step"
    assert (nb * H * W) % 8 == 0 and (nb * ho1 * wo1) % 8 == 0 \
        and (nb * ho2 * wo2) % 8 == 0, "per-step row counts must be 8-aligned"
    assert k1 <= CP and c1 <= CP and c2 <= CP

    # --- stage-1 im2col built in XLA (tiny tensor), lane-padded, bf16 ---
    x = jnp.transpose(x_nchw, (0, 2, 3, 1))                       # (N, H, W, Cin)
    xpad = jnp.pad(x, ((0, 0), (1, 1), (1, 1), (0, 0)))
    taps = [xpad[:, dh:dh + H, dw:dw + W, :] for dh in range(3) for dw in range(3)]
    patches = jnp.concatenate(taps, axis=-1).reshape(N * H * W, k1)
    patches = jnp.pad(patches, ((0, 0), (0, CP - k1))).astype(jnp.bfloat16)

    # --- conv1 weights: HWIO (3,3,Cin,C1) -> im2col (K1, C1) -> (CP, CP) bf16 ---
    w1 = jnp.pad(params["w1"].reshape(k1, c1),
                 ((0, CP - k1), (0, CP - c1))).astype(jnp.bfloat16)
    b1 = jnp.pad(params["b1"], (0, CP - c1)).reshape(1, CP)

    # --- conv2 weights: HWIO (3,3,C1,C2) -> per-tap (9, CP, CP) bf16 ---
    w2 = jnp.pad(params["w2"], ((0, 0), (0, 0), (0, CP - c1), (0, CP - c2)))
    w2 = w2.reshape(9, CP, CP).astype(jnp.bfloat16)
    b2 = jnp.pad(params["b2"], (0, CP - c2)).reshape(1, CP)

    # --- per-tap 'same' border masks for the roll-based conv2 taps ---
    n2 = nb * ho1 * wo1
    ii = np.arange(ho1 * wo1) // wo1
    jj = np.arange(ho1 * wo1) % wo1
    masks = np.zeros((9, ho1 * wo1), np.float32)
    for t in range(9):
        dh, dw = t // 3 - 1, t % 3 - 1
        masks[t] = ((ii + dh >= 0) & (ii + dh < ho1) &
                    (jj + dw >= 0) & (jj + dw < wo1)).astype(np.float32)
    masks = np.tile(masks, (1, nb))                               # (9, n2)
    masks = jnp.asarray(np.broadcast_to(masks[:, :, None], (9, n2, CP)).copy())

    kernel = functools.partial(_fused_kernel, nb=nb, h=H, w=W)
    out = pl.pallas_call(
        kernel,
        out_shape=jax.ShapeDtypeStruct((N * ho2 * wo2, CP), jnp.float32),
        grid=(N // nb,),
        in_specs=[
            pl.BlockSpec((nb * H * W, CP), lambda n: (n, 0)),      # patches (batched M)
            pl.BlockSpec((CP, CP), lambda n: (0, 0)),              # w1 (resident)
            pl.BlockSpec((1, CP), lambda n: (0, 0)),               # b1
            pl.BlockSpec((9, CP, CP), lambda n: (0, 0, 0)),        # w2 taps (resident)
            pl.BlockSpec((1, CP), lambda n: (0, 0)),               # b2
            pl.BlockSpec((9, n2, CP), lambda n: (0, 0, 0)),        # border masks
        ],
        out_specs=pl.BlockSpec((nb * ho2 * wo2, CP), lambda n: (n, 0)),
        compiler_params=pltpu.CompilerParams(
            dimension_semantics=("parallel",)),
    )(patches, w1, b1, w2, b2, masks)

    # (N*Ho2*Wo2, CP) -> slice real channels -> NCHW
    out = out[:, :c2].reshape(N, ho2, wo2, c2)
    return jnp.transpose(out, (0, 3, 1, 2))


def reference_forward(x_nchw, params):
    """Pure-JAX reference (lax conv / reduce_window), f32 throughout."""
    def conv(x, w, b):
        y = lax.conv_general_dilated(
            x, w, window_strides=(1, 1), padding=((1, 1), (1, 1)),
            dimension_numbers=("NHWC", "HWIO", "NHWC"))
        return y + b

    def pool(x):
        return lax.reduce_window(x, -jnp.inf, lax.max,
                                 (1, 3, 3, 1), (1, 3, 3, 1), "VALID")

    x = jnp.transpose(x_nchw, (0, 2, 3, 1))
    h = jnp.maximum(pool(conv(x, params["w1"], params["b1"])), 0.0)
    h = jnp.maximum(pool(conv(h, params["w2"], params["b2"])), 0.0)
    return jnp.transpose(h, (0, 3, 1, 2))


def init_params(key):
    k1, k2, k3, k4 = jax.random.split(key, 4)
    return {
        # conv1: Conv2d(3, 32, 3, 1, 1)  -> HWIO (3, 3, 3, 32)
        "w1": 0.1 * jax.random.normal(k1, (3, 3, 3, 32), jnp.float32),
        "b1": 0.1 * jax.random.normal(k2, (32,), jnp.float32),
        # conv2: Conv2d(32, 64, 3, 1, 1) -> HWIO (3, 3, 32, 64)
        "w2": 0.1 * jax.random.normal(k3, (3, 3, 32, 64), jnp.float32),
        "b2": 0.1 * jax.random.normal(k4, (64,), jnp.float32),
    }


if __name__ == "__main__":
    key = jax.random.PRNGKey(0)
    kp, kx = jax.random.split(key)
    params = init_params(kp)

    # Small input consistent with the module: NCHW, 3 input channels.
    # 18 -> conv(same) 18 -> pool3/3 6 -> conv(same) 6 -> pool3/3 2.
    x = jax.random.normal(kx, (4, 3, 18, 18), jnp.float32)

    out = jax.block_until_ready(model_tanh_forward(x, params, images_per_step=2))
    ref = jax.block_until_ready(reference_forward(x, params))

    assert out.shape == (4, 64, 2, 2), out.shape
    max_err = float(jnp.max(jnp.abs(out - ref)))
    # bf16 matmul operands with f32 accumulation -> loosened tolerance.
    assert jnp.allclose(out, ref, rtol=5e-2, atol=5e-2), max_err

    print("KERNEL_OK")
</pallas_src>

<mosaic_0001>
module attributes {stable_mosaic.version = 11 : i64} {
  func.func @_fused_kernel(%arg0: i32, %arg1: memref<648x128xbf16, #tpu.memory_space<vmem>>, %arg2: memref<128x128xbf16, #tpu.memory_space<vmem>>, %arg3: memref<1x128xf32, #tpu.memory_space<vmem>>, %arg4: memref<9x128x128xbf16, #tpu.memory_space<vmem>>, %arg5: memref<1x128xf32, #tpu.memory_space<vmem>>, %arg6: memref<9x72x128xf32, #tpu.memory_space<vmem>>, %arg7: memref<8x128xf32, #tpu.memory_space<vmem>>) attributes {dimension_semantics = [#tpu.dimension_semantics<parallel>], iteration_bounds = array<i64: 2>, scalar_prefetch = 0 : i64, scratch_operands = 0 : i64, tpu.core_type = #tpu.core_type<tc>, window_params = [{transform_indices = @transform_0, window_bounds = array<i64: 648, 128>}, {pipeline_mode = #tpu.pipeline_mode<synchronous>, transform_indices = @transform_1, window_bounds = array<i64: 128, 128>}, {pipeline_mode = #tpu.pipeline_mode<synchronous>, transform_indices = @transform_2, window_bounds = array<i64: 1, 128>}, {pipeline_mode = #tpu.pipeline_mode<synchronous>, transform_indices = @transform_3, window_bounds = array<i64: 9, 128, 128>}, {pipeline_mode = #tpu.pipeline_mode<synchronous>, transform_indices = @transform_4, window_bounds = array<i64: 1, 128>}, {pipeline_mode = #tpu.pipeline_mode<synchronous>, transform_indices = @transform_5, window_bounds = array<i64: 9, 72, 128>}, {transform_indices = @transform_6, window_bounds = array<i64: 8, 128>}]} {
    %c0 = arith.constant 0 : index
    %c0_0 = arith.constant 0 : index
    %0 = vector.load %arg1[%c0, %c0_0] : memref<648x128xbf16, #tpu.memory_space<vmem>>, vector<648x128xbf16>
    %c0_1 = arith.constant 0 : index
    %c0_2 = arith.constant 0 : index
    %1 = vector.load %arg2[%c0_1, %c0_2] : memref<128x128xbf16, #tpu.memory_space<vmem>>, vector<128x128xbf16>
    %cst = arith.constant dense<0.000000e+00> : vector<648x128xf32>
    %2 = tpu.matmul %0, %1, %cst {dimension_numbers = #tpu.dot_dimension_numbers<[1], [0], [0], [1], [0, 0, 1, 1], [], []>} : vector<648x128xbf16>, vector<128x128xbf16>, vector<648x128xf32> -> vector<648x128xf32>
    %c0_3 = arith.constant 0 : index
    %c0_4 = arith.constant 0 : index
    %3 = vector.load %arg3[%c0_3, %c0_4] : memref<1x128xf32, #tpu.memory_space<vmem>>, vector<1x128xf32>
    %4 = vector.broadcast %3 : vector<1x128xf32> to vector<648x128xf32>
    %5 = arith.addf %2, %4 : vector<648x128xf32>
    %6 = vector.shape_cast %5 : vector<648x128xf32> to vector<36x6x3x128xf32>
    %7 = vector.extract_strided_slice %6 {offsets = [0, 0, 0, 0], sizes = [36, 6, 1, 128], strides = [1, 1, 1, 1]} : vector<36x6x3x128xf32> to vector<36x6x1x128xf32>
    %8 = vector.shape_cast %7 : vector<36x6x1x128xf32> to vector<36x6x128xf32>
    %9 = vector.extract_strided_slice %6 {offsets = [0, 0, 1, 0], sizes = [36, 6, 1, 128], strides = [1, 1, 1, 1]} : vector<36x6x3x128xf32> to vector<36x6x1x128xf32>
    %10 = vector.shape_cast %9 : vector<36x6x1x128xf32> to vector<36x6x128xf32>
    %11 = arith.maximumf %8, %10 : vector<36x6x128xf32>
    %12 = vector.extract_strided_slice %6 {offsets = [0, 0, 2, 0], sizes = [36, 6, 1, 128], strides = [1, 1, 1, 1]} : vector<36x6x3x128xf32> to vector<36x6x1x128xf32>
    %13 = vector.shape_cast %12 : vector<36x6x1x128xf32> to vector<36x6x128xf32>
    %14 = arith.maximumf %11, %13 : vector<36x6x128xf32>
    %15 = vector.shape_cast %14 : vector<36x6x128xf32> to vector<12x3x6x128xf32>
    %16 = vector.extract_strided_slice %15 {offsets = [0, 0, 0, 0], sizes = [12, 1, 6, 128], strides = [1, 1, 1, 1]} : vector<12x3x6x128xf32> to vector<12x1x6x128xf32>
    %17 = vector.shape_cast %16 : vector<12x1x6x128xf32> to vector<12x6x128xf32>
    %18 = vector.extract_strided_slice %15 {offsets = [0, 1, 0, 0], sizes = [12, 1, 6, 128], strides = [1, 1, 1, 1]} : vector<12x3x6x128xf32> to vector<12x1x6x128xf32>
    %19 = vector.shape_cast %18 : vector<12x1x6x128xf32> to vector<12x6x128xf32>
    %20 = arith.maximumf %17, %19 : vector<12x6x128xf32>
    %21 = vector.extract_strided_slice %15 {offsets = [0, 2, 0, 0], sizes = [12, 1, 6, 128], strides = [1, 1, 1, 1]} : vector<12x3x6x128xf32> to vector<12x1x6x128xf32>
    %22 = vector.shape_cast %21 : vector<12x1x6x128xf32> to vector<12x6x128xf32>
    %23 = arith.maximumf %20, %22 : vector<12x6x128xf32>
    %cst_5 = arith.constant 0.000000e+00 : f32
    %24 = vector.broadcast %cst_5 : f32 to vector<12x6x128xf32>
    %25 = arith.maximumf %23, %24 : vector<12x6x128xf32>
    %26 = vector.shape_cast %25 : vector<12x6x128xf32> to vector<72x128xf32>
    %cst_6 = arith.constant 0.000000e+00 : f32
    %27 = vector.broadcast %cst_6 : f32 to vector<72x128xf32>
    %c7_i32 = arith.constant 7 : i32
    %28 = tpu.dynamic_rotate %26 by %c7_i32 dim 0 : vector<72x128xf32>, i32 -> vector<72x128xf32>
    %c0_7 = arith.constant 0 : index
    %c0_8 = arith.constant 0 : index
    %c0_9 = arith.constant 0 : index
    %29 = vector.load %arg6[%c0_7, %c0_8, %c0_9] : memref<9x72x128xf32, #tpu.memory_space<vmem>>, vector<1x72x128xf32>
    %30 = vector.shape_cast %29 : vector<1x72x128xf32> to vector<72x128xf32>
    %31 = arith.mulf %28, %30 : vector<72x128xf32>
    %32 = arith.truncf %31 : vector<72x128xf32> to vector<72x128xbf16>
    %c0_10 = arith.constant 0 : index
    %c0_11 = arith.constant 0 : index
    %c0_12 = arith.constant 0 : index
    %33 = vector.load %arg4[%c0_10, %c0_11, %c0_12] : memref<9x128x128xbf16, #tpu.memory_space<vmem>>, vector<1x128x128xbf16>
    %34 = vector.shape_cast %33 : vector<1x128x128xbf16> to vector<128x128xbf16>
    %cst_13 = arith.constant dense<0.000000e+00> : vector<72x128xf32>
    %35 = tpu.matmul %32, %34, %cst_13 {dimension_numbers = #tpu.dot_dimension_numbers<[1], [0], [0], [1], [0, 0, 1, 1], [], []>} : vector<72x128xbf16>, vector<128x128xbf16>, vector<72x128xf32> -> vector<72x128xf32>
    %36 = arith.addf %27, %35 : vector<72x128xf32>
    %c6_i32 = arith.constant 6 : i32
    %37 = tpu.dynamic_rotate %26 by %c6_i32 dim 0 : vector<72x128xf32>, i32 -> vector<72x128xf32>
    %c1 = arith.constant 1 : index
    %c0_14 = arith.constant 0 : index
    %c0_15 = arith.constant 0 : index
    %38 = vector.load %arg6[%c1, %c0_14, %c0_15] : memref<9x72x128xf32, #tpu.memory_space<vmem>>, vector<1x72x128xf32>
    %39 = vector.shape_cast %38 : vector<1x72x128xf32> to vector<72x128xf32>
    %40 = arith.mulf %37, %39 : vector<72x128xf32>
    %41 = arith.truncf %40 : vector<72x128xf32> to vector<72x128xbf16>
    %c1_16 = arith.constant 1 : index
    %c0_17 = arith.constant 0 : index
    %c0_18 = arith.constant 0 : index
    %42 = vector.load %arg4[%c1_16, %c0_17, %c0_18] : memref<9x128x128xbf16, #tpu.memory_space<vmem>>, vector<1x128x128xbf16>
    %43 = vector.shape_cast %42 : vector<1x128x128xbf16> to vector<128x128xbf16>
    %cst_19 = arith.constant dense<0.000000e+00> : vector<72x128xf32>
    %44 = tpu.matmul %41, %43, %cst_19 {dimension_numbers = #tpu.dot_dimension_numbers<[1], [0], [0], [1], [0, 0, 1, 1], [], []>} : vector<72x128xbf16>, vector<128x128xbf16>, vector<72x128xf32> -> vector<72x128xf32>
    %45 = arith.addf %36, %44 : vector<72x128xf32>
    %c5_i32 = arith.constant 5 : i32
    %46 = tpu.dynamic_rotate %26 by %c5_i32 dim 0 : vector<72x128xf32>, i32 -> vector<72x128xf32>
    %c2 = arith.constant 2 : index
    %c0_20 = arith.constant 0 : index
    %c0_21 = arith.constant 0 : index
    %47 = vector.load %arg6[%c2, %c0_20, %c0_21] : memref<9x72x128xf32, #tpu.memory_space<vmem>>, vector<1x72x128xf32>
    %48 = vector.shape_cast %47 : vector<1x72x128xf32> to vector<72x128xf32>
    %49 = arith.mulf %46, %48 : vector<72x128xf32>
    %50 = arith.truncf %49 : vector<72x128xf32> to vector<72x128xbf16>
    %c2_22 = arith.constant 2 : index
    %c0_23 = arith.constant 0 : index
    %c0_24 = arith.constant 0 : index
    %51 = vector.load %arg4[%c2_22, %c0_23, %c0_24] : memref<9x128x128xbf16, #tpu.memory_space<vmem>>, vector<1x128x128xbf16>
    %52 = vector.shape_cast %51 : vector<1x128x128xbf16> to vector<128x128xbf16>
    %cst_25 = arith.constant dense<0.000000e+00> : vector<72x128xf32>
    %53 = tpu.matmul %50, %52, %cst_25 {dimension_numbers = #tpu.dot_dimension_numbers<[1], [0], [0], [1], [0, 0, 1, 1], [], []>} : vector<72x128xbf16>, vector<128x128xbf16>, vector<72x128xf32> -> vector<72x128xf32>
    %54 = arith.addf %45, %53 : vector<72x128xf32>
    %c1_i32 = arith.constant 1 : i32
    %55 = tpu.dynamic_rotate %26 by %c1_i32 dim 0 : vector<72x128xf32>, i32 -> vector<72x128xf32>
    %c3 = arith.constant 3 : index
    %c0_26 = arith.constant 0 : index
    %c0_27 = arith.constant 0 : index
    %56 = vector.load %arg6[%c3, %c0_26, %c0_27] : memref<9x72x128xf32, #tpu.memory_space<vmem>>, vector<1x72x128xf32>
    %57 = vector.shape_cast %56 : vector<1x72x128xf32> to vector<72x128xf32>
    %58 = arith.mulf %55, %57 : vector<72x128xf32>
    %59 = arith.truncf %58 : vector<72x128xf32> to vector<72x128xbf16>
    %c3_28 = arith.constant 3 : index
    %c0_29 = arith.constant 0 : index
    %c0_30 = arith.constant 0 : index
    %60 = vector.load %arg4[%c3_28, %c0_29, %c0_30] : memref<9x128x128xbf16, #tpu.memory_space<vmem>>, vector<1x128x128xbf16>
    %61 = vector.shape_cast %60 : vector<1x128x128xbf16> to vector<128x128xbf16>
    %cst_31 = arith.constant dense<0.000000e+00> : vector<72x128xf32>
    %62 = tpu.matmul %59, %61, %cst_31 {dimension_numbers = #tpu.dot_dimension_numbers<[1], [0], [0], [1], [0, 0, 1, 1], [], []>} : vector<72x128xbf16>, vector<128x128xbf16>, vector<72x128xf32> -> vector<72x128xf32>
    %63 = arith.addf %54, %62 : vector<72x128xf32>
    %64 = arith.truncf %26 : vector<72x128xf32> to vector<72x128xbf16>
    %c4 = arith.constant 4 : index
    %c0_32 = arith.constant 0 : index
    %c0_33 = arith.constant 0 : index
    %65 = vector.load %arg4[%c4, %c0_32, %c0_33] : memref<9x128x128xbf16, #tpu.memory_space<vmem>>, vector<1x128x128xbf16>
    %66 = vector.shape_cast %65 : vector<1x128x128xbf16> to vector<128x128xbf16>
    %cst_34 = arith.constant dense<0.000000e+00> : vector<72x128xf32>
    %67 = tpu.matmul %64, %66, %cst_34 {dimension_numbers = #tpu.dot_dimension_numbers<[1], [0], [0], [1], [0, 0, 1, 1], [], []>} : vector<72x128xbf16>, vector<128x128xbf16>, vector<72x128xf32> -> vector<72x128xf32>
    %68 = arith.addf %63, %67 : vector<72x128xf32>
    %c71_i32 = arith.constant 71 : i32
    %69 = tpu.dynamic_rotate %26 by %c71_i32 dim 0 : vector<72x128xf32>, i32 -> vector<72x128xf32>
    %c5 = arith.constant 5 : index
    %c0_35 = arith.constant 0 : index
    %c0_36 = arith.constant 0 : index
    %70 = vector.load %arg6[%c5, %c0_35, %c0_36] : memref<9x72x128xf32, #tpu.memory_space<vmem>>, vector<1x72x128xf32>
    %71 = vector.shape_cast %70 : vector<1x72x128xf32> to vector<72x128xf32>
    %72 = arith.mulf %69, %71 : vector<72x128xf32>
    %73 = arith.truncf %72 : vector<72x128xf32> to vector<72x128xbf16>
    %c5_37 = arith.constant 5 : index
    %c0_38 = arith.constant 0 : index
    %c0_39 = arith.constant 0 : index
    %74 = vector.load %arg4[%c5_37, %c0_38, %c0_39] : memref<9x128x128xbf16, #tpu.memory_space<vmem>>, vector<1x128x128xbf16>
    %75 = vector.shape_cast %74 : vector<1x128x128xbf16> to vector<128x128xbf16>
    %cst_40 = arith.constant dense<0.000000e+00> : vector<72x128xf32>
    %76 = tpu.matmul %73, %75, %cst_40 {dimension_numbers = #tpu.dot_dimension_numbers<[1], [0], [0], [1], [0, 0, 1, 1], [], []>} : vector<72x128xbf16>, vector<128x128xbf16>, vector<72x128xf32> -> vector<72x128xf32>
    %77 = arith.addf %68, %76 : vector<72x128xf32>
    %c67_i32 = arith.constant 67 : i32
    %78 = tpu.dynamic_rotate %26 by %c67_i32 dim 0 : vector<72x128xf32>, i32 -> vector<72x128xf32>
    %c6 = arith.constant 6 : index
    %c0_41 = arith.constant 0 : index
    %c0_42 = arith.constant 0 : index
    %79 = vector.load %arg6[%c6, %c0_41, %c0_42] : memref<9x72x128xf32, #tpu.memory_space<vmem>>, vector<1x72x128xf32>
    %80 = vector.shape_cast %79 : vector<1x72x128xf32> to vector<72x128xf32>
    %81 = arith.mulf %78, %80 : vector<72x128xf32>
    %82 = arith.truncf %81 : vector<72x128xf32> to vector<72x128xbf16>
    %c6_43 = arith.constant 6 : index
    %c0_44 = arith.constant 0 : index
    %c0_45 = arith.constant 0 : index
    %83 = vector.load %arg4[%c6_43, %c0_44, %c0_45] : memref<9x128x128xbf16, #tpu.memory_space<vmem>>, vector<1x128x128xbf16>
    %84 = vector.shape_cast %83 : vector<1x128x128xbf16> to vector<128x128xbf16>
    %cst_46 = arith.constant dense<0.000000e+00> : vector<72x128xf32>
    %85 = tpu.matmul %82, %84, %cst_46 {dimension_numbers = #tpu.dot_dimension_numbers<[1], [0], [0], [1], [0, 0, 1, 1], [], []>} : vector<72x128xbf16>, vector<128x128xbf16>, vector<72x128xf32> -> vector<72x128xf32>
    %86 = arith.addf %77, %85 : vector<72x128xf32>
    %c66_i32 = arith.constant 66 : i32
    %87 = tpu.dynamic_rotate %26 by %c66_i32 dim 0 : vector<72x128xf32>, i32 -> vector<72x128xf32>
    %c7 = arith.constant 7 : index
    %c0_47 = arith.constant 0 : index
    %c0_48 = arith.constant 0 : index
    %88 = vector.load %arg6[%c7, %c0_47, %c0_48] : memref<9x72x128xf32, #tpu.memory_space<vmem>>, vector<1x72x128xf32>
    %89 = vector.shape_cast %88 : vector<1x72x128xf32> to vector<72x128xf32>
    %90 = arith.mulf %87, %89 : vector<72x128xf32>
    %91 = arith.truncf %90 : vector<72x128xf32> to vector<72x128xbf16>
    %c7_49 = arith.constant 7 : index
    %c0_50 = arith.constant 0 : index
    %c0_51 = arith.constant 0 : index
    %92 = vector.load %arg4[%c7_49, %c0_50, %c0_51] : memref<9x128x128xbf16, #tpu.memory_space<vmem>>, vector<1x128x128xbf16>
    %93 = vector.shape_cast %92 : vector<1x128x128xbf16> to vector<128x128xbf16>
    %cst_52 = arith.constant dense<0.000000e+00> : vector<72x128xf32>
    %94 = tpu.matmul %91, %93, %cst_52 {dimension_numbers = #tpu.dot_dimension_numbers<[1], [0], [0], [1], [0, 0, 1, 1], [], []>} : vector<72x128xbf16>, vector<128x128xbf16>, vector<72x128xf32> -> vector<72x128xf32>
    %95 = arith.addf %86, %94 : vector<72x128xf32>
    %c65_i32 = arith.constant 65 : i32
    %96 = tpu.dynamic_rotate %26 by %c65_i32 dim 0 : vector<72x128xf32>, i32 -> vector<72x128xf32>
    %c8 = arith.constant 8 : index
    %c0_53 = arith.constant 0 : index
    %c0_54 = arith.constant 0 : index
    %97 = vector.load %arg6[%c8, %c0_53, %c0_54] : memref<9x72x128xf32, #tpu.memory_space<vmem>>, vector<1x72x128xf32>
    %98 = vector.shape_cast %97 : vector<1x72x128xf32> to vector<72x128xf32>
    %99 = arith.mulf %96, %98 : vector<72x128xf32>
    %100 = arith.truncf %99 : vector<72x128xf32> to vector<72x128xbf16>
    %c8_55 = arith.constant 8 : index
    %c0_56 = arith.constant 0 : index
    %c0_57 = arith.constant 0 : index
    %101 = vector.load %arg4[%c8_55, %c0_56, %c0_57] : memref<9x128x128xbf16, #tpu.memory_space<vmem>>, vector<1x128x128xbf16>
    %102 = vector.shape_cast %101 : vector<1x128x128xbf16> to vector<128x128xbf16>
    %cst_58 = arith.constant dense<0.000000e+00> : vector<72x128xf32>
    %103 = tpu.matmul %100, %102, %cst_58 {dimension_numbers = #tpu.dot_dimension_numbers<[1], [0], [0], [1], [0, 0, 1, 1], [], []>} : vector<72x128xbf16>, vector<128x128xbf16>, vector<72x128xf32> -> vector<72x128xf32>
    %104 = arith.addf %95, %103 : vector<72x128xf32>
    %c0_59 = arith.constant 0 : index
    %c0_60 = arith.constant 0 : index
    %105 = vector.load %arg5[%c0_59, %c0_60] : memref<1x128xf32, #tpu.memory_space<vmem>>, vector<1x128xf32>
    %106 = vector.broadcast %105 : vector<1x128xf32> to vector<72x128xf32>
    %107 = arith.addf %104, %106 : vector<72x128xf32>
    %108 = vector.shape_cast %107 : vector<72x128xf32> to vector<12x2x3x128xf32>
    %109 = vector.extract_strided_slice %108 {offsets = [0, 0, 0, 0], sizes = [12, 2, 1, 128], strides = [1, 1, 1, 1]} : vector<12x2x3x128xf32> to vector<12x2x1x128xf32>
    %110 = vector.shape_cast %109 : vector<12x2x1x128xf32> to vector<12x2x128xf32>
    %111 = vector.extract_strided_slice %108 {offsets = [0, 0, 1, 0], sizes = [12, 2, 1, 128], strides = [1, 1, 1, 1]} : vector<12x2x3x128xf32> to vector<12x2x1x128xf32>
    %112 = vector.shape_cast %111 : vector<12x2x1x128xf32> to vector<12x2x128xf32>
    %113 = arith.maximumf %110, %112 : vector<12x2x128xf32>
    %114 = vector.extract_strided_slice %108 {offsets = [0, 0, 2, 0], sizes = [12, 2, 1, 128], strides = [1, 1, 1, 1]} : vector<12x2x3x128xf32> to vector<12x2x1x128xf32>
    %115 = vector.shape_cast %114 : vector<12x2x1x128xf32> to vector<12x2x128xf32>
    %116 = arith.maximumf %113, %115 : vector<12x2x128xf32>
    %117 = vector.shape_cast %116 : vector<12x2x128xf32> to vector<4x3x2x128xf32>
    %118 = vector.extract_strided_slice %117 {offsets = [0, 0, 0, 0], sizes = [4, 1, 2, 128], strides = [1, 1, 1, 1]} : vector<4x3x2x128xf32> to vector<4x1x2x128xf32>
    %119 = vector.shape_cast %118 : vector<4x1x2x128xf32> to vector<4x2x128xf32>
    %120 = vector.extract_strided_slice %117 {offsets = [0, 1, 0, 0], sizes = [4, 1, 2, 128], strides = [1, 1, 1, 1]} : vector<4x3x2x128xf32> to vector<4x1x2x128xf32>
    %121 = vector.shape_cast %120 : vector<4x1x2x128xf32> to vector<4x2x128xf32>
    %122 = arith.maximumf %119, %121 : vector<4x2x128xf32>
    %123 = vector.extract_strided_slice %117 {offsets = [0, 2, 0, 0], sizes = [4, 1, 2, 128], strides = [1, 1, 1, 1]} : vector<4x3x2x128xf32> to vector<4x1x2x128xf32>
    %124 = vector.shape_cast %123 : vector<4x1x2x128xf32> to vector<4x2x128xf32>
    %125 = arith.maximumf %122, %124 : vector<4x2x128xf32>
    %cst_61 = arith.constant 0.000000e+00 : f32
    %126 = vector.broadcast %cst_61 : f32 to vector<4x2x128xf32>
    %127 = arith.maximumf %125, %126 : vector<4x2x128xf32>
    %128 = vector.shape_cast %127 : vector<4x2x128xf32> to vector<8x128xf32>
    %c0_62 = arith.constant 0 : index
    %c0_63 = arith.constant 0 : index
    %129 = vector.load %arg7[%c0_62, %c0_63] : memref<8x128xf32, #tpu.memory_space<vmem>>, vector<8x128xf32>
    tpu.vector_store %arg7[%c0_62, %c0_63], %128 {strides = array<i32>} : memref<8x128xf32, #tpu.memory_space<vmem>>, vector<8x128xf32>,
    return
  }
  func.func @transform_0(%arg0: i32) -> (i32, i32) {
    %c0_i32 = arith.constant 0 : i32
    %c0_i32_0 = arith.constant 0 : i32
    return %arg0, %c0_i32 : i32, i32
  }
  func.func @transform_1(%arg0: i32) -> (i32, i32) {
    %c0_i32 = arith.constant 0 : i32
    %c0_i32_0 = arith.constant 0 : i32
    %c0_i32_1 = arith.constant 0 : i32
    return %c0_i32, %c0_i32_0 : i32, i32
  }
  func.func @transform_2(%arg0: i32) -> (i32, i32) {
    %c0_i32 = arith.constant 0 : i32
    %c0_i32_0 = arith.constant 0 : i32
    %c0_i32_1 = arith.constant 0 : i32
    return %c0_i32, %c0_i32_0 : i32, i32
  }
  func.func @transform_3(%arg0: i32) -> (i32, i32, i32) {
    %c0_i32 = arith.constant 0 : i32
    %c0_i32_0 = arith.constant 0 : i32
    %c0_i32_1 = arith.constant 0 : i32
    %c0_i32_2 = arith.constant 0 : i32
    return %c0_i32, %c0_i32_0, %c0_i32_1 : i32, i32, i32
  }
  func.func @transform_4(%arg0: i32) -> (i32, i32) {
    %c0_i32 = arith.constant 0 : i32
    %c0_i32_0 = arith.constant 0 : i32
    %c0_i32_1 = arith.constant 0 : i32
    return %c0_i32, %c0_i32_0 : i32, i32
  }
  func.func @transform_5(%arg0: i32) -> (i32, i32, i32) {
    %c0_i32 = arith.constant 0 : i32
    %c0_i32_0 = arith.constant 0 : i32
    %c0_i32_1 = arith.constant 0 : i32
    %c0_i32_2 = arith.constant 0 : i32
    return %c0_i32, %c0_i32_0, %c0_i32_1 : i32, i32, i32
  }
  func.func @transform_6(%arg0: i32) -> (i32, i32) {
    %c0_i32 = arith.constant 0 : i32
    %c0_i32_0 = arith.constant 0 : i32
    return %arg0, %c0_i32 : i32, i32
  }
}

</mosaic_0001>

<bundles_post_ra>
// kernel: tpu_custom_call.1
= control target key start
LH: loop header
LB: loop body
LE: loop exit
PB: predicated region body
PF: predicated region fallthrough
CT: control target
= control target key end

     0   :  { %11 = vsyncpa [#allocation3], 0  ;;  %s14125_s0 = inlined_call_operand.hbm [shape: bf16[1296,128], index: 0, kind: input, shape index: {}]   ;;  %s14126_s1 = inlined_call_operand.hbm [shape: bf16[128,128], index: 1, kind: input, shape index: {}]   ;;  %s14127_s2 = inlined_call_operand.vmem [shape: f32[1,128], index: 2, kind: input, shape index: {}]   ;;  %s14128_s3 = inlined_call_operand.hbm [shape: bf16[9,128,128], index: 3, kind: input, shape index: {}]   ;;  %s14129_s4 = inlined_call_operand.vmem [shape: f32[1,128], index: 4, kind: input, shape index: {}]   ;;  %s14130_s5 = inlined_call_operand.hbm [shape: f32[9,72,128], index: 5, kind: input, shape index: {}]   ;;  %s14131_s6 = inlined_call_operand.hbm [shape: f32[16,128], index: 6, kind: output, shape index: {}]  }
   0x1   :  { %13 = vsyncpa [#allocation3 + $0x1], 0 }
   0x2   :  { %14 = vsyncpa [#allocation6], 0 }
   0x3   :  { %15 = vsyncpa [#allocation9], 0 }
   0x4   :  { %16 = vsyncpa [#allocation4], 0 }
   0x5   :  { %18 = vsyncpa [#allocation4 + $0x1], 0  ;;  %s10965_s21 = smov 0   ;;  %s10967_s22 = smov 0  }
   0x6   :  { %s10969_s23 = smov 0   ;;  %s10971_s24 = smov 0  }
   0x7 LB: > { %s10986_s25 = sadd.s32 4294967295, %s10916_s24   ;;  %s9683_s26 = sadd.s32 4294967294, %s10916_s24   ;;  %s10916_s24 = sphi %s10971_s24, %s14442_s24   ;;  %s10912_s23 = sphi %s10969_s23, %s14441_s23   ;;  %s10908_s22 = sphi %s10967_s22, %s14440_s22   ;;  %s10904_s21 = sphi %s10965_s21, %s14439_s21  }
   0x8   : > { %p44_p0 = scmp.ne.s32.totalorder %s10908_s22, %s10904_s21  ;;  %p14132_p1 = scmp.eq.s32.totalorder %s10986_s25, 0 }
   0x9   : > { %p179_p3 = scmp.eq.s32.totalorder %s9683_s26, 1  ;;  %p9684_p5 = scmp.ge.s32.totalorder %s10916_s24, 1 }
   0xa   : > { %p10995_p4 = por %p14132_p1, %p44_p0  ;;  %p186_p7 = scmp.lt.s32.totalorder %s10916_s24, 3 }
   0xb   : > { %p11000_p6 = por %p179_p3, %p44_p0  ;;  %s10918_s30 = smov [#allocation5]  }
   0xc   : > { %s14217_s27 = scalar_select %p10995_p4, 1, 0 }
   0xd   : > { %s14218_s28 = scalar_select %p11000_p6, 1, 0 }
   0xe   : > { %p11005_p8 = pnand %p9684_p5, %p186_p7  ;;  %s198_s7 = sshll.u32 %s10918_s30, 4  ;;  %s11009_s7 = int_to_ptr.vmem [resolvable:$true] %s198_s7 }
   0xf   : > { %s10919_s9 = smov [#allocation7]   ;;  %s10920_s11 = smov [#allocation8]  }
  0x10   : > { %s14219_s29 = scalar_select %p11005_p8, 1, 0 }
  0x11   : > { %p10527_p9 = pneg %p11005_p8  ;;  %s214_s10 = sshll.u32 %s10919_s9, 4  ;;  %s11020_s10 = int_to_ptr.vmem [resolvable:$true] %s214_s10 }
  0x12   : > { %s11022_s12 = sshll.u32 %s10920_s11, 4  ;;  %s10728_s15 = scalar_lea.hbm %s14126_s1, 1024  ;;  %s231_s12 = int_to_ptr.vmem [resolvable:$true] %s11022_s12 }
  0x13   : > { %p11016_p11 = pnand %p10527_p9, %p14132_p1  ;;  %p10729_p12 = scmp.ne.s32.totalorder %s14126_s1, %s10728_s15 }
  0x14   : > { %p10735_p5 = scmp.lt.u32.totalorder %s10728_s15, %s14126_s1 }
  0x15   : > { %p11032_p13 = pneg %p11016_p11 }
  0x17   : > { %p10731_p0 = pnand %p11032_p13, %p10729_p12 }
  0x19   : > { %p10732_p3 = pneg %p10731_p0 }
  0x1b   : > { %p10737_p7 = pnand %p10735_p5, %p10732_p3 }
  0x1d   : > { %10740 = shalt.err (!%p10737_p7)
}
  0x1e   : > { %s10741_s26 = scalar_lea.vmem %s11009_s7, 1024  ;;  %p10749_p2 = scmp.lt.s32.totalorder %s11009_s7, %s11009_s7 }
  0x1f   : > { %p10742_p9 = scmp.ne.s32.totalorder %s11009_s7, %s10741_s26  ;;  %p10750_p6 = scmp.lt.s32.totalorder %s10741_s26, %s10741_s26 }
  0x21   : > { %p10744_p10 = pnand %p10742_p9, %p11032_p13  ;;  %p10751_p12 = por %p10750_p6, %p10749_p2 }
  0x23   : > { %p10745_p1 = pneg %p10744_p10 }
  0x25   : > { %p10752_p0 = pnand %p10751_p12, %p10745_p1 }
  0x27   : > { %10755 = shalt.err (!%p10752_p0)
}
  0x28   : > { %s14135_s30 = smov 64   ;;  %s14136_s9 = smov 4  }
  0x29   : > { %10530 = dma.hbm_to_vmem [thread:$0]  (!%p11016_p11), %s14126_s1, 1024, %s11009_s7, [#allocation6], %s14135_s30, %s14135_s30, %s14136_s9  }
  0x2a   : > { %s10756_s16 = scalar_lea.hbm %s14128_s3, 9216 }
  0x2b   : > { %p10757_p1 = scmp.ne.s32.totalorder %s14128_s3, %s10756_s16  ;;  %p10763_p10 = scmp.lt.u32.totalorder %s10756_s16, %s14128_s3 }
  0x2d   : > { %p10759_p2 = pnand %p10757_p1, %p11032_p13 }
  0x2f   : > { %p10760_p6 = pneg %p10759_p2 }
  0x31   : > { %p10765_p3 = pnand %p10763_p10, %p10760_p6 }
  0x33   : > { %10768 = shalt.err (!%p10765_p3)
}
  0x34   : > { %s10769_s7 = scalar_lea.vmem %s11020_s10, 9216  ;;  %p10777_p12 = scmp.lt.s32.totalorder %s11020_s10, %s11020_s10 }
  0x35   : > { %p10770_p5 = scmp.ne.s32.totalorder %s11020_s10, %s10769_s7  ;;  %p10778_p0 = scmp.lt.s32.totalorder %s10769_s7, %s10769_s7 }
  0x37   : > { %p10772_p7 = pnand %p10770_p5, %p11032_p13  ;;  %p10779_p1 = por %p10778_p0, %p10777_p12 }
  0x39   : > { %p10773_p9 = pneg %p10772_p7 }
  0x3b   : > { %p10780_p2 = pnand %p10779_p1, %p10773_p9 }
  0x3d   : > { %10783 = shalt.err (!%p10780_p2)
}
  0x3e   : > { %10533 = dma.hbm_to_vmem [thread:$0]  (!%p11016_p11), %s14128_s3, 9216, %s11020_s10, [#allocation6], %s14135_s30, %s14135_s30, %s14136_s9  }
  0x3f   : > { %s10784_s16 = scalar_lea.hbm %s14130_s5, 10368 }
  0x40   : > { %p10785_p6 = scmp.ne.s32.totalorder %s14130_s5, %s10784_s16  ;;  %p10791_p5 = scmp.lt.u32.totalorder %s10784_s16, %s14130_s5 }
  0x42   : > { %p10787_p10 = pnand %p10785_p6, %p11032_p13 }
  0x44   : > { %p10788_p3 = pneg %p10787_p10 }
  0x46   : > { %p10793_p7 = pnand %p10791_p5, %p10788_p3 }
  0x48   : > { %10796 = shalt.err (!%p10793_p7)
}
  0x49   : > { %s10797_s7 = scalar_lea.vmem %s231_s12, 10368  ;;  %p10805_p1 = scmp.lt.s32.totalorder %s231_s12, %s231_s12 }
  0x4a   : > { %p10798_p9 = scmp.ne.s32.totalorder %s231_s12, %s10797_s7  ;;  %p10806_p2 = scmp.lt.s32.totalorder %s10797_s7, %s10797_s7 }
  0x4c   : > { %p10800_p12 = pnand %p10798_p9, %p11032_p13  ;;  %p10807_p4 = por %p10806_p2, %p10805_p1 }
  0x4e   : > { %p10801_p0 = pneg %p10800_p12 }
  0x50   : > { %p10808_p8 = pnand %p10807_p4, %p10801_p0 }
  0x52   : > { %10811 = shalt.err (!%p10808_p8)
}
  0x53   : > { %s10923_s10 = smov 128   ;;  %s10924_s18 = smov 8  }
  0x54   : > { %10536 = dma.hbm_to_vmem [thread:$0]  (!%p11016_p11), %s14130_s5, 10368, %s231_s12, [#allocation9], %s10923_s10, %s10923_s10, %s10924_s18  }
  0x55   : > { %s11102_s14 = sadd.s32 1, %s10916_s24   ;;  %s31_s16 = sadd.s32 1, %s10912_s23 }
  0x56   : > { %s28_s15 = ssub.s32 %s10916_s24, %s11102_s14  ;;  %p38_p8 = scmp.ne.s32.totalorder %s10912_s23, %s10908_s22 }
  0x57   : > { %p29_p4 = scmp.eq.s32.totalorder %s28_s15, 0  ;;  %p39_p13 = scmp.eq.s32.totalorder %s10916_s24, 0 }
  0x58   : > { %p10548_p6 = scmp.lt.s32.totalorder %s10916_s24, 2  ;;  %p14222_p3 = scmp.eq.s32.totalorder %s10986_s25, 1 }
  0x59   : > { %s11112_s17 = scalar_select %p29_p4, %s10912_s23, %s31_s16  }
  0x5a   : > { %p40_p10 = por %p39_p13, %p38_p8  ;;  %p11116_p5 = por %p14222_p3, %p38_p8 }
  0x5b   : > { %s244_s8 = sand.u32 1, %s10912_s23   ;;  %s9822_s20 = smul.u32 5184, %s10916_s24 }
  0x5c   : > { %s10509_s12 = smul.u32 324, %s244_s8  ;;  %p11122_p11 = pnand %p10548_p6, %p40_p10 }
  0x5d   : > { %s11129_s18 = scalar_lea.hbm %s14125_s0, %s9822_s20  ;;  %s11133_s15 = scalar_lea.sflag [#allocation3], %s244_s8 }
  0x5e   : > { %s248_s11 = scalar_lea.vmem [#allocation2], %s10509_s12  ;;  %s10812_s16 = scalar_lea.hbm %s11129_s18, 5184 }
  0x5f   : > { %s255_s13 = sshll.u32 %s248_s11, 4  ;;  %p10813_p7 = scmp.ne.s32.totalorder %s11129_s18, %s10812_s16  ;;  %s11131_s13 = int_to_ptr.vmem [resolvable:$true] %s255_s13 }
  0x60   : > { %p10814_p9 = pneg %p11122_p11  ;;  %s10817_s10 = scalar_lea.hbm %s14125_s0, 10368 }
  0x61   : > { %p10818_p1 = scmp.lt.u32.totalorder %s11129_s18, %s14125_s0  ;;  %p10819_p2 = scmp.lt.u32.totalorder %s10817_s10, %s10812_s16 }
  0x62   : > { %p10815_p12 = pnand %p10814_p9, %p10813_p7  ;;  %p10821_p8 = scmp.lt.u32.totalorder %s10812_s16, %s11129_s18 }
  0x63   : > { %p10820_p4 = por %p10819_p2, %p10818_p1 }
  0x64   : > { %p10816_p0 = pneg %p10815_p12 }
  0x65   : > { %p10822_p13 = por %p10821_p8, %p10820_p4 }
  0x67   : > { %p10823_p6 = pnand %p10822_p13, %p10816_p0 }
  0x69   : > { %10826 = shalt.err (!%p10823_p6)
}
  0x6a   : > { %s10827_s8 = scalar_lea.vmem %s11131_s13, 5184  ;;  %s10925_s12 = smov [#allocation2]  }
  0x6b   : > { %p10828_p10 = scmp.ne.s32.totalorder %s11131_s13, %s10827_s8  ;;  %s10832_s11 = sshll.u32 %s10925_s12, 4  ;;  %s10833_s11 = int_to_ptr.vmem [resolvable:$false] %s10832_s11 }
  0x6c   : > { %s10834_s30 = scalar_lea.vmem %s10833_s11, 10368  ;;  %p10835_p12 = scmp.lt.s32.totalorder %s11131_s13, %s10833_s11 }
  0x6d   : > { %p10830_p3 = pnand %p10828_p10, %p10814_p9  ;;  %p10836_p1 = scmp.lt.s32.totalorder %s10834_s30, %s10827_s8 }
  0x6f   : > { %p10831_p7 = pneg %p10830_p3  ;;  %p10837_p2 = por %p10836_p1, %p10835_p12 }
  0x71   : > { %p10838_p4 = pnand %p10837_p2, %p10831_p7 }
  0x73   : > { %10841 = shalt.err (!%p10838_p4)
}
  0x74   : > { %s14225_s9 = smov 4   ;;  %s14226_s16 = smov 64  }
  0x75   : > { %10540 = dma.hbm_to_vmem [thread:$0]  (!%p11122_p11), %s11129_s18, 5184, %s11131_s13, %s11133_s15, %s14226_s16, %s14226_s16, %s14225_s9  }
  0x76   : > { %p14227_p9 = scmp.ne.s32.totalorder %s14219_s29, 0 }
  0x78   : > { %267 = sbr.rel (%p14227_p9) target bundleno = 1506 (0x5e2), region = 44 }
  0x7f   : > { %s11167_s20 = sand.u32 1, %s10908_s22   ;;  %p14228_p0 = scmp.ne.s32.totalorder %s14217_s27, 0 }
  0x80   : > { %s10510_s7 = smul.u32 324, %s11167_s20  ;;  %s270_s10 = scalar_lea.sflag [#allocation3], %s11167_s20 }
  0x82   : > { %s11171_s8 = scalar_lea.vmem [#allocation2], %s10510_s7 }
  0x83   : > { %10887 = dma.done.wait (%p14228_p0), %s270_s10, 5184  }
  0x84   : > { %10889 = vsyncadd (%p14228_p0), %s270_s10, 4294962112  ;;  %p14229_p11 = scmp.eq.s32.totalorder %s10986_s25, 0 }
  0x86   : > { %10891 = dma.done.wait (%p14229_p11), [#allocation6], 10240   ;;  %p14230_p8 = pmov %p14229_p11 }
  0x88   : > { %10893 = vsyncadd (%p14230_p8), [#allocation6], 4294957056  ;;  %p14231_p13 = pmov %p14230_p8 }
  0x89   : > { %p14232_p6 = pmov %p14230_p8 }
  0x8a   : > { %10895 = dma.done.wait (%p14231_p13), [#allocation9], 10368  }
  0x8b   : > { %10897 = vsyncadd (%p14232_p6), [#allocation9], 4294956928  ;;  %v14137_v0 = vmov 0.0   ;;  %vm10927_vm0 = vmmov 0   ;;  %v10595_v1 = vld [vmem:[#allocation5] sm:$0xff]   ;;  %v10596_v2 = vld [vmem:[#allocation5 + $0x8] sm:$0xff]   ;;  %v1157_v37 = vlaneseq }
  0x8c   : > { %9989 = vmatprep.subr.bf16.mxu0 %v14137_v0  ;;  %10005 = vmatprep.mubr.msk.bf16.mxu0 %vm10927_vm0, %v14137_v0  ;;  %v10597_v3 = vld [vmem:[#allocation5 + $0x10] sm:$0xff]   ;;  %v10598_v4 = vld [vmem:[#allocation5 + $0x18] sm:$0xff]   ;;  %v10599_v5 = vld [vmem:[#allocation5 + $0x20] sm:$0xff]   ;;  %v10928_v35 = vmov 1966171168   ;;  %vm7912_vm1 = vcmask 1041409  }
  0x8d   : > { %10169 = vmatprep.subr.bf16.mxu1 %v14137_v0  ;;  %10185 = vmatprep.mubr.msk.bf16.mxu1 %vm10927_vm0, %v14137_v0  ;;  %v10600_v6 = vld [vmem:[#allocation5 + $0x28] sm:$0xff]   ;;  %v10601_v7 = vld [vmem:[#allocation5 + $0x30] sm:$0xff]   ;;  %v10602_v8 = vld [vmem:[#allocation5 + $0x38] sm:$0xff]   ;;  %v1155_v36 = vunpack.c.l.s4 %v10928_v35  ;;  %v11278_v40 = vshrl.u32 %v1157_v37, 7  ;;  %vm7915_vm2 = vcmask 1042434   ;;  %vm7918_vm3 = vcmask 1043459  }
  0x8e   : > { %9990 = vmatpush3.bf16.msra.mxu0 %v10595_v1  ;;  %v10603_v9 = vld [vmem:[%s11171_s8] sm:$0xff]   ;;  %v10604_v10 = vld [vmem:[%s11171_s8 + $0x8] sm:$0xff]   ;;  %v10605_v11 = vld [vmem:[%s11171_s8 + $0x10] sm:$0xff]   ;;  %vm7921_vm4 = vcmask 1044484   ;;  %vm7924_vm8 = vcmask 1045509   ;;  %vm7927_vm9 = vcmask 1046534  }
  0x8f   : > { %9991 = vmatprep.subr.bf16.mxu0 %v14137_v0  ;;  %v10606_v12 = vld [vmem:[%s11171_s8 + $0x18] sm:$0xff]   ;;  %v10607_v13 = vld [vmem:[%s11171_s8 + $0x20] sm:$0xff]   ;;  %v10608_v14 = vld [vmem:[%s11171_s8 + $0x28] sm:$0xff]   ;;  %v1156_v39 = vunpack.c.0.s8 %v1155_v36  ;;  %vm7498_vm5 = vcmp.lt.s32.totalorder %v11278_v40, 1  ;;  %vm6951_vm6 = vcmp.lt.s32.totalorder %v11278_v40, 7  ;;  %vm7009_vm7 = vcmp.lt.s32.totalorder %v11278_v40, 6 }
  0x90   : > { %v10609_v15 = vld [vmem:[%s11171_s8 + $0x30] sm:$0xff]   ;;  %v10610_v16 = vld [vmem:[%s11171_s8 + $0x38] sm:$0xff]   ;;  %v10611_v17 = vld [vmem:[%s11171_s8 + $0x40] sm:$0xff]   ;;  %vm7930_vm10 = vcmask 1047559   ;;  %vm7309_vm11 = vcmp.lt.s32.totalorder %v11278_v40, 5  ;;  %vm8362_vm12 = vcmp.lt.s32.totalorder %v11278_v40, 3 }
  0x91   : > { %v10612_v18 = vld [vmem:[%s11171_s8 + $0x48] sm:$0xff]   ;;  %v10613_v19 = vld [vmem:[%s11171_s8 + $0x50] sm:$0xff]   ;;  %v10614_v20 = vld [vmem:[%s11171_s8 + $0x58] sm:$0xff]   ;;  %v11288_v42 = vsub.s32 %v1156_v39, %v11278_v40  ;;  %vm8551_vm13 = vcmp.lt.s32.totalorder %v11278_v40, 2  ;;  %s9694_s10 = sshll.u32 %s11167_s20, 3  ;;  %s9571_s15 = scalar_lea.sflag [#allocation4], %s11167_s20 }
  0x92   : > { %9992 = vmatpush3.bf16.msra.mxu0 %v10596_v2  ;;  %v10615_v21 = vld [vmem:[%s11171_s8 + $0x60] sm:$0xff]   ;;  %v10616_v22 = vld [vmem:[%s11171_s8 + $0x68] sm:$0xff]   ;;  %v10617_v23 = vld [vmem:[%s11171_s8 + $0x70] sm:$0xff]   ;;  %s313_s27 = scalar_lea.vmem [#allocation10], %s9694_s10  ;;  %s10929_s12 = smov [#allocation10]  }
  0x93   : > { %9993 = vmatprep.subr.bf16.mxu0 %v14137_v0  ;;  %v10618_v24 = vld [vmem:[%s11171_s8 + $0x78] sm:$0xff]   ;;  %v10619_v25 = vld [vmem:[%s11171_s8 + $0x80] sm:$0xff]   ;;  %v10620_v26 = vld [vmem:[%s11171_s8 + $0x88] sm:$0xff]   ;;  %14233 = vst [vmem:[#allocation15_spill] sm:$0xff] %v11288_v42  ;;  %s9584_s29 = sshll.u32 %s313_s27, 4  ;;  %s10846_s11 = sshll.u32 %s10929_s12, 4  ;;  %s14083_s29 = int_to_ptr.vmem [resolvable:$true] %s9584_s29  ;;  %s10847_s11 = int_to_ptr.vmem [resolvable:$false] %s10846_s11 }
  0x94   : > { %v10621_v27 = vld [vmem:[%s11171_s8 + $0x90] sm:$0xff]   ;;  %v10622_v28 = vld [vmem:[%s11171_s8 + $0x98] sm:$0xff]   ;;  %v10623_v29 = vld [vmem:[%s11171_s8 + $0xa0] sm:$0xff]   ;;  %s10848_s30 = scalar_lea.vmem %s10847_s11, 256  ;;  %p10849_p12 = scmp.lt.s32.totalorder %s14083_s29, %s10847_s11 }
  0x95   : > { %v10624_v30 = vld [vmem:[%s11171_s8 + $0xa8] sm:$0xff]   ;;  %v10625_v31 = vld [vmem:[%s11171_s8 + $0xb0] sm:$0xff]   ;;  %v10626_v32 = vld [vmem:[%s11171_s8 + $0xb8] sm:$0xff]  }
  0x96   : > { %9994 = vmatpush3.bf16.msra.mxu0 %v10597_v3  ;;  %v10627_v33 = vld [vmem:[%s11171_s8 + $0xc0] sm:$0xff]   ;;  %v10628_v34 = vld [vmem:[%s11171_s8 + $0xc8] sm:$0xff]   ;;  %v10629_v38 = vld [vmem:[%s11171_s8 + $0xd0] sm:$0xff]  }
  0x97   : > { %9995 = vmatprep.subr.bf16.mxu0 %v14137_v0  ;;  %v11283_v41 = vld [vmem:[%s14127_s2] ss:$0 sm:$0xff] }
  0x98   : > { %v10630_v46 = vld [vmem:[%s11171_s8 + $0xd8] sm:$0xff]  }
  0x9a   : > { %9996 = vmatpush3.bf16.msra.mxu0 %v10598_v4 }
  0x9b   : > { %9997 = vmatprep.subr.bf16.mxu0 %v14137_v0 }
  0x9e   : > { %9998 = vmatpush3.bf16.msra.mxu0 %v10599_v5 }
  0x9f   : > { %9999 = vmatprep.subr.bf16.mxu0 %v14137_v0 }
  0xa2   : > { %10000 = vmatpush3.bf16.msra.mxu0 %v10600_v6  ;;  %v10631_v6 = vld [vmem:[%s11171_s8 + $0xe0] sm:$0xff]  }
  0xa3   : > { %10001 = vmatprep.subr.bf16.mxu0 %v14137_v0 }
  0xa6   : > { %10002 = vmatpush3.bf16.msra.mxu0 %v10601_v7 }
  0xa7   : > { %10003 = vmatprep.subr.bf16.mxu0 %v14137_v0 }
  0xaa   : > { %10004 = vmatpush3.bf16.msra.mxu0 %v10602_v8 }
  0xab   : > { %10457 = vmatprep.subr.bf16.mxu0 %v14137_v0 }
  0xad   : > { %10006 = vmatmul.mubr.bf16.vlgmr.msra.gmra.mrb[0].mxu0 %v10603_v9 }
  0xae   : > { %10009 = vmatprep.mubr.msk.bf16.mxu0 %vm10927_vm0, %v14137_v0 }
  0xb5   : > { %10010 = vmatmul.mubr.bf16.gmra.mrb[4].mxu0 %v10604_v10 }
  0xb6   : > { %10013 = vmatprep.mubr.msk.bf16.mxu0 %vm10927_vm0, %v14137_v0 }
  0xbd   : > { %10014 = vmatmul.mubr.bf16.gmra.mrb[8].mxu0 %v10605_v11 }
  0xbe   : > { %10017 = vmatprep.mubr.msk.bf16.mxu0 %vm10927_vm0, %v14137_v0 }
  0xc5   : > { %10018 = vmatmul.mubr.bf16.gmra.mrb[12].mxu0 %v10606_v12 }
  0xc6   : > { %10021 = vmatprep.mubr.msk.bf16.mxu0 %vm10927_vm0, %v14137_v0 }
  0xcd   : > { %10022 = vmatmul.mubr.bf16.gmra.mrb[16].mxu0 %v10607_v13 }
  0xce   : > { %10025 = vmatprep.mubr.msk.bf16.mxu0 %vm10927_vm0, %v14137_v0 }
  0xd5   : > { %10026 = vmatmul.mubr.bf16.gmra.mrb[20].mxu0 %v10608_v14 }
  0xd6   : > { %10029 = vmatprep.mubr.msk.bf16.mxu0 %vm10927_vm0, %v14137_v0 }
  0xdd   : > { %10030 = vmatmul.mubr.bf16.gmra.mrb[24].mxu0 %v10609_v15 }
  0xde   : > { %10033 = vmatprep.mubr.msk.bf16.mxu0 %vm10927_vm0, %v14137_v0 }
  0xe5   : > { %10034 = vmatmul.mubr.bf16.gmra.mrb[28].mxu0 %v10610_v16 }
  0xe6   : > { %10037 = vmatprep.mubr.msk.bf16.mxu0 %vm10927_vm0, %v14137_v0 }
  0xed   : > { %10038 = vmatmul.mubr.bf16.gmra.mrb[32].mxu0 %v10611_v17 }
  0xee   : > { %10041 = vmatprep.mubr.msk.bf16.mxu0 %vm10927_vm0, %v14137_v0 }
  0xf5   : > { %10042 = vmatmul.mubr.bf16.gmra.mrb[36].mxu0 %v10612_v18 }
  0xf6   : > { %10045 = vmatprep.mubr.msk.bf16.mxu0 %vm10927_vm0, %v14137_v0 }
  0xfd   : > { %10046 = vmatmul.mubr.bf16.gmra.mrb[40].mxu0 %v10613_v19 }
  0xfe   : > { %10049 = vmatprep.mubr.msk.bf16.mxu0 %vm10927_vm0, %v14137_v0 }
 0x105   : > { %10050 = vmatmul.mubr.bf16.gmra.mrb[44].mxu0 %v10614_v20 }
 0x106   : > { %10053 = vmatprep.mubr.msk.bf16.mxu0 %vm10927_vm0, %v14137_v0 }
 0x10d   : > { %10054 = vmatmul.mubr.bf16.gmra.mrb[48].mxu0 %v10615_v21 }
 0x10e   : > { %10057 = vmatprep.mubr.msk.bf16.mxu0 %vm10927_vm0, %v14137_v0 }
 0x115   : > { %10058 = vmatmul.mubr.bf16.gmra.mrb[52].mxu0 %v10616_v22 }
 0x116   : > { %10061 = vmatprep.mubr.msk.bf16.mxu0 %vm10927_vm0, %v14137_v0 }
 0x11d   : > { %10062 = vmatmul.mubr.bf16.gmra.mrb[56].mxu0 %v10617_v23 }
 0x11e   : > { %10065 = vmatprep.mubr.msk.bf16.mxu0 %vm10927_vm0, %v14137_v0 }
 0x125   : > { %10066 = vmatmul.mubr.bf16.gmra.mrb[60].mxu0 %v10618_v24 }
 0x126   : > { %10069 = vmatprep.mubr.msk.bf16.mxu0 %vm10927_vm0, %v14137_v0 }
 0x12d   : > { %10070 = vmatmul.mubr.bf16.gmra.mrb[64].mxu0 %v10619_v25 }
 0x12e   : > { %10073 = vmatprep.mubr.msk.bf16.mxu0 %vm10927_vm0, %v14137_v0 }
 0x135   : > { %10074 = vmatmul.mubr.bf16.gmra.mrb[68].mxu0 %v10620_v26 }
 0x136   : > { %10077 = vmatprep.mubr.msk.bf16.mxu0 %vm10927_vm0, %v14137_v0 }
 0x13d   : > { %10078 = vmatmul.mubr.bf16.gmra.mrb[72].mxu0 %v10621_v27 }
 0x13e   : > { %10081 = vmatprep.mubr.msk.bf16.mxu0 %vm10927_vm0, %v14137_v0 }
 0x145   : > { %10082 = vmatmul.mubr.bf16.gmra.mrb[76].mxu0 %v10622_v28 }
 0x146   : > { %10085 = vmatprep.mubr.msk.bf16.mxu0 %vm10927_vm0, %v14137_v0 }
 0x14d   : > { %10086 = vmatmul.mubr.bf16.gmra.mrb[80].mxu0 %v10623_v29 }
 0x14e   : > { %10089 = vmatprep.mubr.msk.bf16.mxu0 %vm10927_vm0, %v14137_v0 }
 0x155   : > { %10090 = vmatmul.mubr.bf16.gmra.mrb[84].mxu0 %v10624_v30 }
 0x156   : > { %10093 = vmatprep.mubr.msk.bf16.mxu0 %vm10927_vm0, %v14137_v0 }
 0x15d   : > { %10094 = vmatmul.mubr.bf16.gmra.mrb[88].mxu0 %v10625_v31 }
 0x15e   : > { %10097 = vmatprep.mubr.msk.bf16.mxu0 %vm10927_vm0, %v14137_v0 }
 0x165   : > { %10098 = vmatmul.mubr.bf16.gmra.mrb[92].mxu0 %v10626_v32 }
 0x166   : > { %10101 = vmatprep.mubr.msk.bf16.mxu0 %vm10927_vm0, %v14137_v0 }
 0x16d   : > { %10102 = vmatmul.mubr.bf16.gmra.mrb[96].mxu0 %v10627_v33 }
 0x16e   : > { %10105 = vmatprep.mubr.msk.bf16.mxu0 %vm10927_vm0, %v14137_v0 }
 0x175   : > { %10106 = vmatmul.mubr.bf16.gmra.mrb[100].mxu0 %v10628_v34 }
 0x176   : > { %10109 = vmatprep.mubr.msk.bf16.mxu0 %vm10927_vm0, %v14137_v0 }
 0x17d   : > { %10110 = vmatmul.mubr.bf16.gmra.mrb[104].mxu0 %v10629_v38 }
 0x17e   : > { %10113 = vmatprep.mubr.msk.bf16.mxu0 %vm10927_vm0, %v14137_v0 }
 0x180   : > { %v746_v43 = vpop.f32.mrb[0].mxu0 }
 0x181   : > { %v747_v44 = vadd.f32 %v11283_v41, %v746_v43  ;;  %v10007_v45 = vpop.f32.mrb[1].mxu0 }
 0x182   : > { %v749_v47 = vpop.f32.mrb[2].mxu0 }
 0x183   : > { %v1153_v48 = vcombine.high %v747_v44, %v747_v44  ;;  %v1160_v49 = vrot.slane %v747_v44, %v11288_v42  ;;  %v750_v50 = vadd.f32 %v11283_v41, %v749_v47  ;;  %v10008_v51 = vpop.f32.mrb[3].mxu0 }
 0x185   : > { %v1167_v52 = vrot.slane %v1153_v48, %v11288_v42  ;;  %v1168_v53 = vcombine.high %v1160_v49, %v1160_v49  ;;  %v1176_v54 = vrot.slane %v1160_v49, %v11288_v42  ;;  %v1202_v55 = vcombine.high %v750_v50, %v750_v50  ;;  %10114 = vmatmul.mubr.bf16.gmra.mrb[108].mxu0 %v10630_v46  ;;  %v10632_v46 = vld [vmem:[%s11171_s8 + $0xe8] sm:$0xff]  }
 0x186   : > { %v1209_v56 = vrot.slane %v750_v50, %v11288_v42  ;;  %10117 = vmatprep.mubr.msk.bf16.mxu0 %vm10927_vm0, %v14137_v0 }
 0x187   : > { %v1169_v57 = vcombine.high %v1167_v52, %v1167_v52  ;;  %v1183_v58 = vrot.slane %v1167_v52, %v11288_v42  ;;  %v1190_v59 = vrot.slane %v1168_v53, %v11288_v42  ;;  %v1216_v60 = vrot.slane %v1202_v55, %v11288_v42 }
 0x188   : > { %v1217_v61 = vcombine.high %v1209_v56, %v1209_v56  ;;  %v11303_v62 = vrot.slane %v1209_v56, %v11288_v42  ;;  %v754_v63 = vpop.f32.mrb[4].mxu0  ;;  %v1198_v2 = vcombine.high %v1176_v54, %v1176_v54 }
 0x189   : > { %v11306_v1 = vrot.slane %v1169_v57, %v11288_v42  ;;  %v1200_v3 = vcombine.high %v1190_v59, %v1190_v59  ;;  %v5770_v4 = vmax.f32 %v1176_v54, %v1190_v59  ;;  %v10011_v5 = vpop.f32.mrb[5].mxu0  ;;  %v1218_v7 = vcombine.high %v1216_v60, %v1216_v60 }
 0x18a   : > { %v1232_v8 = vrot.slane %v1216_v60, %v11288_v42  ;;  %v1239_v9 = vrot.slane %v1217_v61, %v11288_v42  ;;  %v1247_v10 = vcombine.high %v11303_v62, %v11303_v62  ;;  %v757_v11 = vpop.f32.mrb[6].mxu0  ;;  %v1199_v12 = vcombine.high %v1183_v58, %v1183_v58 }
 0x18b   : > { %v11313_v13 = vmax.f32 %v1200_v3, %v1183_v58  ;;  %v1201_v14 = vcombine.high %v11306_v1, %v11306_v1  ;;  %v755_v15 = vadd.f32 %v11283_v41, %v754_v63  ;;  %v10012_v16 = vpop.f32.mrb[7].mxu0  ;;  %v5986_v17 = vmax.f32 %v5770_v4, %v1198_v2 }
 0x18c   : > { %v1246_v18 = vrot.slane %v1218_v7, %v11288_v42  ;;  %v1249_v19 = vcombine.high %v1239_v9, %v1239_v9  ;;  %v5773_v20 = vmax.f32 %v1239_v9, %v1247_v10  ;;  %v1248_v21 = vcombine.high %v1232_v8, %v1232_v8 }
 0x18d   : > { %v11319_v22 = vmax.f32 %v1199_v12, %v1201_v14  ;;  %v1251_v23 = vcombine.high %v755_v15, %v755_v15  ;;  %v1258_v24 = vrot.slane %v755_v15, %v11288_v42  ;;  %10118 = vmatmul.mubr.bf16.gmra.mrb[112].mxu0 %v10631_v6  ;;  %v5987_v25 = vmax.f32 %v11313_v13, %v11306_v1 }
 0x18e   : > { %v5774_v26 = vmax.f32 %v1232_v8, %v1246_v18  ;;  %v1250_v27 = vcombine.high %v1246_v18, %v1246_v18  ;;  %v758_v28 = vadd.f32 %v11283_v41, %v757_v11  ;;  %10121 = vmatprep.mubr.msk.bf16.mxu0 %vm10927_vm0, %v14137_v0  ;;  %v5989_v33 = vmax.f32 %v5773_v20, %v1249_v19 }
 0x18f   : > { %v5988_v29 = vmax.f32 %v11319_v22, %v11303_v62  ;;  %v1265_v30 = vrot.slane %v1251_v23, %v11288_v42  ;;  %v1266_v31 = vcombine.high %v1258_v24, %v1258_v24  ;;  %v1274_v32 = vrot.slane %v1258_v24, %v11288_v42  ;;  %v10633_v23 = vld [vmem:[%s11171_s8 + $0xf0] sm:$0xff]  }
 0x190   : > { %v1300_v34 = vcombine.high %v758_v28, %v758_v28  ;;  %v1307_v35 = vrot.slane %v758_v28, %v11288_v42  ;;  %v762_v36 = vpop.f32.mrb[8].mxu0  ;;  %v11332_v37 = vmax.f32 %v5774_v26, %v1248_v21 }
 0x191   : > { %v1267_v38 = vcombine.high %v1265_v30, %v1265_v30  ;;  %v1281_v39 = vrot.slane %v1265_v30, %v11288_v42  ;;  %v11336_v43 = vrot.slane %v1266_v31, %v11288_v42  ;;  %v1296_v44 = vcombine.high %v1274_v32, %v1274_v32  ;;  %v10015_v45 = vpop.f32.mrb[9].mxu0 }
 0x192   : > { %v11339_v47 = vmax.f32 %v1250_v27, %v1274_v32  ;;  %v1314_v48 = vrot.slane %v1300_v34, %v11288_v42  ;;  %v1315_v49 = vcombine.high %v1307_v35, %v1307_v35  ;;  %v1323_v50 = vrot.slane %v1307_v35, %v11288_v42  ;;  %v765_v51 = vpop.f32.mrb[10].mxu0 }
 0x193   : > { %v1295_v52 = vrot.slane %v1267_v38, %v11288_v42  ;;  %v1297_v53 = vcombine.high %v1281_v39, %v1281_v39  ;;  %v1298_v54 = vcombine.high %v11336_v43, %v11336_v43  ;;  %v763_v55 = vadd.f32 %v11283_v41, %v762_v36  ;;  %v10016_v56 = vpop.f32.mrb[11].mxu0 }
 0x194   : > { %v5991_v57 = vmax.f32 %v11339_v47, %v11336_v43  ;;  %v1316_v58 = vcombine.high %v1314_v48, %v1314_v48  ;;  %v1330_v59 = vrot.slane %v1314_v48, %v11288_v42  ;;  %v1337_v60 = vrot.slane %v1315_v49, %v11288_v42 }
 0x195   : > { %v1299_v61 = vcombine.high %v1295_v52, %v1295_v52  ;;  %v5776_v62 = vmax.f32 %v1296_v44, %v1298_v54  ;;  %v5777_v63 = vmax.f32 %v1295_v52, %v1297_v53  ;;  %v1345_v2 = vcombine.high %v1323_v50, %v1323_v50  ;;  %10122 = vmatmul.mubr.bf16.gmra.mrb[116].mxu0 %v10632_v46 }
 0x196   : > { %v1344_v3 = vrot.slane %v1316_v58, %v11288_v42  ;;  %v1346_v4 = vcombine.high %v1330_v59, %v1330_v59  ;;  %v1347_v5 = vcombine.high %v1337_v60, %v1337_v60  ;;  %v5778_v6 = vmax.f32 %v1323_v50, %v1337_v60  ;;  %10125 = vmatprep.mubr.msk.bf16.mxu0 %vm10927_vm0, %v14137_v0 }
 0x197   : > { %v5992_v7 = vmax.f32 %v5776_v62, %v1281_v39  ;;  %v5993_v8 = vmax.f32 %v5777_v63, %v1299_v61  ;;  %v1349_v9 = vcombine.high %v763_v55, %v763_v55  ;;  %v1356_v10 = vrot.slane %v763_v55, %v11288_v42 }
 0x198   : > { %v5779_v11 = vmax.f32 %v1347_v5, %v1330_v59  ;;  %v5994_v12 = vmax.f32 %v5778_v6, %v1345_v2  ;;  %v1348_v14 = vcombine.high %v1344_v3, %v1344_v3  ;;  %v766_v15 = vadd.f32 %v11283_v41, %v765_v51  ;;  %v770_v16 = vpop.f32.mrb[12].mxu0 }
 0x199   : > { %v6202_v18 = vmax.f32 %v5986_v17, %v5992_v7  ;;  %v1363_v19 = vrot.slane %v1349_v9, %v11288_v42  ;;  %v1364_v20 = vcombine.high %v1356_v10, %v1356_v10  ;;  %v1372_v21 = vrot.slane %v1356_v10, %v11288_v42  ;;  %v10019_v22 = vpop.f32.mrb[13].mxu0 }
 0x19a   : > { %v5995_v24 = vmax.f32 %v5779_v11, %v1344_v3  ;;  %v11359_v26 = vmax.f32 %v5988_v29, %v5994_v12  ;;  %v5780_v27 = vmax.f32 %v1346_v4, %v1348_v14  ;;  %v1398_v28 = vcombine.high %v766_v15, %v766_v15  ;;  %v773_v30 = vpop.f32.mrb[14].mxu0  ;;  %v10634_v4 = vld [vmem:[%s11171_s8 + $0xf8] sm:$0xff]  }
 0x19b   : > { %v1365_v31 = vcombine.high %v1363_v19, %v1363_v19  ;;  %v1379_v32 = vrot.slane %v1363_v19, %v11288_v42  ;;  %v1386_v34 = vrot.slane %v1364_v20, %v11288_v42  ;;  %v1394_v35 = vcombine.high %v1372_v21, %v1372_v21  ;;  %v10020_v17 = vpop.f32.mrb[15].mxu0 }
 0x19c   : > { %v6205_v36 = vmax.f32 %v5989_v33, %v5995_v24  ;;  %v5996_v38 = vmax.f32 %v5780_v27, %v1372_v21  ;;  %v1405_v39 = vrot.slane %v766_v15, %v11288_v42  ;;  %v1412_v44 = vrot.slane %v1398_v28, %v11288_v42 }
 0x19d   : > { %v1393_v45 = vrot.slane %v1365_v31, %v11288_v42  ;;  %v1395_v29 = vcombine.high %v1379_v32, %v1379_v32  ;;  %v1396_v46 = vcombine.high %v1386_v34, %v1386_v34  ;;  %v5781_v48 = vmax.f32 %v1386_v34, %v1394_v35  ;;  %10126 = vmatmul.mubr.bf16.gmra.mrb[120].mxu0 %v10633_v23 }
 0x19e   : > { %v11367_v49 = vmax.f32 %v11332_v37, %v5996_v38  ;;  %v1413_v50 = vcombine.high %v1405_v39, %v1405_v39  ;;  %v1414_v51 = vcombine.high %v1412_v44, %v1412_v44  ;;  %v1421_v52 = vrot.slane %v1405_v39, %v11288_v42  ;;  %10129 = vmatprep.mubr.msk.bf16.mxu0 %vm10927_vm0, %v14137_v0 }
 0x19f   : > { %v5782_v33 = vmax.f32 %v1379_v32, %v1393_v45  ;;  %v5997_v53 = vmax.f32 %v5781_v48, %v1396_v46  ;;  %v1397_v54 = vcombine.high %v1393_v45, %v1393_v45  ;;  %v1428_v55 = vrot.slane %v1412_v44, %v11288_v42 }
 0x1a0   : > { %v1435_v56 = vrot.slane %v1413_v50, %v11288_v42  ;;  %v1442_v58 = vrot.slane %v1414_v51, %v11288_v42  ;;  %v1443_v59 = vcombine.high %v1421_v52, %v1421_v52  ;;  %v6203_v37 = vmax.f32 %v5987_v25, %v5993_v8  ;;  %v11378_v60 = vpop.f32.mrb[16].mxu0 }
 0x1a1   : > { %v5998_v61 = vmax.f32 %v5782_v33, %v1395_v29  ;;  %v11383_v62 = vmax.f32 %v5991_v57, %v5997_v53  ;;  %v1444_v63 = vcombine.high %v1428_v55, %v1428_v55  ;;  %v5783_v2 = vmax.f32 %v1397_v54, %v1421_v52  ;;  %v10023_v3 = vpop.f32.mrb[17].mxu0 }
 0x1a2   : > { %v1445_v5 = vcombine.high %v1435_v56, %v1435_v56  ;;  %v1446_v6 = vcombine.high %v1442_v58, %v1442_v58  ;;  %v771_v7 = vadd.f32 %v11283_v41, %v770_v16  ;;  %v774_v9 = vadd.f32 %v11283_v41, %v773_v30  ;;  %v11388_v1 = vpop.f32.mrb[18].mxu0 }
 0x1a3   : > { %v6274_v13 = vmax.f32 %v6202_v18, %v5998_v61  ;;  %v5785_v25 = vmax.f32 %v1442_v58, %v1444_v63  ;;  %v5999_v8 = vmax.f32 %v5783_v2, %v1435_v56  ;;  %v10024_v10 = vpop.f32.mrb[19].mxu0 }
 0x1a4   : > { %v5784_v11 = vmax.f32 %v1443_v59, %v1445_v5  ;;  %v1447_v43 = vcombine.high %v771_v7, %v771_v7  ;;  %v1454_v47 = vrot.slane %v771_v7, %v11288_v42  ;;  %v1496_v20 = vcombine.high %v774_v9, %v774_v9  ;;  %v10644_v7 = vld [vmem:[#allocation7 + $0x200] sm:$0xff]  }
 0x1a5   : > { %v6346_v57 = vmax.f32 %v6274_v13, 0.0  ;;  %v6001_v12 = vmax.f32 %v5785_v25, %v1446_v6  ;;  %v6275_v14 = vmax.f32 %v6203_v37, %v5999_v8  ;;  %10130 = vmatmul.mubr.bf16.gmra.mrb[124].mxu0 %v10634_v4  ;;  %v1503_v28 = vrot.slane %v774_v9, %v11288_v42 }
 0x1a6   : > { %v6000_v15 = vmax.f32 %v5784_v11, %v1428_v55  ;;  %v1461_v16 = vrot.slane %v1447_v43, %v11288_v42  ;;  %v1462_v19 = vcombine.high %v1454_v47, %v1454_v47  ;;  %10133 = vmatprep.mubr.msk.bf16.mxu0 %vm10927_vm0, %v14137_v0  ;;  %v1470_v22 = vrot.slane %v1454_v47, %v11288_v42 }
 0x1a7   : > { %v6277_v18 = vmax.f32 %v6205_v36, %v6001_v12  ;;  %v6347_v21 = vmax.f32 %v6275_v14, 0.0  ;;  %v7678_v31 = vpack.c.bf16 %v6346_v57, %v6346_v57  ;;  %v10635_v36 = vld [vmem:[%s11171_s8 + $0x100] sm:$0xff]   ;;  %v1511_v6 = vcombine.high %v1503_v28, %v1503_v28  ;;  %v10636_v14 = vld [vmem:[%s11171_s8 + $0x108] sm:$0xff]   ;;  %10458 = vmatpush3.bf16.msra.mxu0 %v10644_v7 }
 0x1a8   : > { %v6276_v23 = vmax.f32 %v11359_v26, %v6000_v15  ;;  %v1463_v24 = vcombine.high %v1461_v16, %v1461_v16  ;;  %v1484_v27 = vrot.slane %v1462_v19, %v11288_v42  ;;  %v11398_v30 = vpop.f32.mrb[20].mxu0  ;;  %v1477_v39 = vrot.slane %v1461_v16, %v11288_v42  ;;  %10459 = vmatprep.subr.bf16.mxu0 %v14137_v0 }
 0x1a9   : > { %v6349_v32 = vmax.f32 %v6277_v18, 0.0  ;;  %v6490_v34 = vcombine.low %v6346_v57, %v6347_v21  ;;  %v7679_v35 = vpack.c.bf16 %v6347_v21, %v6347_v21  ;;  %v10027_v17 = vpop.f32.mrb[21].mxu0  ;;  %v1510_v26 = vrot.slane %v1496_v20, %v11288_v42 }
 0x1aa   : > { %v6348_v38 = vmax.f32 %v6276_v23, 0.0  ;;  %v1491_v44 = vrot.slane %v1463_v24, %v11288_v42  ;;  %v11404_v45 = vpop.f32.mrb[22].mxu0  ;;  %v1492_v48 = vcombine.high %v1470_v22, %v1470_v22  ;;  %v1494_v50 = vcombine.high %v1484_v27, %v1484_v27  ;;  %v10645_v24 = vld [vmem:[#allocation7 + $0x208] sm:$0xff]  }
 0x1ab   : > { %v7681_v29 = vpack.c.bf16 %v6349_v32, %v6349_v32  ;;  %v7840_v46 = vunpack.c.l.b16 %v7679_v35  ;;  %v10028_v51 = vpop.f32.mrb[23].mxu0  ;;  %v11407_v33 = vrot.slane %v6490_v34, %v11288_v42  ;;  %v5786_v54 = vmax.f32 %v1470_v22, %v1484_v27  ;;  %10460 = vmatpush3.bf16.msra.mxu0 %v10645_v24  ;;  %v10647_v24 = vld [vmem:[#allocation7 + $0x218] sm:$0xff]  }
 0x1ac   : > { %v6491_v52 = vcombine.low %v6348_v38, %v6349_v32  ;;  %v7680_v53 = vpack.c.bf16 %v6348_v38, %v6348_v38  ;;  %v7839_v55 = vunpack.c.l.b16 %v7678_v31  ;;  %v5787_v59 = vmax.f32 %v1494_v50, %v1477_v39  ;;  %10461 = vmatprep.subr.bf16.mxu0 %v14137_v0 }
 0x1ad   : > { %v7842_v56 = vunpack.c.l.b16 %v7681_v29  ;;  %v7911_v58 = vrot.slane %v7840_v46, 7  ;;  %10134 = vmatmul.mubr.bf16.gmra.mrb[128].mxu0 %v10635_v36  ;;  %v6002_v63 = vmax.f32 %v5786_v54, %v1492_v48  ;;  %v1512_v2 = vcombine.high %v1510_v26, %v1510_v26 }
 0x1ae   : > { %v11410_v37 = vrot.slane %v6491_v52, %v11288_v42  ;;  %v7841_v61 = vunpack.c.l.b16 %v7680_v53  ;;  %10137 = vmatprep.mubr.msk.bf16.mxu0 %vm10927_vm0, %v14137_v0  ;;  %v6003_v4 = vmax.f32 %v5787_v59, %v1491_v44  ;;  %v1495_v5 = vcombine.high %v1491_v44, %v1491_v44 }
 0x1af   : > { %v7913_v3 = vsel %vm7912_vm1, %v7911_v58, %v7839_v55  ;;  %v6278_v25 = vmax.f32 %v11367_v49, %v6002_v63  ;;  %v779_v8 = vadd.f32 %v11283_v41, %v11378_v60  ;;  %v7917_v11 = vrot.slane %v7842_v56, 5  ;;  %v10637_v55 = vld [vmem:[%s11171_s8 + $0x110] sm:$0xff]  }
 0x1b0   : > { %v6522_v9 = vcombine.low %v11407_v33, %v11410_v37  ;;  %v7914_v13 = vrot.slane %v7841_v61, 6  ;;  %v11420_v10 = vpop.f32.mrb[24].mxu0  ;;  %v1493_v43 = vcombine.high %v1477_v39, %v1477_v39  ;;  %v6279_v47 = vmax.f32 %v11383_v62, %v6003_v4 }
 0x1b1   : > { %v11424_v57 = vrot.slane %v1503_v28, %v11288_v42  ;;  %v10031_v12 = vpop.f32.mrb[25].mxu0  ;;  %v11428_v16 = vmax.f32 %v6278_v25, 0.0  ;;  %v11431_v49 = vrot.slane %v1512_v2, %v11288_v42  ;;  %v1533_v20 = vrot.slane %v1511_v6, %v11288_v42  ;;  %v10646_v6 = vld [vmem:[#allocation7 + $0x210] sm:$0xff]  }
 0x1b2   : > { %v7916_v15 = vsel %vm7915_vm2, %v7914_v13, %v7913_v3  ;;  %v11433_v60 = vpop.f32.mrb[26].mxu0  ;;  %v11436_v19 = vmax.f32 %v6279_v47, 0.0  ;;  %v11440_v18 = vmax.f32 %v1493_v43, %v1495_v5  ;;  %v11445_v23 = vrot.slane %v1510_v26, %v11288_v42  ;;  %10462 = vmatpush3.bf16.msra.mxu0 %v10646_v6 }
 0x1b3   : > { %v7919_v62 = vsel %vm7918_vm3, %v7917_v11, %v7916_v15  ;;  %v10032_v21 = vpop.f32.mrb[27].mxu0  ;;  %v7682_v22 = vpack.c.bf16 %v11428_v16, %v11428_v16  ;;  %v1541_v28 = vcombine.high %v11424_v57, %v11424_v57  ;;  %v1545_v32 = vcombine.high %v779_v8, %v779_v8  ;;  %10463 = vmatprep.subr.bf16.mxu0 %v14137_v0 }
 0x1b4   : > { %14234 = vst [vmem:[#allocation16_spill] sm:$0xff] %v11436_v19  ;;  %v6492_v27 = vcombine.low %v11428_v16, %v11436_v19  ;;  %v6004_v31 = vmax.f32 %v11440_v18, %v11424_v57  ;;  %v1544_v35 = vcombine.high %v11431_v49, %v11431_v49  ;;  %v1552_v17 = vrot.slane %v779_v8, %v11288_v42 }
 0x1b5   : > { %10138 = vmatmul.mubr.bf16.gmra.mrb[132].mxu0 %v10636_v14  ;;  %v7843_v34 = vunpack.c.l.b16 %v7682_v22  ;;  %v782_v36 = vadd.f32 %v11283_v41, %v11388_v1  ;;  %v1543_v38 = vcombine.high %v1533_v20, %v1533_v20  ;;  %v1559_v39 = vrot.slane %v1545_v32, %v11288_v42 }
 0x1b6   : > { %10141 = vmatprep.mubr.msk.bf16.mxu0 %vm10927_vm0, %v14137_v0  ;;  %v787_v44 = vadd.f32 %v11283_v41, %v11398_v30  ;;  %v1560_v29 = vcombine.high %v1552_v17, %v1552_v17  ;;  %v1568_v46 = vrot.slane %v1552_v17, %v11288_v42  ;;  %v5789_v50 = vmax.f32 %v1533_v20, %v1541_v28 }
 0x1b7   : > { %v7920_v26 = vrot.slane %v7843_v34, 4  ;;  %v1594_v48 = vcombine.high %v782_v36, %v782_v36  ;;  %v1561_v51 = vcombine.high %v1559_v39, %v1559_v39  ;;  %v11468_v52 = vrot.slane %v1559_v39, %v11288_v42  ;;  %10464 = vmatpush3.bf16.msra.mxu0 %v10647_v24 }
 0x1b8   : > { %v11465_v1 = vpop.f32.mrb[28].mxu0  ;;  %v1601_v53 = vrot.slane %v782_v36, %v11288_v42  ;;  %v1542_v56 = vcombine.high %v11445_v23, %v11445_v23  ;;  %v11478_v58 = vrot.slane %v1560_v29, %v11288_v42  ;;  %v11480_v59 = vmax.f32 %v1544_v35, %v1568_v46  ;;  %v10638_v29 = vld [vmem:[%s11171_s8 + $0x118] sm:$0xff]   ;;  %10465 = vmatprep.subr.bf16.mxu0 %v14137_v0 }
 0x1b9   : > { %v10035_v54 = vpop.f32.mrb[29].mxu0  ;;  %v11473_v30 = vsel %vm7921_vm4, %v7920_v26, %v7919_v62  ;;  %v11485_v63 = vrot.slane %v1561_v51, %v11288_v42  ;;  %v1591_v2 = vcombine.high %v11468_v52, %v11468_v52  ;;  %v1608_v3 = vrot.slane %v1594_v48, %v11288_v42 }
 0x1ba   : > { %14235 = vst [vmem:[#allocation17_spill] sm:$0xff] %v11473_v30  ;;  %v11482_v61 = vpop.f32.mrb[30].mxu0  ;;  %v1609_v4 = vcombine.high %v1601_v53, %v1601_v53  ;;  %v5790_v7 = vmax.f32 %v11445_v23, %v11431_v49  ;;  %v6007_v13 = vmax.f32 %v11480_v59, %v11478_v58  ;;  %v1617_v25 = vrot.slane %v1601_v53, %v11288_v42 }
 0x1bb   : > { %v10036_v5 = vpop.f32.mrb[31].mxu0  ;;  %v1643_v8 = vcombine.high %v787_v44, %v787_v44  ;;  %v6005_v11 = vmax.f32 %v5789_v50, %v1543_v38  ;;  %v1590_v43 = vcombine.high %v1568_v46, %v1568_v46  ;;  %v1610_v47 = vcombine.high %v1608_v3, %v1608_v3 }
 0x1bc   : > { %v1624_v12 = vrot.slane %v1608_v3, %v11288_v42  ;;  %v1592_v14 = vcombine.high %v11478_v58, %v11478_v58  ;;  %v1593_v15 = vcombine.high %v11485_v63, %v11485_v63  ;;  %v1631_v49 = vrot.slane %v1609_v4, %v11288_v42 }
 0x1bd   : > { %10142 = vmatmul.mubr.bf16.gmra.mrb[136].mxu0 %v10637_v55  ;;  %v1650_v62 = vrot.slane %v787_v44, %v11288_v42  ;;  %v11505_v20 = vmax.f32 %v11485_v63, %v1591_v2  ;;  %v1638_v21 = vrot.slane %v1610_v47, %v11288_v42  ;;  %v1639_v22 = vcombine.high %v1617_v25, %v1617_v25 }
 0x1be   : > { %10145 = vmatprep.mubr.msk.bf16.mxu0 %vm10927_vm0, %v14137_v0  ;;  %v1657_v23 = vrot.slane %v1643_v8, %v11288_v42  ;;  %v1640_v28 = vcombine.high %v1624_v12, %v1624_v12  ;;  %v1641_v32 = vcombine.high %v1631_v49, %v1631_v49  ;;  %v5794_v34 = vmax.f32 %v1617_v25, %v1631_v49 }
 0x1bf   : > { %v1658_v35 = vcombine.high %v1650_v62, %v1650_v62  ;;  %v1642_v36 = vcombine.high %v1638_v21, %v1638_v21  ;;  %v1666_v39 = vrot.slane %v1650_v62, %v11288_v42  ;;  %v790_v51 = vadd.f32 %v11283_v41, %v11404_v45 }
 0x1c0   : > { %v11509_v17 = vpop.f32.mrb[32].mxu0  ;;  %v1659_v38 = vcombine.high %v1657_v23, %v1657_v23  ;;  %v11514_v44 = vrot.slane %v1657_v23, %v11288_v42  ;;  %v5795_v46 = vmax.f32 %v1641_v32, %v1624_v12  ;;  %v6010_v48 = vmax.f32 %v5794_v34, %v1639_v22 }
 0x1c1   : > { %v10039_v26 = vpop.f32.mrb[33].mxu0  ;;  %v1680_v50 = vrot.slane %v1658_v35, %v11288_v42  ;;  %v11522_v54 = vmax.f32 %v1590_v43, %v1592_v14  ;;  %v1688_v2 = vcombine.high %v1666_v39, %v1666_v39  ;;  %v5796_v3 = vmax.f32 %v1640_v28, %v1642_v36 }
 0x1c2   : > { %v11520_v53 = vpop.f32.mrb[34].mxu0  ;;  %v11525_v55 = vrot.slane %v1659_v38, %v11288_v42  ;;  %v6011_v5 = vmax.f32 %v5795_v46, %v1638_v21  ;;  %v11530_v6 = vmax.f32 %v6004_v31, %v6010_v48  ;;  %v1692_v8 = vcombine.high %v790_v51, %v790_v51  ;;  %v10648_v31 = vld [vmem:[#allocation7 + $0x220] sm:$0xff]  }
 0x1c3   : > { %v10040_v4 = vpop.f32.mrb[35].mxu0  ;;  %v1690_v25 = vcombine.high %v1680_v50, %v1680_v50  ;;  %v1689_v45 = vcombine.high %v11514_v44, %v11514_v44  ;;  %v5797_v43 = vmax.f32 %v1680_v50, %v1688_v2  ;;  %v6006_v47 = vmax.f32 %v5790_v7, %v1542_v56  ;;  %10466 = vmatpush3.bf16.msra.mxu0 %v10648_v31  ;;  %v10639_v38 = vld [vmem:[%s11171_s8 + $0x120] sm:$0xff]  }
 0x1c4   : > { %v6012_v12 = vmax.f32 %v5796_v3, %v1666_v39  ;;  %v11535_v14 = vmax.f32 %v6005_v11, %v6011_v5  ;;  %v5798_v49 = vmax.f32 %v11514_v44, %v11525_v55  ;;  %v1699_v57 = vrot.slane %v790_v51, %v11288_v42  ;;  %10467 = vmatprep.subr.bf16.mxu0 %v14137_v0 }
 0x1c5   : > { %10146 = vmatmul.mubr.bf16.gmra.mrb[140].mxu0 %v10638_v29  ;;  %v1706_v18 = vrot.slane %v1692_v8, %v11288_v42  ;;  %v6013_v62 = vmax.f32 %v5797_v43, %v1690_v25  ;;  %v1691_v56 = vcombine.high %v11525_v55, %v11525_v55  ;;  %v795_v7 = vadd.f32 %v11283_v41, %v11420_v10 }
 0x1c6   : > { %10149 = vmatprep.mubr.msk.bf16.mxu0 %vm10927_vm0, %v14137_v0  ;;  %v11543_v21 = vmax.f32 %v6006_v47, %v6012_v12  ;;  %v1707_v11 = vcombine.high %v1699_v57, %v1699_v57  ;;  %v1715_v23 = vrot.slane %v1699_v57, %v11288_v42  ;;  %v798_v10 = vadd.f32 %v11283_v41, %v11433_v60  ;;  %v10649_v60 = vld [vmem:[#allocation7 + $0x228] sm:$0xff]  }
 0x1c7   : > { %v1708_v22 = vcombine.high %v1706_v18, %v1706_v18  ;;  %v1722_v24 = vrot.slane %v1706_v18, %v11288_v42  ;;  %v11556_v32 = vmax.f32 %v6007_v13, %v6013_v62  ;;  %v1741_v34 = vcombine.high %v795_v7, %v795_v7  ;;  %10468 = vmatpush3.bf16.msra.mxu0 %v10649_v60 }
 0x1c8   : > { %v11551_v28 = vpop.f32.mrb[36].mxu0  ;;  %v1748_v35 = vrot.slane %v795_v7, %v11288_v42  ;;  %v1729_v39 = vrot.slane %v1707_v11, %v11288_v42  ;;  %v1737_v29 = vcombine.high %v1715_v23, %v1715_v23  ;;  %v5799_v58 = vmax.f32 %v1691_v56, %v1715_v23  ;;  %10469 = vmatprep.subr.bf16.mxu0 %v14137_v0 }
 0x1c9   : > { %v10043_v36 = vpop.f32.mrb[37].mxu0  ;;  %v1736_v26 = vrot.slane %v1708_v22, %v11288_v42  ;;  %v1738_v46 = vcombine.high %v1722_v24, %v1722_v24  ;;  %v1755_v59 = vrot.slane %v1741_v34, %v11288_v42  ;;  %v1790_v5 = vcombine.high %v798_v10, %v798_v10 }
 0x1ca   : > { %v11565_v48 = vpop.f32.mrb[38].mxu0  ;;  %v1756_v13 = vcombine.high %v1748_v35, %v1748_v35  ;;  %v1764_v50 = vrot.slane %v1748_v35, %v11288_v42  ;;  %v1739_v2 = vcombine.high %v1729_v39, %v1729_v39  ;;  %v6009_v25 = vmax.f32 %v11505_v20, %v1593_v15 }
 0x1cb   : > { %v10044_v51 = vpop.f32.mrb[39].mxu0  ;;  %v1740_v3 = vcombine.high %v1736_v26, %v1736_v26  ;;  %v5801_v4 = vmax.f32 %v1736_v26, %v1738_v46  ;;  %v6015_v8 = vmax.f32 %v5799_v58, %v1729_v39  ;;  %v1757_v43 = vcombine.high %v1755_v59, %v1755_v59  ;;  %v10640_v39 = vld [vmem:[%s11171_s8 + $0x128] sm:$0xff]   ;;  %v10650_v26 = vld [vmem:[#allocation7 + $0x230] sm:$0xff]  }
 0x1cc   : > { %v1778_v47 = vrot.slane %v1756_v13, %v11288_v42  ;;  %v5800_v12 = vmax.f32 %v1737_v29, %v1739_v2  ;;  %v1771_v18 = vrot.slane %v1755_v59, %v11288_v42  ;;  %v1797_v31 = vrot.slane %v798_v10, %v11288_v42  ;;  %10470 = vmatpush3.bf16.msra.mxu0 %v10650_v26 }
 0x1cd   : > { %10150 = vmatmul.mubr.bf16.gmra.mrb[144].mxu0 %v10639_v38  ;;  %v6017_v57 = vmax.f32 %v5801_v4, %v1740_v3  ;;  %v11578_v62 = vmax.f32 %v6009_v25, %v6015_v8  ;;  %v1785_v63 = vrot.slane %v1757_v43, %v11288_v42  ;;  %v1786_v15 = vcombine.high %v1764_v50, %v1764_v50 }
 0x1ce   : > { %10153 = vmatprep.mubr.msk.bf16.mxu0 %vm10927_vm0, %v14137_v0  ;;  %v1788_v20 = vcombine.high %v1778_v47, %v1778_v47  ;;  %v6016_v56 = vmax.f32 %v5800_v12, %v1722_v24  ;;  %v5802_v11 = vmax.f32 %v1764_v50, %v1778_v47  ;;  %v1804_v22 = vrot.slane %v1790_v5, %v11288_v42 }
 0x1cf   : > { %v6281_v7 = vmax.f32 %v11535_v14, %v6017_v57  ;;  %v1789_v35 = vcombine.high %v1785_v63, %v1785_v63  ;;  %v1805_v10 = vcombine.high %v1797_v31, %v1797_v31  ;;  %v1813_v36 = vrot.slane %v1797_v31, %v11288_v42  ;;  %10471 = vmatprep.subr.bf16.mxu0 %v14137_v0 }
 0x1d0   : > { %v11583_v23 = vpop.f32.mrb[40].mxu0  ;;  %v5803_v34 = vmax.f32 %v1788_v20, %v1771_v18  ;;  %v6280_v29 = vmax.f32 %v11530_v6, %v6016_v56  ;;  %v1787_v14 = vcombine.high %v1771_v18, %v1771_v18  ;;  %v6018_v46 = vmax.f32 %v5802_v11, %v1786_v15 }
 0x1d1   : > { %v10047_v38 = vpop.f32.mrb[41].mxu0  ;;  %v11589_v24 = vmax.f32 %v6281_v7, 0.0  ;;  %v1806_v13 = vcombine.high %v1804_v22, %v1804_v22  ;;  %v1827_v50 = vrot.slane %v1805_v10, %v11288_v42  ;;  %v1835_v51 = vcombine.high %v1813_v36, %v1813_v36  ;;  %v10651_v7 = vld [vmem:[#allocation7 + $0x238] sm:$0xff]  }
 0x1d2   : > { %v11591_v58 = vpop.f32.mrb[42].mxu0  ;;  %v6019_v59 = vmax.f32 %v5803_v34, %v1785_v63  ;;  %v6014_v6 = vmax.f32 %v5798_v49, %v1689_v45  ;;  %v11600_v2 = vmax.f32 %v6280_v29, 0.0  ;;  %v6282_v3 = vmax.f32 %v11543_v21, %v6018_v46  ;;  %v10641_v63 = vld [vmem:[%s11171_s8 + $0x130] sm:$0xff]   ;;  %10472 = vmatpush3.bf16.msra.mxu0 %v10651_v7 }
 0x1d3   : > { %14236 = vst [vmem:[#allocation18_spill] sm:$0xff] %v11589_v24  ;;  %v10048_v60 = vpop.f32.mrb[43].mxu0  ;;  %v1837_v5 = vcombine.high %v1827_v50, %v1827_v50  ;;  %v5804_v25 = vmax.f32 %v1787_v14, %v1789_v35  ;;  %v6530_v8 = vrot.slane %v6522_v9, %v11288_v42  ;;  %v6008_v44 = vmax.f32 %v11522_v54, %v11468_v52 }
 0x1d4   : > { %14237 = vst [vmem:[#allocation19_spill] sm:$0xff] %v11600_v2  ;;  %v6283_v4 = vmax.f32 %v11556_v32, %v6019_v59  ;;  %v6493_v55 = vcombine.low %v11600_v2, %v11589_v24  ;;  %v6354_v45 = vmax.f32 %v6282_v3, 0.0  ;;  %v11616_v21 = vrot.slane %v1806_v13, %v11288_v42 }
 0x1d5   : > { %10154 = vmatmul.mubr.bf16.gmra.mrb[148].mxu0 %v10640_v39  ;;  %v5805_v32 = vmax.f32 %v1827_v50, %v1835_v51  ;;  %v6020_v43 = vmax.f32 %v5804_v25, %v1813_v36  ;;  %v6514_v33 = vrot.slane %v6492_v27, %v11288_v42  ;;  %v6212_v52 = vmax.f32 %v6008_v44, %v6014_v6 }
 0x1d6   : > { %10157 = vmatprep.mubr.msk.bf16.mxu0 %vm10927_vm0, %v14137_v0  ;;  %v6355_v49 = vmax.f32 %v6283_v4, 0.0  ;;  %v6521_v37 = vrot.slane %v6493_v55, %v11288_v42  ;;  %v7686_v9 = vpack.c.bf16 %v6354_v45, %v6354_v45  ;;  %v803_v18 = vadd.f32 %v11283_v41, %v11465_v1 }
 0x1d7   : > { %v6021_v57 = vmax.f32 %v5805_v32, %v1837_v5  ;;  %v11629_v56 = vrot.slane %v1804_v22, %v11288_v42  ;;  %v6284_v16 = vmax.f32 %v6212_v52, %v6020_v43  ;;  %v1838_v1 = vcombine.high %v11616_v21, %v11616_v21  ;;  %v10642_v32 = vld [vmem:[%s11171_s8 + $0x138] sm:$0xff]  }
 0x1d8   : > { %v11623_v54 = vpop.f32.mrb[44].mxu0  ;;  %v6539_v47 = vcombine.low %v6354_v45, %v6355_v49  ;;  %v7687_v12 = vpack.c.bf16 %v6355_v49, %v6355_v49  ;;  %v6523_v15 = vcombine.low %v6514_v33, %v6521_v37  ;;  %v7847_v20 = vunpack.c.l.b16 %v7686_v9 }
 0x1d9   : > { %v10051_v31 = vpop.f32.mrb[45].mxu0  ;;  %v6285_v35 = vmax.f32 %v11578_v62, %v6021_v57  ;;  %v6356_v38 = vmax.f32 %v6284_v16, 0.0  ;;  %v1839_v39 = vcombine.high %v803_v18, %v803_v18  ;;  %v1846_v22 = vrot.slane %v803_v18, %v11288_v42 }
 0x1da   : > { %v11631_v27 = vpop.f32.mrb[46].mxu0  ;;  %v11634_v11 = vrot.slane %v6539_v47, %v11288_v42  ;;  %v7848_v34 = vunpack.c.l.b16 %v7687_v12  ;;  %v6537_v36 = vrot.slane %v6523_v15, %v11288_v42  ;;  %v806_v14 = vadd.f32 %v11283_v41, %v11482_v61 }
 0x1db   : > { %v10052_v10 = vpop.f32.mrb[47].mxu0  ;;  %v6357_v29 = vmax.f32 %v6285_v35, 0.0  ;;  %v811_v46 = vadd.f32 %v11283_v41, %v11509_v17  ;;  %v7688_v59 = vpack.c.bf16 %v6356_v38, %v6356_v38  ;;  %v1853_v13 = vrot.slane %v1839_v39, %v11288_v42 }
 0x1dc   : > { %v7932_v26 = vrot.slane %v7848_v34, 7  ;;  %v11645_v62 = vcombine.low %v6530_v8, %v6537_v36  ;;  %v1854_v50 = vcombine.high %v1846_v22, %v1846_v22  ;;  %v1862_v61 = vrot.slane %v1846_v22, %v11288_v42 }
 0x1dd   : > { %10158 = vmatmul.mubr.bf16.gmra.mrb[152].mxu0 %v10641_v63  ;;  %v6540_v60 = vcombine.low %v6356_v38, %v6357_v29  ;;  %v7689_v6 = vpack.c.bf16 %v6357_v29, %v6357_v29  ;;  %v7849_v3 = vunpack.c.l.b16 %v7688_v59  ;;  %v1855_v4 = vcombine.high %v1853_v13, %v1853_v13 }
 0x1de   : > { %14238 = vst [vmem:[#allocation20_spill] sm:$0xff] %v11645_v62  ;;  %10161 = vmatprep.mubr.msk.bf16.mxu0 %vm10927_vm0, %v14137_v0  ;;  %v7933_v51 = vsel %vm7912_vm1, %v7932_v26, %v7847_v20  ;;  %v11653_v17 = vrot.slane %v1853_v13, %v11288_v42  ;;  %v11656_v5 = vrot.slane %v1854_v50, %v11288_v42 }
 0x1df   : > { %v11661_v8 = vrot.slane %v6540_v60, %v11288_v42  ;;  %v7850_v44 = vunpack.c.l.b16 %v7689_v6  ;;  %v1884_v55 = vcombine.high %v1862_v61, %v1862_v61  ;;  %v11663_v45 = vmax.f32 %v1838_v1, %v1862_v61 }
 0x1e0   : > { %v11658_v25 = vpop.f32.mrb[48].mxu0  ;;  %v7934_v43 = vrot.slane %v7849_v3, 6  ;;  %v11667_v33 = vrot.slane %v1855_v4, %v11288_v42  ;;  %v1885_v37 = vcombine.high %v11653_v17, %v11653_v17  ;;  %v1886_v9 = vcombine.high %v11656_v5, %v11656_v5  ;;  %v10643_v3 = vld [vmem:[%s11171_s8 + $0x140] ss:$0 sps:$4 sm:$0xff]   ;;  %s9819_s8 = sshll.u32 %s10986_s25, 7  ;;  %s10842_s25 = scalar_lea.vmem %s14083_s29, 128 }
 0x1e1   : > { %v10055_v49 = vpop.f32.mrb[49].mxu0  ;;  %v6571_v47 = vcombine.low %v11634_v11, %v11661_v8  ;;  %v7936_v12 = vrot.slane %v7850_v44, 5  ;;  %v6023_v57 = vmax.f32 %v11663_v45, %v11656_v5  ;;  %v1888_v18 = vcombine.high %v806_v14, %v806_v14  ;;  %s14081_s13 = scalar_lea.hbm %s14131_s6, %s9819_s8  ;;  %p10843_p10 = scmp.ne.s32.totalorder %s14083_s29, %s10842_s25 }
 0x1e2   : > { %v11673_v52 = vpop.f32.mrb[50].mxu0  ;;  %v1836_v63 = vcombine.high %v11629_v56, %v11629_v56  ;;  %v5806_v15 = vmax.f32 %v11629_v56, %v11616_v21  ;;  %v7935_v20 = vsel %vm7915_vm2, %v7934_v43, %v7933_v51  ;;  %v11684_v16 = vmax.f32 %v1884_v55, %v1886_v9  ;;  %p10850_p1 = scmp.lt.s32.totalorder %s10848_s30, %s10842_s25 }
 0x1e3   : > { %v10056_v31 = vpop.f32.mrb[51].mxu0  ;;  %v11687_v7 = vsel %vm7918_vm3, %v7936_v12, %v7935_v20  ;;  %v1887_v34 = vcombine.high %v11667_v33, %v11667_v33  ;;  %v1895_v35 = vrot.slane %v806_v14, %v11288_v42  ;;  %v1902_v1 = vrot.slane %v1888_v18, %v11288_v42  ;;  %p10844_p3 = pnand %p10843_p10, %p11116_p5 }
 0x1e4   : > { %v5809_v10 = vmax.f32 %v11667_v33, %v1885_v37  ;;  %v6024_v21 = vmax.f32 %v11684_v16, %v11653_v17  ;;  %v1937_v56 = vcombine.high %v811_v46, %v811_v46  ;;  %v1944_v36 = vrot.slane %v811_v46, %v11288_v42  ;;  %p10851_p2 = por %p10850_p1, %p10849_p12 }
 0x1e5   : > { %10162 = vmatmul.mubr.bf16.gmra.mrb[156].mxu0 %v10642_v32  ;;  %v1903_v38 = vcombine.high %v1895_v35, %v1895_v35  ;;  %v1904_v39 = vcombine.high %v1902_v1, %v1902_v1  ;;  %v1911_v22 = vrot.slane %v1895_v35, %v11288_v42  ;;  %v1918_v26 = vrot.slane %v1902_v1, %v11288_v42  ;;  %p10845_p7 = pneg %p10844_p3 }
 0x1e6   : > { %10165 = vmatprep.mubr.msk.bf16.mxu0 %vm10927_vm0, %v14137_v0  ;;  %v1951_v29 = vrot.slane %v1937_v56, %v11288_v42  ;;  %v1952_v14 = vcombine.high %v1944_v36, %v1944_v36  ;;  %v1960_v59 = vrot.slane %v1944_v36, %v11288_v42  ;;  %v814_v13 = vadd.f32 %v11283_v41, %v11520_v53 }
 0x1e7   : > { %v1925_v46 = vrot.slane %v1903_v38, %v11288_v42  ;;  %v11709_v51 = vrot.slane %v1904_v39, %v11288_v42  ;;  %v1934_v60 = vcombine.high %v1918_v26, %v1918_v26  ;;  %v6022_v6 = vmax.f32 %v5806_v15, %v1836_v63  ;;  %p10852_p4 = pnand %p10851_p2, %p10845_p7 }
 0x1e8   : > { %v11705_v50 = vpop.f32.mrb[52].mxu0  ;;  %v1953_v4 = vcombine.high %v1951_v29, %v1951_v29  ;;  %v1967_v5 = vrot.slane %v1951_v29, %v11288_v42  ;;  %v1974_v44 = vrot.slane %v1952_v14, %v11288_v42  ;;  %v1982_v55 = vcombine.high %v1960_v59, %v1960_v59 }
 0x1e9   : > { %v10059_v61 = vpop.f32.mrb[53].mxu0  ;;  %v1935_v41 = vcombine.high %v1925_v46, %v1925_v46  ;;  %v5810_v53 = vmax.f32 %v1911_v22, %v1925_v46  ;;  %v1936_v49 = vcombine.high %v11709_v51, %v11709_v51  ;;  %v1986_v32 = vcombine.high %v814_v13, %v814_v13 }
 0x1ea   : > { %v11714_v45 = vpop.f32.mrb[54].mxu0  ;;  %v1933_v37 = vcombine.high %v1911_v22, %v1911_v22  ;;  %v1981_v9 = vrot.slane %v1953_v4, %v11288_v42  ;;  %v1984_v12 = vcombine.high %v1974_v44, %v1974_v44  ;;  %v5813_v18 = vmax.f32 %v1974_v44, %v1982_v55 }
 0x1eb   : > { %v10060_v43 = vpop.f32.mrb[55].mxu0  ;;  %v11719_v31 = vmax.f32 %v1935_v41, %v1918_v26  ;;  %v1983_v63 = vcombine.high %v1967_v5, %v1967_v5  ;;  %v5812_v15 = vmax.f32 %v1934_v60, %v1936_v49  ;;  %v1993_v20 = vrot.slane %v814_v13, %v11288_v42  ;;  %v11741_v41 = vld [vmem:[%s14127_s2] ss:$0 sm:$0xff] }
 0x1ec   : > { %v5814_v35 = vmax.f32 %v1967_v5, %v1981_v9  ;;  %v6029_v1 = vmax.f32 %v5813_v18, %v1984_v12  ;;  %v1985_v56 = vcombine.high %v1981_v9, %v1981_v9  ;;  %v2000_v36 = vrot.slane %v1986_v32, %v11288_v42 }
 0x1ed   : > { %10166 = vmatmul.mubr.bf16.gmra.mrb[160].mxu0 %v10643_v3  ;;  %v6026_v38 = vmax.f32 %v5810_v53, %v1933_v37  ;;  %v6028_v39 = vmax.f32 %v5812_v15, %v1960_v59  ;;  %v2001_v22 = vcombine.high %v1993_v20, %v1993_v20  ;;  %v2009_v29 = vrot.slane %v1993_v20, %v11288_v42 }
 0x1ee   : > { %10473 = vmatprep.mubr.msk.bf16.mxu0 %vm10927_vm0, %v14137_v0  ;;  %v6030_v26 = vmax.f32 %v5814_v35, %v1983_v63  ;;  %v11726_v14 = vmax.f32 %v6023_v57, %v6029_v1  ;;  %v2002_v46 = vcombine.high %v2000_v36, %v2000_v36  ;;  %v2016_v13 = vrot.slane %v2000_v36, %v11288_v42 }
 0x1ef   : > { %v11731_v61 = vmax.f32 %v6022_v6, %v6028_v39  ;;  %v2023_v3 = vrot.slane %v2001_v22, %v11288_v42  ;;  %v2031_v4 = vcombine.high %v2009_v29, %v2009_v29  ;;  %v5815_v5 = vmax.f32 %v1985_v56, %v2009_v29 }
 0x1f0   : > { %v11729_v60 = vpop.f32.mrb[56].mxu0  ;;  %v2030_v59 = vrot.slane %v2002_v46, %v11288_v42  ;;  %v2032_v55 = vcombine.high %v2016_v13, %v2016_v13  ;;  %v6025_v57 = vmax.f32 %v5809_v10, %v1887_v34  ;;  %v819_v6 = vadd.f32 %v11741_v41, %v11551_v28 }
 0x1f1   : > { %v10063_v44 = vpop.f32.mrb[57].mxu0  ;;  %v2033_v49 = vcombine.high %v2023_v3, %v2023_v3  ;;  %v6031_v32 = vmax.f32 %v5815_v5, %v2023_v3  ;;  %v822_v43 = vadd.f32 %v11741_v41, %v11565_v48  ;;  %v11752_v33 = vmax.f32 %v6024_v21, %v6030_v26 }
 0x1f2   : > { %v11745_v53 = vpop.f32.mrb[58].mxu0  ;;  %v2034_v10 = vcombine.high %v2030_v59, %v2030_v59  ;;  %v5817_v37 = vmax.f32 %v2030_v59, %v2032_v55  ;;  %v2035_v9 = vcombine.high %v819_v6, %v819_v6  ;;  %v2042_v12 = vrot.slane %v819_v6, %v11288_v42 }
 0x1f3   : > { %v10064_v34 = vpop.f32.mrb[59].mxu0  ;;  %v5816_v18 = vmax.f32 %v2031_v4, %v2033_v49  ;;  %v11755_v28 = vmax.f32 %v6025_v57, %v6031_v32  ;;  %v2084_v63 = vcombine.high %v822_v43, %v822_v43  ;;  %v2091_v15 = vrot.slane %v822_v43, %v11288_v42 }
 0x1f4   : > { %v6027_v48 = vmax.f32 %v11719_v31, %v11709_v51  ;;  %v2049_v20 = vrot.slane %v2035_v9, %v11288_v42  ;;  %v2050_v17 = vcombine.high %v2042_v12, %v2042_v12  ;;  %v2058_v16 = vrot.slane %v2042_v12, %v11288_v42 }
 0x1f5   : > { %v6032_v21 = vmax.f32 %v5816_v18, %v2016_v13  ;;  %v2098_v35 = vrot.slane %v2084_v63, %v11288_v42  ;;  %v2099_v1 = vcombine.high %v2091_v15, %v2091_v15  ;;  %v2107_v56 = vrot.slane %v2091_v15, %v11288_v42 }
 0x1f6   : > { %v6033_v36 = vmax.f32 %v5817_v37, %v2034_v10  ;;  %v2051_v39 = vcombine.high %v2049_v20, %v2049_v20  ;;  %v2065_v22 = vrot.slane %v2049_v20, %v11288_v42  ;;  %v2072_v29 = vrot.slane %v2050_v17, %v11288_v42 }
 0x1f7   : > { %v11768_v51 = vmax.f32 %v6026_v38, %v6032_v21  ;;  %v2100_v31 = vcombine.high %v2098_v35, %v2098_v35  ;;  %v2114_v46 = vrot.slane %v2098_v35, %v11288_v42  ;;  %v2121_v13 = vrot.slane %v2099_v1, %v11288_v42 }
 0x1f8   : > { %v11766_v26 = vpop.f32.mrb[60].mxu0  ;;  %v2079_v4 = vrot.slane %v2051_v39, %v11288_v42  ;;  %v2080_v5 = vcombine.high %v2058_v16, %v2058_v16  ;;  %v2082_v44 = vcombine.high %v2072_v29, %v2072_v29  ;;  %v5818_v59 = vmax.f32 %v2058_v16, %v2072_v29 }
 0x1f9   : > { %v10067_v3 = vpop.f32.mrb[61].mxu0  ;;  %v2081_v57 = vcombine.high %v2065_v22, %v2065_v22  ;;  %v2128_v6 = vrot.slane %v2100_v31, %v11288_v42  ;;  %v2129_v49 = vcombine.high %v2107_v56, %v2107_v56  ;;  %v2131_v32 = vcombine.high %v2121_v13, %v2121_v13 }
 0x1fa   : > { %v11773_v55 = vpop.f32.mrb[62].mxu0  ;;  %v5819_v43 = vmax.f32 %v2082_v44, %v2065_v22  ;;  %v6034_v34 = vmax.f32 %v5818_v59, %v2080_v5  ;;  %v2083_v10 = vcombine.high %v2079_v4, %v2079_v4  ;;  %v827_v37 = vadd.f32 %v11741_v41, %v11583_v23 }
 0x1fb   : > { %v10068_v38 = vpop.f32.mrb[63].mxu0  ;;  %v2130_v9 = vcombine.high %v2114_v46, %v2114_v46  ;;  %v5821_v12 = vmax.f32 %v2121_v13, %v2129_v49  ;;  %v5822_v18 = vmax.f32 %v2114_v46, %v2128_v6  ;;  %v6219_v63 = vmax.f32 %v6027_v48, %v6033_v36 }
 0x1fc   : > { %v6035_v15 = vmax.f32 %v5819_v43, %v2079_v4  ;;  %v6286_v20 = vmax.f32 %v11731_v61, %v6034_v34  ;;  %v5820_v17 = vmax.f32 %v2081_v57, %v2083_v10  ;;  %v2133_v35 = vcombine.high %v827_v37, %v827_v37 }
 0x1fd   : > { %v6037_v16 = vmax.f32 %v5821_v12, %v2131_v32  ;;  %v6038_v21 = vmax.f32 %v5822_v18, %v2130_v9  ;;  %v2140_v1 = vrot.slane %v827_v37, %v11288_v42  ;;  %v830_v38 = vadd.f32 %v11741_v41, %v11591_v58 }
 0x1fe   : > { %v6287_v39 = vmax.f32 %v11726_v14, %v6035_v15  ;;  %v6358_v22 = vmax.f32 %v6286_v20, 0.0  ;;  %v6036_v29 = vmax.f32 %v5820_v17, %v2107_v56  ;;  %v2147_v5 = vrot.slane %v2133_v35, %v11288_v42 }
 0x1ff   : > { %v6289_v23 = vmax.f32 %v11755_v28, %v6037_v16  ;;  %v6290_v46 = vmax.f32 %v11768_v51, %v6038_v21  ;;  %v2148_v48 = vcombine.high %v2140_v1, %v2140_v1  ;;  %v2132_v51 = vcombine.high %v2128_v6, %v2128_v6 }
 0x200   : > { %v11781_v31 = vpop.f32.mrb[64].mxu0  ;;  %v11785_v13 = vmax.f32 %v6287_v39, 0.0  ;;  %v7690_v61 = vpack.c.bf16 %v6358_v22, %v6358_v22  ;;  %v6288_v3 = vmax.f32 %v11752_v33, %v6036_v29  ;;  %v2156_v57 = vrot.slane %v2140_v1, %v11288_v42 }
 0x201   : > { %v10071_v36 = vpop.f32.mrb[65].mxu0  ;;  %v11794_v28 = vmax.f32 %v6289_v23, 0.0  ;;  %v2170_v49 = vrot.slane %v2148_v48, %v11288_v42  ;;  %v2149_v43 = vcombine.high %v2147_v5, %v2147_v5  ;;  %v11809_v37 = vrot.slane %v2147_v5, %v11288_v42 }
 0x202   : > { %14239 = vst [vmem:[#allocation21_spill] sm:$0xff] %v11785_v13  ;;  %v11788_v4 = vpop.f32.mrb[66].mxu0  ;;  %v6541_v56 = vcombine.low %v6358_v22, %v11785_v13  ;;  %v7851_v44 = vunpack.c.l.b16 %v7690_v61  ;;  %v11792_v59 = vmax.f32 %v6288_v3, 0.0  ;;  %v5823_v18 = vmax.f32 %v2132_v51, %v2156_v57 }
 0x203   : > { %v10072_v14 = vpop.f32.mrb[67].mxu0  ;;  %14241 = vst [vmem:[#allocation23_spill] sm:$0xff] %v11794_v28  ;;  %v2180_v12 = vcombine.high %v2170_v49, %v2170_v49  ;;  %v6579_v58 = vrot.slane %v6571_v47, %v11288_v42  ;;  %v11817_v20 = vmax.f32 %v6290_v46, 0.0  ;;  %v2178_v21 = vcombine.high %v2156_v57, %v2156_v57 }
 0x204   : > { %14240 = vst [vmem:[#allocation22_spill] sm:$0xff] %v11792_v59  ;;  %v7938_v32 = vrot.slane %v7851_v44, 4  ;;  %v6542_v33 = vcombine.low %v11792_v59, %v11794_v28  ;;  %v6563_v34 = vrot.slane %v6541_v56, %v11288_v42  ;;  %v6039_v35 = vmax.f32 %v5823_v18, %v2170_v49 }
 0x205   : > { %14243 = vst [vmem:[#allocation25_spill] sm:$0xff] %v11817_v20  ;;  %v2189_v1 = vrot.slane %v830_v38, %v11288_v42  ;;  %v835_v39 = vadd.f32 %v11741_v41, %v11623_v54  ;;  %v2177_v23 = vrot.slane %v2149_v43, %v11288_v42  ;;  %v2179_v11 = vcombine.high %v11809_v37, %v11809_v37 }
 0x206   : > { %v11805_v10 = vsel %vm7921_vm4, %v7938_v32, %v11687_v7  ;;  %v6570_v6 = vrot.slane %v6542_v33, %v11288_v42  ;;  %v2182_v7 = vcombine.high %v830_v38, %v830_v38  ;;  %v11829_v47 = vmax.f32 %v2178_v21, %v2180_v12 }
 0x207   : > { %14242 = vst [vmem:[#allocation24_spill] sm:$0xff] %v11805_v10  ;;  %v6291_v46 = vmax.f32 %v6219_v63, %v6039_v35  ;;  %v2197_v48 = vcombine.high %v2189_v1, %v2189_v1  ;;  %v2231_v36 = vcombine.high %v835_v39, %v835_v39  ;;  %v2205_v54 = vrot.slane %v2189_v1, %v11288_v42 }
 0x208   : > { %v11811_v9 = vpop.f32.mrb[68].mxu0  ;;  %v6572_v17 = vcombine.low %v6563_v34, %v6570_v6  ;;  %v2196_v8 = vrot.slane %v2182_v7, %v11288_v42  ;;  %v2238_v5 = vrot.slane %v835_v39, %v11288_v42  ;;  %v2181_v57 = vcombine.high %v2177_v23, %v2177_v23 }
 0x209   : > { %v10075_v15 = vpop.f32.mrb[69].mxu0  ;;  %v11835_v14 = vmax.f32 %v6291_v46, 0.0  ;;  %v2219_v44 = vrot.slane %v2197_v48, %v11288_v42  ;;  %v2245_v51 = vrot.slane %v2231_v36, %v11288_v42  ;;  %v838_v6 = vadd.f32 %v11741_v41, %v11631_v27 }
 0x20a   : > { %v11819_v16 = vpop.f32.mrb[70].mxu0  ;;  %v6586_v29 = vrot.slane %v6572_v17, %v11288_v42  ;;  %v2198_v3 = vcombine.high %v2196_v8, %v2196_v8  ;;  %v2212_v56 = vrot.slane %v2196_v8, %v11288_v42  ;;  %v2246_v49 = vcombine.high %v2238_v5, %v2238_v5 }
 0x20b   : > { %v10076_v22 = vpop.f32.mrb[71].mxu0  ;;  %14245 = vst [vmem:[#allocation27_spill] sm:$0xff] %v11835_v14  ;;  %v11844_v32 = vrot.slane %v2238_v5, %v11288_v42  ;;  %v2229_v43 = vcombine.high %v2219_v44, %v2219_v44  ;;  %v5826_v34 = vmax.f32 %v2205_v54, %v2219_v44  ;;  %v2247_v15 = vcombine.high %v2245_v51, %v2245_v51 }
 0x20c   : > { %v11831_v61 = vcombine.low %v6579_v58, %v6586_v29  ;;  %v11841_v63 = vrot.slane %v2198_v3, %v11288_v42  ;;  %v2261_v58 = vrot.slane %v2245_v51, %v11288_v42  ;;  %v2268_v17 = vrot.slane %v2246_v49, %v11288_v42 }
 0x20d   : > { %v5825_v21 = vmax.f32 %v2177_v23, %v2179_v11  ;;  %v2227_v1 = vcombine.high %v2205_v54, %v2205_v54  ;;  %v2228_v39 = vcombine.high %v2212_v56, %v2212_v56  ;;  %v11860_v29 = vmax.f32 %v2229_v43, %v2212_v56 }
 0x20e   : > { %14244 = vst [vmem:[#allocation26_spill] sm:$0xff] %v11831_v61  ;;  %v2230_v18 = vcombine.high %v11841_v63, %v11841_v63  ;;  %v2275_v27 = vrot.slane %v2247_v15, %v11288_v42  ;;  %v2276_v8 = vcombine.high %v11844_v32, %v11844_v32  ;;  %v2278_v46 = vcombine.high %v2268_v17, %v2268_v17 }
 0x20f   : > { %v6042_v48 = vmax.f32 %v5826_v34, %v2227_v1  ;;  %v2277_v36 = vcombine.high %v2261_v58, %v2261_v58  ;;  %v2280_v5 = vcombine.high %v838_v6, %v838_v6  ;;  %v2287_v54 = vrot.slane %v838_v6, %v11288_v42 }
 0x210   : > { %v11846_v33 = vpop.f32.mrb[72].mxu0  ;;  %v11865_v3 = vmax.f32 %v2228_v39, %v2230_v18  ;;  %v5829_v23 = vmax.f32 %v2268_v17, %v2276_v8  ;;  %v5830_v11 = vmax.f32 %v2261_v58, %v2275_v27  ;;  %v2279_v44 = vcombine.high %v2275_v27, %v2275_v27 }
 0x211   : > { %v10079_v12 = vpop.f32.mrb[73].mxu0  ;;  %v2294_v51 = vrot.slane %v2280_v5, %v11288_v42  ;;  %v6041_v49 = vmax.f32 %v5825_v21, %v2181_v57  ;;  %v843_v43 = vadd.f32 %v11741_v41, %v11658_v25  ;;  %v2295_v18 = vcombine.high %v2287_v54, %v2287_v54 }
 0x212   : > { %v11856_v7 = vpop.f32.mrb[74].mxu0  ;;  %v6044_v56 = vmax.f32 %v11865_v3, %v11844_v32  ;;  %v11873_v12 = vmax.f32 %v5829_v23, %v2278_v46  ;;  %v6046_v34 = vmax.f32 %v5830_v11, %v2277_v36  ;;  %v2303_v15 = vrot.slane %v2287_v54, %v11288_v42 }
 0x213   : > { %v10080_v22 = vpop.f32.mrb[75].mxu0  ;;  %v2296_v58 = vcombine.high %v2294_v51, %v2294_v51  ;;  %v2310_v6 = vrot.slane %v2294_v51, %v11288_v42  ;;  %v2329_v1 = vcombine.high %v843_v43, %v843_v43  ;;  %v2336_v32 = vrot.slane %v843_v43, %v11288_v42 }
 0x214   : > { %v2317_v57 = vrot.slane %v2295_v18, %v11288_v42  ;;  %v2325_v21 = vcombine.high %v2303_v15, %v2303_v15  ;;  %v5831_v22 = vmax.f32 %v2279_v44, %v2303_v15  ;;  %v846_v25 = vadd.f32 %v11741_v41, %v11673_v52 }
 0x215   : > { %v2324_v8 = vrot.slane %v2296_v58, %v11288_v42  ;;  %v2326_v46 = vcombine.high %v2310_v6, %v2310_v6  ;;  %v2343_v36 = vrot.slane %v2329_v1, %v11288_v42  ;;  %v2344_v3 = vcombine.high %v2336_v32, %v2336_v32 }
 0x216   : > { %v2327_v23 = vcombine.high %v2317_v57, %v2317_v57  ;;  %v6047_v11 = vmax.f32 %v5831_v22, %v2317_v57  ;;  %v2352_v54 = vrot.slane %v2336_v32, %v11288_v42  ;;  %v2378_v51 = vcombine.high %v846_v25, %v846_v25 }
 0x217   : > { %v2328_v43 = vcombine.high %v2324_v8, %v2324_v8  ;;  %v5833_v18 = vmax.f32 %v2324_v8, %v2326_v46  ;;  %v2345_v44 = vcombine.high %v2343_v36, %v2343_v36  ;;  %v2359_v15 = vrot.slane %v2343_v36, %v11288_v42 }
 0x218   : > { %v11876_v17 = vpop.f32.mrb[76].mxu0  ;;  %v5832_v52 = vmax.f32 %v2325_v21, %v2327_v23  ;;  %v2366_v0 = vrot.slane %v2344_v3, %v11288_v42  ;;  %v2374_v58 = vcombine.high %v2352_v54, %v2352_v54  ;;  %v2392_v10 = vrot.slane %v2378_v51, %v11288_v42 }
 0x219   : > { %v10083_v39 = vpop.f32.mrb[77].mxu0  ;;  %v6049_v38 = vmax.f32 %v5833_v18, %v2328_v43  ;;  %v2373_v1 = vrot.slane %v2345_v44, %v11288_v42  ;;  %v2375_v35 = vcombine.high %v2359_v15, %v2359_v15  ;;  %v14246_v21 = vmax.f32 %v11829_v47, %v11809_v37 }
 0x21a   : > { %v11883_v27 = vpop.f32.mrb[78].mxu0  ;;  %v6221_v39 = vmax.f32 %v6041_v49, %v6047_v11  ;;  %v6048_v57 = vmax.f32 %v5832_v52, %v2310_v6  ;;  %v2376_v22 = vcombine.high %v2366_v0, %v2366_v0  ;;  %v5834_v32 = vmax.f32 %v2352_v54, %v2366_v0 }
 0x21b   : > { %v10084_v5 = vpop.f32.mrb[79].mxu0  ;;  %v2377_v46 = vcombine.high %v2373_v1, %v2373_v1  ;;  %v6220_v3 = vmax.f32 %v14246_v21, %v6046_v34  ;;  %v2394_v6 = vcombine.high %v2392_v10, %v2392_v10  ;;  %v2408_v0 = vrot.slane %v2392_v10, %v11288_v42 }
 0x21c   : > { %v2385_v5 = vrot.slane %v846_v25, %v11288_v42  ;;  %v11899_v11 = vmax.f32 %v6042_v48, %v6048_v57  ;;  %v5835_v43 = vmax.f32 %v2376_v22, %v2359_v15  ;;  %v6050_v25 = vmax.f32 %v5834_v32, %v2374_v58 }
 0x21d   : > { %v5836_v44 = vmax.f32 %v2375_v35, %v2377_v46  ;;  %v2422_v37 = vrot.slane %v2394_v6, %v11288_v42  ;;  %v851_v47 = vadd.f32 %v11741_v41, %v11705_v50  ;;  %v6043_v48 = vmax.f32 %v11860_v29, %v11841_v63 }
 0x21e   : > { %v2393_v36 = vcombine.high %v2385_v5, %v2385_v5  ;;  %v2401_v49 = vrot.slane %v2385_v5, %v11288_v42  ;;  %v6051_v5 = vmax.f32 %v5835_v43, %v2373_v1  ;;  %v6224_v30 = vmax.f32 %v6044_v56, %v6050_v25 }
 0x21f   : > { %v2424_v57 = vcombine.high %v2408_v0, %v2408_v0  ;;  %v5838_v22 = vmax.f32 %v2408_v0, %v2422_v37  ;;  %v2427_v32 = vcombine.high %v851_v47, %v851_v47  ;;  %v2434_v56 = vrot.slane %v851_v47, %v11288_v42 }
 0x220   : > { %v11893_v8 = vpop.f32.mrb[80].mxu0  ;;  %v2415_v54 = vrot.slane %v2393_v36, %v11288_v42  ;;  %v2423_v51 = vcombine.high %v2401_v49, %v2401_v49  ;;  %v6052_v58 = vmax.f32 %v5836_v44, %v2401_v49  ;;  %v6225_v10 = vmax.f32 %v11873_v12, %v6051_v5 }
 0x221   : > { %v10087_v23 = vpop.f32.mrb[81].mxu0  ;;  %v6223_v1 = vmax.f32 %v6043_v48, %v6049_v38  ;;  %v6054_v36 = vmax.f32 %v5838_v22, %v2424_v57  ;;  %v2426_v21 = vcombine.high %v2422_v37, %v2422_v37  ;;  %v2441_v50 = vrot.slane %v2427_v32, %v11288_v42 }
 0x222   : > { %v11901_v18 = vpop.f32.mrb[82].mxu0  ;;  %v2425_v34 = vcombine.high %v2415_v54, %v2415_v54  ;;  %v5837_v15 = vmax.f32 %v2415_v54, %v2423_v51  ;;  %v6292_v46 = vmax.f32 %v6220_v3, %v6052_v58  ;;  %v854_v63 = vadd.f32 %v11741_v41, %v11714_v45 }
 0x223   : > { %v10088_v52 = vpop.f32.mrb[83].mxu0  ;;  %v2442_v12 = vcombine.high %v2434_v56, %v2434_v56  ;;  %v2450_v43 = vrot.slane %v2434_v56, %v11288_v42  ;;  %v6294_v3 = vmax.f32 %v11899_v11, %v6054_v36  ;;  %v2443_v6 = vcombine.high %v2441_v50, %v2441_v50 }
 0x224   : > { %v6053_v35 = vmax.f32 %v5837_v15, %v2425_v34  ;;  %v11917_v23 = vmax.f32 %v6292_v46, 0.0  ;;  %v2457_v38 = vrot.slane %v2441_v50, %v11288_v42  ;;  %v2476_v11 = vcombine.high %v854_v63, %v854_v63 }
 0x225   : > { %v2464_v45 = vrot.slane %v2442_v12, %v11288_v42  ;;  %v5839_v52 = vmax.f32 %v2426_v21, %v2450_v43  ;;  %v2472_v37 = vcombine.high %v2450_v43, %v2450_v43  ;;  %v14249_v58 = vcombine.low %v11817_v20, %v11835_v14 }
 0x226   : > { %v6293_v49 = vmax.f32 %v6221_v39, %v6053_v35  ;;  %14247 = vst [vmem:[#allocation28_spill] sm:$0xff] %v11917_v23  ;;  %v2471_v39 = vrot.slane %v2443_v6, %v11288_v42  ;;  %v2473_v44 = vcombine.high %v2457_v38, %v2457_v38  ;;  %v2483_v56 = vrot.slane %v854_v63, %v11288_v42 }
 0x227   : > { %v2474_v47 = vcombine.high %v2464_v45, %v2464_v45  ;;  %v6055_v15 = vmax.f32 %v5839_v52, %v2464_v45  ;;  %v6598_v57 = vrot.slane %v14249_v58, %v11288_v42  ;;  %v859_v12 = vadd.f32 %v11741_v41, %v11729_v60 }
 0x228   : > { %v11915_v29 = vpop.f32.mrb[84].mxu0  ;;  %v11924_v54 = vmax.f32 %v6293_v49, 0.0  ;;  %v2475_v48 = vcombine.high %v2471_v39, %v2471_v39  ;;  %v5841_v34 = vmax.f32 %v2471_v39, %v2473_v44  ;;  %v2490_v49 = vrot.slane %v2476_v11, %v11288_v42 }
 0x229   : > { %v10091_v25 = vpop.f32.mrb[85].mxu0  ;;  %v5840_v32 = vmax.f32 %v2472_v37, %v2474_v47  ;;  %v6295_v46 = vmax.f32 %v6223_v1, %v6055_v15  ;;  %v2499_v44 = vrot.slane %v2483_v56, %v11288_v42 }
 0x22a   : > { %v11922_v0 = vpop.f32.mrb[86].mxu0  ;;  %14248 = vst [vmem:[#allocation29_spill] sm:$0xff] %v11924_v54  ;;  %v6589_v5 = vcombine.low %v11917_v23, %v11924_v54  ;;  %v6057_v35 = vmax.f32 %v5841_v34, %v2475_v48  ;;  %v11941_v25 = vmax.f32 %v6294_v3, 0.0  ;;  %v2492_v63 = vcombine.high %v2490_v49, %v2490_v49 }
 0x22b   : > { %v10092_v51 = vpop.f32.mrb[87].mxu0  ;;  %v6056_v50 = vmax.f32 %v5840_v32, %v2457_v38  ;;  %v11943_v45 = vmax.f32 %v6295_v46, 0.0  ;;  %v2506_v60 = vrot.slane %v2490_v49, %v11288_v42  ;;  %v2521_v11 = vcombine.high %v2499_v44, %v2499_v44 }
 0x22c   : > { %v6605_v22 = vrot.slane %v6589_v5, %v11288_v42  ;;  %14250 = vst [vmem:[#allocation30_spill] sm:$0xff] %v11941_v25  ;;  %v6297_v6 = vmax.f32 %v6225_v10, %v6057_v35  ;;  %v2491_v51 = vcombine.high %v2483_v56, %v2483_v56  ;;  %v11958_v47 = vrot.slane %v2492_v63, %v11288_v42 }
 0x22d   : > { %14251 = vst [vmem:[#allocation31_spill] sm:$0xff] %v11943_v45  ;;  %v6296_v1 = vmax.f32 %v6224_v30, %v6056_v50  ;;  %v6590_v5 = vcombine.low %v11941_v25, %v11943_v45  ;;  %v2522_v48 = vcombine.high %v2506_v60, %v2506_v60  ;;  %v2525_v34 = vcombine.high %v859_v12, %v859_v12 }
 0x22e   : > { %v6620_v21 = vcombine.low %v6598_v57, %v6605_v22  ;;  %v11948_v38 = vmax.f32 %v6297_v6, 0.0  ;;  %v2513_v37 = vrot.slane %v2491_v51, %v11288_v42  ;;  %v2524_v22 = vcombine.high %v11958_v47, %v11958_v47 }
 0x22f   : > { %v11954_v10 = vmax.f32 %v6296_v1, 0.0  ;;  %v6612_v30 = vrot.slane %v6590_v5, %v11288_v42  ;;  %v2532_v32 = vrot.slane %v859_v12, %v11288_v42  ;;  %v2539_v35 = vrot.slane %v2525_v34, %v11288_v42 }
 0x230   : > { %v11936_v36 = vpop.f32.mrb[88].mxu0  ;;  %14252 = vst [vmem:[#allocation32_spill] sm:$0xff] %v11948_v38  ;;  %v6628_v3 = vrot.slane %v6620_v21, %v11288_v42  ;;  %v2523_v58 = vcombine.high %v2513_v37, %v2513_v37  ;;  %v5842_v57 = vmax.f32 %v2499_v44, %v2513_v37  ;;  %v862_v46 = vadd.f32 %v11741_v41, %v11745_v53 }
 0x231   : > { %v10095_v43 = vpop.f32.mrb[89].mxu0  ;;  %14253 = vst [vmem:[#allocation33_spill] sm:$0xff] %v11954_v10  ;;  %v6591_v15 = vcombine.low %v11954_v10, %v11948_v38  ;;  %v867_v56 = vadd.f32 %v11741_v41, %v11766_v26  ;;  %v11978_v6 = vmax.f32 %v2522_v48, %v2524_v22  ;;  %v2540_v12 = vcombine.high %v2532_v32, %v2532_v32 }
 0x232   : > { %v11945_v39 = vpop.f32.mrb[90].mxu0  ;;  %v11974_v49 = vmax.f32 %v2523_v58, %v2506_v60  ;;  %v11976_v43 = vmax.f32 %v5842_v57, %v2521_v11  ;;  %v2541_v1 = vcombine.high %v2539_v35, %v2539_v35  ;;  %v11981_v63 = vrot.slane %v2532_v32, %v11288_v42 }
 0x233   : > { %v10096_v52 = vpop.f32.mrb[91].mxu0  ;;  %v6619_v50 = vrot.slane %v6591_v15, %v11288_v42  ;;  %v11984_v53 = vrot.slane %v2539_v35, %v11288_v42  ;;  %v2581_v5 = vrot.slane %v862_v46, %v11288_v42  ;;  %v2562_v60 = vrot.slane %v2540_v12, %v11288_v42 }
 0x234   : > { %v2574_v52 = vcombine.high %v862_v46, %v862_v46  ;;  %v2569_v37 = vrot.slane %v2541_v1, %v11288_v42  ;;  %v2570_v11 = vcombine.high %v11981_v63, %v11981_v63  ;;  %v2630_v38 = vrot.slane %v867_v56, %v11288_v42 }
 0x235   : > { %v6621_v26 = vcombine.low %v6612_v30, %v6619_v50  ;;  %v2571_v48 = vcombine.high %v11984_v53, %v11984_v53  ;;  %v2589_v58 = vcombine.high %v2581_v5, %v2581_v5  ;;  %v2572_v22 = vcombine.high %v2562_v60, %v2562_v60 }
 0x236   : > { %v2588_v15 = vrot.slane %v2574_v52, %v11288_v42  ;;  %v5845_v32 = vmax.f32 %v2562_v60, %v2570_v11  ;;  %v5846_v35 = vmax.f32 %v11984_v53, %v2569_v37  ;;  %v2573_v46 = vcombine.high %v2569_v37, %v2569_v37 }
 0x237   : > { %v6635_v34 = vrot.slane %v6621_v26, %v11288_v42  ;;  %v2597_v1 = vrot.slane %v2581_v5, %v11288_v42  ;;  %v12007_v30 = vrot.slane %v2589_v58, %v11288_v42  ;;  %v2623_v52 = vcombine.high %v867_v56, %v867_v56 }
 0x238   : > { %v11971_v21 = vpop.f32.mrb[92].mxu0  ;;  %v2590_v12 = vcombine.high %v2588_v15, %v2588_v15  ;;  %v2604_v26 = vrot.slane %v2588_v15, %v11288_v42  ;;  %v6061_v44 = vmax.f32 %v5845_v32, %v2572_v22  ;;  %v2638_v15 = vcombine.high %v2630_v38, %v2630_v38 }
 0x239   : > { %v10099_v51 = vpop.f32.mrb[93].mxu0  ;;  %v2619_v60 = vcombine.high %v2597_v1, %v2597_v1  ;;  %v2621_v5 = vcombine.high %v12007_v30, %v12007_v30  ;;  %v2646_v58 = vrot.slane %v2630_v38, %v11288_v42 }
 0x23a   : > { %v11999_v57 = vpop.f32.mrb[94].mxu0  ;;  %v12002_v51 = vcombine.low %v6628_v3, %v6635_v34  ;;  %v2618_v53 = vrot.slane %v2590_v12, %v11288_v42  ;;  %v2620_v37 = vcombine.high %v2604_v26, %v2604_v26  ;;  %v12013_v3 = vmax.f32 %v2573_v46, %v2597_v1 }
 0x23b   : > { %v10100_v50 = vpop.f32.mrb[95].mxu0  ;;  %v2637_v34 = vrot.slane %v2623_v52, %v11288_v42  ;;  %v5848_v46 = vmax.f32 %v2619_v60, %v2621_v5  ;;  %v2660_v45 = vrot.slane %v2638_v15, %v11288_v42  ;;  %v2668_v54 = vcombine.high %v2646_v58, %v2646_v58 }
 0x23c   : > { %v2622_v22 = vcombine.high %v2618_v53, %v2618_v53  ;;  %v5849_v32 = vmax.f32 %v2618_v53, %v2620_v37  ;;  %v6063_v56 = vmax.f32 %v12013_v3, %v12007_v30  ;;  %v870_v50 = vadd.f32 %v11741_v41, %v11773_v55 }
 0x23d   : > { %v2639_v1 = vcombine.high %v2637_v34, %v2637_v34  ;;  %v6064_v37 = vmax.f32 %v5848_v46, %v2604_v26  ;;  %v2670_v23 = vcombine.high %v2660_v45, %v2660_v45  ;;  %v5850_v55 = vmax.f32 %v2646_v58, %v2660_v45 }
 0x23e   : > { %v6065_v25 = vmax.f32 %v5849_v32, %v2622_v22  ;;  %v2672_v38 = vcombine.high %v870_v50, %v870_v50  ;;  %v2679_v53 = vrot.slane %v870_v50, %v11288_v42  ;;  %v6062_v22 = vmax.f32 %v5846_v35, %v2571_v48 }
 0x23f   : > { %v2667_v30 = vrot.slane %v2639_v1, %v11288_v42  ;;  %v6066_v20 = vmax.f32 %v5850_v55, %v2668_v54 }
 0x240   : > { %v12010_v10 = vpop.f32.mrb[96].mxu0  ;;  %v2686_v14 = vrot.slane %v2672_v38, %v11288_v42  ;;  %v2687_v60 = vcombine.high %v2679_v53, %v2679_v53  ;;  %v2695_v5 = vrot.slane %v2679_v53, %v11288_v42  ;;  %v875_v53 = vadd.f32 %v11741_v41, %v11781_v31 }
 0x241   : > { %v10103_v11 = vpop.f32.mrb[97].mxu0 }
 0x242   : > { %v12023_v12 = vpop.f32.mrb[98].mxu0  ;;  %v2653_v11 = vrot.slane %v2637_v34, %v11288_v42  ;;  %v6226_v34 = vmax.f32 %v11976_v43, %v6064_v37  ;;  %v2688_v50 = vcombine.high %v2686_v14, %v2686_v14  ;;  %v2702_v26 = vrot.slane %v2686_v14, %v11288_v42 }
 0x243   : > { %v10104_v52 = vpop.f32.mrb[99].mxu0  ;;  %v2709_v46 = vrot.slane %v2687_v60, %v11288_v42  ;;  %v2717_v58 = vcombine.high %v2695_v5, %v2695_v5  ;;  %v2721_v55 = vcombine.high %v875_v53, %v875_v53 }
 0x244   : > { %v2669_v3 = vcombine.high %v2653_v11, %v2653_v11  ;;  %v5851_v15 = vmax.f32 %v2670_v23, %v2653_v11  ;;  %v2671_v52 = vcombine.high %v2667_v30, %v2667_v30  ;;  %v14254_v23 = vmax.f32 %v11978_v6, %v11981_v63 }
 0x245   : > { %v2716_v48 = vrot.slane %v2688_v50, %v11288_v42  ;;  %v2718_v35 = vcombine.high %v2702_v26, %v2702_v26  ;;  %v2719_v54 = vcombine.high %v2709_v46, %v2709_v46  ;;  %v5853_v37 = vmax.f32 %v2709_v46, %v2717_v58 }
 0x246   : > { %v6067_v45 = vmax.f32 %v5851_v15, %v2667_v30  ;;  %v5852_v38 = vmax.f32 %v2669_v3, %v2671_v52  ;;  %v6228_v43 = vmax.f32 %v14254_v23, %v6066_v20  ;;  %v2728_v30 = vrot.slane %v875_v53, %v11288_v42 }
 0x247   : > { %v5854_v60 = vmax.f32 %v2702_v26, %v2716_v48  ;;  %v14255_v3 = vmax.f32 %v11974_v49, %v11958_v47  ;;  %v6069_v15 = vmax.f32 %v5853_v37, %v2719_v54  ;;  %v2735_v20 = vrot.slane %v2721_v55, %v11288_v42 }
 0x248   : > { %v12032_v32 = vpop.f32.mrb[100].mxu0  ;;  %v6229_v11 = vmax.f32 %v6061_v44, %v6067_v45  ;;  %v6068_v14 = vmax.f32 %v5852_v38, %v2695_v5  ;;  %v878_v6 = vadd.f32 %v11741_v41, %v11788_v4  ;;  %v2736_v44 = vcombine.high %v2728_v30, %v2728_v30 }
 0x249   : > { %v10107_v1 = vpop.f32.mrb[101].mxu0  ;;  %v6227_v31 = vmax.f32 %v14255_v3, %v6065_v25  ;;  %v6070_v63 = vmax.f32 %v5854_v60, %v2718_v35  ;;  %v2744_v5 = vrot.slane %v2728_v30, %v11288_v42  ;;  %v6231_v26 = vmax.f32 %v6063_v56, %v6069_v15 }
 0x24a   : > { %v2720_v1 = vcombine.high %v2716_v48, %v2716_v48  ;;  %v12046_v52 = vmax.f32 %v6062_v22, %v6068_v14  ;;  %v12052_v50 = vpop.f32.mrb[102].mxu0  ;;  %v2737_v46 = vcombine.high %v2735_v20, %v2735_v20  ;;  %v2751_v45 = vrot.slane %v2735_v20, %v11288_v42 }
 0x24b   : > { %v2770_v47 = vcombine.high %v878_v6, %v878_v6  ;;  %v10108_v25 = vpop.f32.mrb[103].mxu0  ;;  %v6298_v49 = vmax.f32 %v6226_v34, %v6070_v63  ;;  %v2758_v22 = vrot.slane %v2736_v44, %v11288_v42  ;;  %v2777_v4 = vrot.slane %v878_v6, %v11288_v42 }
 0x24c   : > { %v5855_v58 = vmax.f32 %v2720_v1, %v2744_v5  ;;  %v2765_v38 = vrot.slane %v2737_v46, %v11288_v42  ;;  %v2767_v53 = vcombine.high %v2751_v45, %v2751_v45  ;;  %v2766_v35 = vcombine.high %v2744_v5, %v2744_v5 }
 0x24d   : > { %v2784_v23 = vrot.slane %v2770_v47, %v11288_v42  ;;  %v2768_v56 = vcombine.high %v2758_v22, %v2758_v22  ;;  %v883_v37 = vadd.f32 %v11741_v41, %v11811_v9  ;;  %v2785_v60 = vcombine.high %v2777_v4, %v2777_v4 }
 0x24e   : > { %v6071_v54 = vmax.f32 %v5855_v58, %v2758_v22  ;;  %v2769_v34 = vcombine.high %v2765_v38, %v2765_v38  ;;  %v5857_v55 = vmax.f32 %v2765_v38, %v2767_v53  ;;  %v2793_v15 = vrot.slane %v2777_v4, %v11288_v42 }
 0x24f   : > { %v5856_v1 = vmax.f32 %v2766_v35, %v2768_v56  ;;  %v2786_v3 = vcombine.high %v2784_v23, %v2784_v23  ;;  %v12064_v20 = vmax.f32 %v6298_v49, 0.0  ;;  %v2807_v63 = vrot.slane %v2785_v60, %v11288_v42 }
 0x250   : > { %v12059_v48 = vpop.f32.mrb[104].mxu0  ;;  %v6299_v30 = vmax.f32 %v6227_v31, %v6071_v54  ;;  %v6073_v6 = vmax.f32 %v5857_v55, %v2769_v34  ;;  %v2800_v46 = vrot.slane %v2784_v23, %v11288_v42  ;;  %v2819_v9 = vcombine.high %v883_v37, %v883_v37 }
 0x251   : > { %v10111_v14 = vpop.f32.mrb[105].mxu0  ;;  %14256 = vst [vmem:[#allocation34_spill] sm:$0xff] %v12064_v20  ;;  %v6072_v44 = vmax.f32 %v5856_v1, %v2751_v45  ;;  %v2815_v25 = vcombine.high %v2793_v15, %v2793_v15  ;;  %v2817_v22 = vcombine.high %v2807_v63, %v2807_v63  ;;  %v5858_v58 = vmax.f32 %v2793_v15, %v2807_v63 }
 0x252   : > { %v12067_v5 = vmax.f32 %v6299_v30, 0.0  ;;  %v6301_v47 = vmax.f32 %v6229_v11, %v6073_v6  ;;  %v2814_v49 = vrot.slane %v2786_v3, %v11288_v42  ;;  %v2826_v45 = vrot.slane %v883_v37, %v11288_v42 }
 0x253   : > { %v6300_v38 = vmax.f32 %v6228_v43, %v6072_v44  ;;  %v5859_v4 = vmax.f32 %v2817_v22, %v2800_v46  ;;  %v6074_v35 = vmax.f32 %v5858_v58, %v2815_v25  ;;  %v2833_v23 = vrot.slane %v2819_v9, %v11288_v42 }
 0x254   : > { %14257 = vst [vmem:[#allocation35_spill] sm:$0xff] %v12067_v5  ;;  %v6637_v31 = vcombine.low %v12064_v20, %v12067_v5  ;;  %v12073_v53 = vmax.f32 %v6301_v47, 0.0  ;;  %v2834_v14 = vcombine.high %v2826_v45, %v2826_v45  ;;  %v2818_v60 = vcombine.high %v2814_v49, %v2814_v49 }
 0x255   : > { %v12076_v56 = vmax.f32 %v6300_v38, 0.0  ;;  %v6075_v11 = vmax.f32 %v5859_v4, %v2814_v49  ;;  %v6302_v54 = vmax.f32 %v12046_v52, %v6074_v35  ;;  %v2835_v34 = vcombine.high %v2833_v23, %v2833_v23  ;;  %v12094_v52 = vpop.f32.mrb[106].mxu0 }
 0x256   : > { %14258 = vst [vmem:[#allocation36_spill] sm:$0xff] %v12073_v53  ;;  %v12085_v1 = vrot.slane %v2826_v45, %v11288_v42  ;;  %v12088_v37 = vrot.slane %v6637_v31, %v11288_v42  ;;  %v2856_v3 = vrot.slane %v2834_v14, %v11288_v42  ;;  %v2816_v15 = vcombine.high %v2800_v46, %v2800_v46  ;;  %v10112_v63 = vpop.f32.mrb[107].mxu0 }
 0x257   : > { %14259 = vst [vmem:[#allocation37_spill] sm:$0xff] %v12076_v56  ;;  %v6638_v43 = vcombine.low %v12076_v56, %v12073_v53  ;;  %v12082_v55 = vmax.f32 %v6231_v26, %v6075_v11  ;;  %v12097_v6 = vrot.slane %v2833_v23, %v11288_v42  ;;  %v12100_v26 = vrot.slane %v2835_v34, %v11288_v42 }
 0x258   : > { %v2864_v9 = vcombine.high %v12085_v1, %v12085_v1  ;;  %v2866_v47 = vcombine.high %v2856_v3, %v2856_v3  ;;  %v12106_v25 = vmax.f32 %v2816_v15, %v2818_v60  ;;  %v12108_v22 = vmax.f32 %v6302_v54, 0.0  ;;  %v8733_v15 = vld [vmem:[#allocation8 + $0x248] sm:$0xff]  ;;  %v12165_v44 = vpop.f32.mrb[108].mxu0 }
 0x259   : > { %v12091_v30 = vrot.slane %v6638_v43, %v11288_v42  ;;  %v886_v46 = vadd.f32 %v11741_v41, %v11819_v16  ;;  %v2865_v38 = vcombine.high %v12097_v6, %v12097_v6  ;;  %v5862_v31 = vmax.f32 %v12097_v6, %v12100_v26 }
 0x25a   : > { %14260 = vst [vmem:[#allocation38_spill] sm:$0xff] %v12108_v22  ;;  %v5861_v58 = vmax.f32 %v2856_v3, %v2864_v9  ;;  %v2867_v4 = vcombine.high %v12100_v26, %v12100_v26  ;;  %v14147_v11 = vrot.slane %v11645_v62, 7  ;;  %v7490_v16 = vrot.slane %v11831_v61, 7  ;;  %v8732_v3 = vld [vmem:[#allocation8 + $0x240] sm:$0xff] }
 0x25b   : > { %v2868_v45 = vcombine.high %v886_v46, %v886_v46  ;;  %v2875_v23 = vrot.slane %v886_v46, %v11288_v42  ;;  %v14148_v54 = vrot.slane %v12002_v51, 7  ;;  %v891_v14 = vadd.f32 %v11741_v41, %v11846_v33 }
 0x25c   : > { %v12120_v35 = vmax.f32 %v5861_v58, %v2866_v47  ;;  %v894_v6 = vadd.f32 %v11741_v41, %v11856_v7  ;;  %v12143_v33 = vsel %vm7498_vm5, %v14147_v11, %v7490_v16  ;;  %v14264_v24 = vmax.f32 %v12106_v25, %v12085_v1 }
 0x25d   : > { %v2882_v43 = vrot.slane %v2868_v45, %v11288_v42  ;;  %v2883_v34 = vcombine.high %v2875_v23, %v2875_v23  ;;  %v2891_v60 = vrot.slane %v2875_v23, %v11288_v42  ;;  %v12137_v26 = vsel %vm7498_vm5, %v7490_v16, %v14148_v54  ;;  %14262 = vst [vmem:[#allocation40_spill] sm:$0xff] %v12143_v33 }
 0x25e   : > { %14261 = vst [vmem:[#allocation39_spill] sm:$0xff] %v12137_v26  ;;  %v2917_v63 = vcombine.high %v891_v14, %v891_v14  ;;  %v2924_v9 = vrot.slane %v891_v14, %v11288_v42  ;;  %v8741_v45 = vmul.f32 %v8732_v3, %v12143_v33  ;;  %v8742_v23 = vmul.f32 %v8733_v15, %v12137_v26  ;;  %v10115_v26 = vpop.f32.mrb[109].mxu0 }
 0x25f   : > { %v2884_v47 = vcombine.high %v2882_v43, %v2882_v43  ;;  %v12147_v58 = vrot.slane %v2882_v43, %v11288_v42  ;;  %v12150_v41 = vrot.slane %v2883_v34, %v11288_v42  ;;  %v2913_v7 = vcombine.high %v2891_v60, %v2891_v60 }
 0x260   : > { %v12152_v46 = vmax.f32 %v2867_v4, %v2891_v60  ;;  %v2931_v16 = vrot.slane %v2917_v63, %v11288_v42  ;;  %v2932_v54 = vcombine.high %v2924_v9, %v2924_v9  ;;  %v8750_v4 = vpack.c.bf16 %v8742_v23, %v8741_v45  ;;  %v12172_v45 = vpop.f32.mrb[110].mxu0 }
 0x261   : > { %v2912_v11 = vrot.slane %v2884_v47, %v11288_v42  ;;  %v2914_v14 = vcombine.high %v12147_v58, %v12147_v58  ;;  %v2915_v43 = vcombine.high %v12150_v41, %v12150_v41  ;;  %v2940_v3 = vrot.slane %v2924_v9, %v11288_v42  ;;  %v10116_v26 = vpop.f32.mrb[111].mxu0 }
 0x262   : > { %v2933_v60 = vcombine.high %v2931_v16, %v2931_v16  ;;  %v2947_v49 = vrot.slane %v2931_v16, %v11288_v42  ;;  %10474 = vmatmul.mubr.bf16.vlgmr.msra.gmra.mrb[164].mxu0 %v8750_v4  ;;  %v2954_v33 = vrot.slane %v2932_v54, %v11288_v42  ;;  %v2966_v34 = vcombine.high %v894_v6, %v894_v6 }
 0x263   : > { %v2916_v15 = vcombine.high %v2912_v11, %v2912_v11  ;;  %v12167_v63 = vmax.f32 %v2913_v7, %v2915_v43  ;;  %v5865_v47 = vmax.f32 %v2912_v11, %v2914_v14  ;;  %v2962_v53 = vcombine.high %v2940_v3, %v2940_v3 }
 0x264   : > { %v2961_v20 = vrot.slane %v2933_v60, %v11288_v42  ;;  %v2963_v23 = vcombine.high %v2947_v49, %v2947_v49  ;;  %v2973_v7 = vrot.slane %v894_v6, %v11288_v42  ;;  %v6078_v43 = vmax.f32 %v5862_v31, %v2865_v38  ;;  %v12180_v60 = vpop.f32.mrb[112].mxu0 }
 0x265   : > { %v6080_v9 = vmax.f32 %v12167_v63, %v12147_v58  ;;  %v14263_v11 = vmov 0.0   ;;  %v2964_v16 = vcombine.high %v2954_v33, %v2954_v33  ;;  %v5866_v14 = vmax.f32 %v2940_v3, %v2954_v33  ;;  %v12186_v58 = vld [vmem:[%s14127_s2] ss:$0 sm:$0xff]  ;;  %v10119_v6 = vpop.f32.mrb[113].mxu0 }
 0x266   : > { %10477 = vmatprep.mubr.msk.bf16.mxu0 %vm10927_vm0, %v14263_v11  ;;  %v2965_v54 = vcombine.high %v2961_v20, %v2961_v20  ;;  %v2980_v4 = vrot.slane %v2966_v34, %v11288_v42  ;;  %v2981_v56 = vcombine.high %v2973_v7, %v2973_v7  ;;  %v2989_v5 = vrot.slane %v2973_v7, %v11288_v42  ;;  %v12202_v1 = vpop.f32.mrb[114].mxu0 }
 0x267   : > { %v899_v38 = vadd.f32 %v12186_v58, %v11876_v17  ;;  %v6081_v31 = vmax.f32 %v5865_v47, %v2916_v15  ;;  %v5867_v63 = vmax.f32 %v2964_v16, %v2947_v49  ;;  %v6082_v33 = vmax.f32 %v5866_v14, %v2962_v53 }
 0x268   : > { %v2982_v3 = vcombine.high %v2980_v4, %v2980_v4  ;;  %v2996_v34 = vrot.slane %v2980_v4, %v11288_v42  ;;  %v3003_v26 = vrot.slane %v2981_v56, %v11288_v42  ;;  %v3011_v59 = vcombine.high %v2989_v5, %v2989_v5 }
 0x269   : > { %v5868_v28 = vmax.f32 %v2963_v23, %v2965_v54  ;;  %v3015_v7 = vcombine.high %v899_v38, %v899_v38  ;;  %v6083_v13 = vmax.f32 %v5867_v63, %v2961_v20  ;;  %v6232_v62 = vmax.f32 %v14264_v24, %v6082_v33 }
 0x26a   : > { %v3010_v61 = vrot.slane %v2982_v3, %v11288_v42  ;;  %v3012_v17 = vcombine.high %v2996_v34, %v2996_v34  ;;  %v3013_v15 = vcombine.high %v3003_v26, %v3003_v26  ;;  %v5869_v47 = vmax.f32 %v3003_v26, %v3011_v59 }
 0x26b   : > { %v6084_v49 = vmax.f32 %v5868_v28, %v2989_v5  ;;  %v3022_v53 = vrot.slane %v899_v38, %v11288_v42  ;;  %v6233_v16 = vmax.f32 %v12120_v35, %v6083_v13  ;;  %v3029_v23 = vrot.slane %v3015_v7, %v11288_v42  ;;  %v10120_v13 = vpop.f32.mrb[115].mxu0 }
 0x26c   : > { %v5870_v14 = vmax.f32 %v2996_v34, %v3010_v61  ;;  %v3014_v56 = vcombine.high %v3010_v61, %v3010_v61  ;;  %v6085_v54 = vmax.f32 %v5869_v47, %v3013_v15  ;;  %v902_v28 = vadd.f32 %v12186_v58, %v11883_v27  ;;  %v12213_v26 = vpop.f32.mrb[116].mxu0 }
 0x26d   : > { %v12199_v20 = vmax.f32 %v6078_v43, %v6084_v49  ;;  %v3030_v4 = vcombine.high %v3022_v53, %v3022_v53  ;;  %v3038_v24 = vrot.slane %v3022_v53, %v11288_v42  ;;  %v3031_v6 = vcombine.high %v3029_v23, %v3029_v23 }
 0x26e   : > { %v6086_v25 = vmax.f32 %v5870_v14, %v3012_v17  ;;  %v3045_v59 = vrot.slane %v3029_v23, %v11288_v42  ;;  %v14265_v61 = vmax.f32 %v12152_v46, %v12150_v41  ;;  %v3064_v3 = vcombine.high %v902_v28, %v902_v28  ;;  %v10123_v41 = vpop.f32.mrb[117].mxu0 }
 0x26f   : > { %v3052_v35 = vrot.slane %v3030_v4, %v11288_v42  ;;  %v3060_v43 = vcombine.high %v3038_v24, %v3038_v24  ;;  %v5871_v38 = vmax.f32 %v3014_v56, %v3038_v24  ;;  %v3059_v63 = vrot.slane %v3031_v6, %v11288_v42 }
 0x270   : > { %v6235_v5 = vmax.f32 %v14265_v61, %v6085_v54  ;;  %v3061_v33 = vcombine.high %v3045_v59, %v3045_v59  ;;  %v3071_v34 = vrot.slane %v902_v28, %v11288_v42  ;;  %v907_v27 = vadd.f32 %v12186_v58, %v11893_v8 }
 0x271   : > { %v3062_v7 = vcombine.high %v3052_v35, %v3052_v35  ;;  %v6087_v17 = vmax.f32 %v5871_v38, %v3052_v35  ;;  %v6236_v15 = vmax.f32 %v6080_v9, %v6086_v25  ;;  %v3063_v46 = vcombine.high %v3059_v63, %v3059_v63 }
 0x272   : > { %v5873_v47 = vmax.f32 %v3059_v63, %v3061_v33  ;;  %v3078_v49 = vrot.slane %v3064_v3, %v11288_v42  ;;  %v3079_v53 = vcombine.high %v3071_v34, %v3071_v34  ;;  %v3087_v23 = vrot.slane %v3071_v34, %v11288_v42 }
 0x273   : > { %v5872_v14 = vmax.f32 %v3060_v43, %v3062_v7  ;;  %v6237_v56 = vmax.f32 %v6081_v31, %v6087_v17  ;;  %v3113_v54 = vcombine.high %v907_v27, %v907_v27  ;;  %v12222_v8 = vmax.f32 %v12082_v55, 0.0 }
 0x274   : > { %v6089_v4 = vmax.f32 %v5873_v47, %v3063_v46  ;;  %v3080_v24 = vcombine.high %v3078_v49, %v3078_v49  ;;  %v3094_v6 = vrot.slane %v3078_v49, %v11288_v42  ;;  %v3101_v28 = vrot.slane %v3079_v53, %v11288_v42  ;;  %v12235_v46 = vpop.f32.mrb[118].mxu0 }
 0x275   : > { %14266 = vst [vmem:[#allocation41_spill] sm:$0xff] %v12222_v8  ;;  %v6088_v9 = vmax.f32 %v5872_v14, %v3045_v59  ;;  %v3109_v25 = vcombine.high %v3087_v23, %v3087_v23  ;;  %v3120_v13 = vrot.slane %v907_v27, %v11288_v42  ;;  %v3127_v43 = vrot.slane %v3113_v54, %v11288_v42  ;;  %v10124_v14 = vpop.f32.mrb[119].mxu0 }
 0x276   : > { %v6305_v61 = vmax.f32 %v6233_v16, %v6089_v4  ;;  %v3108_v35 = vrot.slane %v3080_v24, %v11288_v42  ;;  %v3111_v31 = vcombine.high %v3101_v28, %v3101_v28  ;;  %v3110_v63 = vcombine.high %v3094_v6, %v3094_v6 }
 0x277   : > { %v6304_v38 = vmax.f32 %v6232_v62, %v6088_v9  ;;  %v5874_v33 = vmax.f32 %v3087_v23, %v3101_v28  ;;  %v3128_v3 = vcombine.high %v3120_v13, %v3120_v13  ;;  %v3136_v55 = vrot.slane %v3120_v13, %v11288_v42 }
 0x278   : > { %v12227_v34 = vmax.f32 %v6305_v61, 0.0  ;;  %v5875_v7 = vmax.f32 %v3111_v31, %v3094_v6  ;;  %v3112_v17 = vcombine.high %v3108_v35, %v3108_v35  ;;  %v6639_v59 = vcombine.low %v12108_v22, %v12222_v8 }
 0x279   : > { %v12232_v27 = vmax.f32 %v6304_v38, 0.0  ;;  %v6090_v16 = vmax.f32 %v5874_v33, %v3109_v25  ;;  %v3150_v41 = vrot.slane %v3128_v3, %v11288_v42  ;;  %v3129_v47 = vcombine.high %v3127_v43, %v3127_v43 }
 0x27a   : > { %14267 = vst [vmem:[#allocation42_spill] sm:$0xff] %v12227_v34  ;;  %v6091_v62 = vmax.f32 %v5875_v7, %v3108_v35  ;;  %v3158_v49 = vcombine.high %v3136_v55, %v3136_v55  ;;  %v5876_v53 = vmax.f32 %v3110_v63, %v3112_v17  ;;  %v6661_v9 = vrot.slane %v6639_v59, %v11288_v42 }
 0x27b   : > { %14268 = vst [vmem:[#allocation43_spill] sm:$0xff] %v12232_v27  ;;  %v6640_v23 = vcombine.low %v12232_v27, %v12227_v34  ;;  %v6306_v54 = vmax.f32 %v12199_v20, %v6090_v16  ;;  %v3160_v4 = vcombine.high %v3150_v41, %v3150_v41  ;;  %v910_v61 = vadd.f32 %v12186_v58, %v11901_v18 }
 0x27c   : > { %v6307_v24 = vmax.f32 %v6235_v5, %v6091_v62  ;;  %v5877_v6 = vmax.f32 %v3150_v41, %v3158_v49  ;;  %v6092_v28 = vmax.f32 %v5876_v53, %v3136_v55  ;;  %v3157_v31 = vrot.slane %v3129_v47, %v11288_v42 }
 0x27d   : > { %v6668_v25 = vrot.slane %v6640_v23, %v11288_v42  ;;  %v6378_v13 = vmax.f32 %v6306_v54, 0.0  ;;  %v3162_v3 = vcombine.high %v910_v61, %v910_v61  ;;  %v3169_v20 = vrot.slane %v910_v61, %v11288_v42 }
 0x27e   : > { %v6379_v35 = vmax.f32 %v6307_v24, 0.0  ;;  %v6093_v38 = vmax.f32 %v5877_v6, %v3160_v4  ;;  %v6308_v63 = vmax.f32 %v6236_v15, %v6092_v28  ;;  %v14269_v59 = vcombine.low %v12088_v37, %v12091_v30 }
 0x27f   : > { %v6670_v33 = vcombine.low %v6661_v9, %v6668_v25  ;;  %v7710_v7 = vpack.c.bf16 %v6378_v13, %v6378_v13  ;;  %v3176_v41 = vrot.slane %v3162_v3, %v11288_v42  ;;  %v3177_v62 = vcombine.high %v3169_v20, %v3169_v20 }
 0x280   : > { %v6686_v5 = vcombine.low %v6378_v13, %v6379_v35  ;;  %v7711_v17 = vpack.c.bf16 %v6379_v35, %v6379_v35  ;;  %v6309_v55 = vmax.f32 %v6237_v56, %v6093_v38  ;;  %v6677_v16 = vrot.slane %v14269_v59, %v11288_v42 }
 0x281   : > { %v6684_v18 = vrot.slane %v6670_v33, %v11288_v42  ;;  %v12252_v15 = vmax.f32 %v6308_v63, 0.0  ;;  %v3161_v53 = vcombine.high %v3157_v31, %v3157_v31  ;;  %v3178_v23 = vcombine.high %v3176_v41, %v3176_v41 }
 0x282   : > { %v7872_v47 = vunpack.c.l.b16 %v7711_v17  ;;  %v12254_v49 = vmax.f32 %v6309_v55, 0.0  ;;  %v3185_v56 = vrot.slane %v3169_v20, %v11288_v42  ;;  %v12260_v54 = vrot.slane %v3176_v41, %v11288_v42 }
 0x283   : > { %14270 = vst [vmem:[#allocation44_spill] sm:$0xff] %v12252_v15  ;;  %v12256_v14 = vcombine.low %v6677_v16, %v6684_v18  ;;  %v7871_v37 = vunpack.c.l.b16 %v7710_v7  ;;  %v915_v24 = vadd.f32 %v12186_v58, %v11915_v29  ;;  %v12267_v6 = vrot.slane %v6686_v5, %v11288_v42  ;;  %v12289_v5 = vpop.f32.mrb[120].mxu0 }
 0x284   : > { %14271 = vst [vmem:[#allocation45_spill] sm:$0xff] %v12254_v49  ;;  %v7974_v30 = vrot.slane %v7872_v47, 7  ;;  %v6687_v4 = vcombine.low %v12252_v15, %v12254_v49  ;;  %v3143_v28 = vrot.slane %v3127_v43, %v11288_v42  ;;  %v12271_v9 = vrot.slane %v3177_v62, %v11288_v42  ;;  %v10127_v59 = vpop.f32.mrb[121].mxu0 }
 0x285   : > { %v12280_v61 = vrot.slane %v3178_v23, %v11288_v42  ;;  %v3208_v29 = vcombine.high %v12260_v54, %v12260_v54  ;;  %v3207_v38 = vcombine.high %v3185_v56, %v3185_v56  ;;  %v5879_v63 = vmax.f32 %v3161_v53, %v3185_v56  ;;  %v12300_v47 = vpop.f32.mrb[122].mxu0 }
 0x286   : > { %v12274_v25 = vsel %vm7912_vm1, %v7974_v30, %v7871_v37  ;;  %v12277_v13 = vrot.slane %v6687_v4, %v11288_v42  ;;  %v5878_v35 = vmax.f32 %v3143_v28, %v3157_v31  ;;  %v3209_v43 = vcombine.high %v12271_v9, %v12271_v9  ;;  %v10128_v30 = vpop.f32.mrb[123].mxu0 }
 0x287   : > { %14272 = vst [vmem:[#allocation46_spill] sm:$0xff] %v12274_v25  ;;  %v3211_v3 = vcombine.high %v915_v24, %v915_v24  ;;  %v3218_v20 = vrot.slane %v915_v24, %v11288_v42  ;;  %v3159_v7 = vcombine.high %v3143_v28, %v3143_v28  ;;  %v6095_v55 = vmax.f32 %v5879_v63, %v12271_v9  ;;  %v12308_v9 = vpop.f32.mrb[124].mxu0 }
 0x288   : > { %v12291_v17 = vmax.f32 %v3207_v38, %v3209_v43  ;;  %v918_v31 = vadd.f32 %v12186_v58, %v11922_v0  ;;  %v3210_v16 = vcombine.high %v12280_v61, %v12280_v61  ;;  %v5881_v18 = vmax.f32 %v12280_v61, %v3208_v29  ;;  %v10131_v43 = vpop.f32.mrb[125].mxu0 }
 0x289   : > { %v3225_v41 = vrot.slane %v3211_v3, %v11288_v42  ;;  %v3226_v62 = vcombine.high %v3218_v20, %v3218_v20  ;;  %v6094_v56 = vmax.f32 %v5878_v35, %v3159_v7  ;;  %v923_v37 = vadd.f32 %v12186_v58, %v11936_v36  ;;  %v12331_v49 = vpop.f32.mrb[126].mxu0 }
 0x28a   : > { %v3260_v53 = vcombine.high %v918_v31, %v918_v31  ;;  %v3267_v23 = vrot.slane %v918_v31, %v11288_v42  ;;  %v3234_v4 = vrot.slane %v3218_v20, %v11288_v42  ;;  %v6096_v61 = vmax.f32 %v12291_v17, %v12260_v54 }
 0x28b   : > { %v3227_v0 = vcombine.high %v3225_v41, %v3225_v41  ;;  %v3241_v24 = vrot.slane %v3225_v41, %v11288_v42  ;;  %v3248_v28 = vrot.slane %v3226_v62, %v11288_v42  ;;  %v3309_v20 = vcombine.high %v923_v37, %v923_v37 }
 0x28c   : > { %v3274_v29 = vrot.slane %v3260_v53, %v11288_v42  ;;  %v3275_v38 = vcombine.high %v3267_v23, %v3267_v23  ;;  %v3283_v35 = vrot.slane %v3267_v23, %v11288_v42  ;;  %v3316_v53 = vrot.slane %v923_v37, %v11288_v42 }
 0x28d   : > { %v12315_v36 = vrot.slane %v3227_v0, %v11288_v42  ;;  %v3257_v63 = vcombine.high %v3241_v24, %v3241_v24  ;;  %v3258_v3 = vcombine.high %v3248_v28, %v3248_v28  ;;  %v5882_v62 = vmax.f32 %v3234_v4, %v3248_v28 }
 0x28e   : > { %v3276_v7 = vcombine.high %v3274_v29, %v3274_v29  ;;  %v3290_v31 = vrot.slane %v3274_v29, %v11288_v42  ;;  %v3297_v59 = vrot.slane %v3275_v38, %v11288_v42  ;;  %v3305_v41 = vcombine.high %v3283_v35, %v3283_v35 }
 0x28f   : > { %v12319_v54 = vmax.f32 %v3258_v3, %v3241_v24  ;;  %v3259_v17 = vcombine.high %v12315_v36, %v12315_v36  ;;  %v3323_v38 = vrot.slane %v3309_v20, %v11288_v42  ;;  %v3324_v25 = vcombine.high %v3316_v53, %v3316_v53  ;;  %v10132_v20 = vpop.f32.mrb[127].mxu0 }
 0x290   : > { %v3304_v23 = vrot.slane %v3276_v7, %v11288_v42  ;;  %v3306_v30 = vcombine.high %v3290_v31, %v3290_v31  ;;  %v3307_v0 = vcombine.high %v3297_v59, %v3297_v59  ;;  %v5885_v43 = vmax.f32 %v3297_v59, %v3305_v41 }
 0x291   : > { %v5884_v29 = vmax.f32 %v3257_v63, %v3259_v17  ;;  %v3332_v34 = vrot.slane %v3316_v53, %v11288_v42  ;;  %v3325_v8 = vcombine.high %v3323_v38, %v3323_v38  ;;  %v3339_v37 = vrot.slane %v3323_v38, %v11288_v42 }
 0x292   : > { %v5886_v28 = vmax.f32 %v3290_v31, %v3304_v23  ;;  %v6101_v24 = vmax.f32 %v5885_v43, %v3307_v0  ;;  %v3308_v3 = vcombine.high %v3304_v23, %v3304_v23  ;;  %v3346_v7 = vrot.slane %v3324_v25, %v11288_v42 }
 0x293   : > { %v6100_v27 = vmax.f32 %v5884_v29, %v3283_v35  ;;  %v3256_v59 = vcombine.high %v3234_v4, %v3234_v4  ;;  %v12338_v31 = vrot.slane %v3325_v8, %v11288_v42  ;;  %v3354_v53 = vcombine.high %v3332_v34, %v3332_v34 }
 0x294   : > { %v6102_v41 = vmax.f32 %v5886_v28, %v3306_v30  ;;  %v12333_v33 = vmax.f32 %v6095_v55, %v6101_v24  ;;  %v5887_v63 = vmax.f32 %v3308_v3, %v3332_v34  ;;  %v3356_v35 = vcombine.high %v3346_v7, %v3346_v7  ;;  %v12344_v30 = vpop.f32.mrb[128].mxu0 }
 0x295   : > { %v12335_v17 = vmax.f32 %v6094_v56, %v6100_v27  ;;  %v6097_v23 = vmax.f32 %v5881_v18, %v3210_v16  ;;  %v926_v25 = vadd.f32 %v12186_v58, %v11945_v39  ;;  %v931_v4 = vadd.f32 %v12186_v58, %v11971_v21  ;;  %14273 = vst [vmem:[#allocation47_spill] sm:$0xff] %v12344_v30  ;;  %v10135_v56 = vpop.f32.mrb[129].mxu0 }
 0x296   : > { %v6103_v0 = vmax.f32 %v5887_v63, %v3346_v7  ;;  %v6098_v55 = vmax.f32 %v5882_v62, %v3256_v59  ;;  %v3355_v43 = vcombine.high %v3339_v37, %v3339_v37  ;;  %v5888_v29 = vmax.f32 %v3354_v53, %v3356_v35  ;;  %v12357_v20 = vpop.f32.mrb[130].mxu0 }
 0x297   : > { %v6240_v27 = vmax.f32 %v6096_v61, %v6102_v41  ;;  %v3358_v8 = vcombine.high %v926_v25, %v926_v25  ;;  %v3365_v34 = vrot.slane %v926_v25, %v11288_v42  ;;  %v3407_v28 = vcombine.high %v931_v4, %v931_v4  ;;  %14274 = vst [vmem:[#allocation48_spill] sm:$0xff] %v12357_v20 }
 0x298   : > { %v6241_v38 = vmax.f32 %v6097_v23, %v6103_v0  ;;  %v3357_v16 = vcombine.high %v12338_v31, %v12338_v31  ;;  %v6104_v18 = vmax.f32 %v5888_v29, %v3339_v37  ;;  %v3414_v39 = vrot.slane %v931_v4, %v11288_v42  ;;  %v10136_v23 = vpop.f32.mrb[131].mxu0 }
 0x299   : > { %v934_v21 = vadd.f32 %v12186_v58, %v11999_v57  ;;  %v3372_v62 = vrot.slane %v3358_v8, %v11288_v42  ;;  %v3373_v24 = vcombine.high %v3365_v34, %v3365_v34  ;;  %v3381_v61 = vrot.slane %v3365_v34, %v11288_v42 }
 0x29a   : > { %v3421_v3 = vrot.slane %v3407_v28, %v11288_v42  ;;  %v5889_v7 = vmax.f32 %v12338_v31, %v3355_v43  ;;  %v6242_v59 = vmax.f32 %v6098_v55, %v6104_v18  ;;  %v3422_v41 = vcombine.high %v3414_v39, %v3414_v39 }
 0x29b   : > { %v3430_v63 = vrot.slane %v3414_v39, %v11288_v42  ;;  %v3374_v37 = vcombine.high %v3372_v62, %v3372_v62  ;;  %v3388_v53 = vrot.slane %v3372_v62, %v11288_v42  ;;  %v3395_v57 = vrot.slane %v3373_v24, %v11288_v42 }
 0x29c   : > { %v3456_v35 = vcombine.high %v934_v21, %v934_v21  ;;  %v3423_v0 = vcombine.high %v3421_v3, %v3421_v3  ;;  %v3437_v25 = vrot.slane %v3421_v3, %v11288_v42  ;;  %v3444_v4 = vrot.slane %v3422_v41, %v11288_v42 }
 0x29d   : > { %v3452_v29 = vcombine.high %v3430_v63, %v3430_v63  ;;  %v3402_v31 = vrot.slane %v3374_v37, %v11288_v42  ;;  %v3403_v55 = vcombine.high %v3381_v61, %v3381_v61  ;;  %v3405_v43 = vcombine.high %v3395_v57, %v3395_v57 }
 0x29e   : > { %v5890_v56 = vmax.f32 %v3381_v61, %v3395_v57  ;;  %v3404_v8 = vcombine.high %v3388_v53, %v3388_v53  ;;  %v3451_v34 = vrot.slane %v3423_v0, %v11288_v42  ;;  %v3454_v28 = vcombine.high %v3444_v4, %v3444_v4 }
 0x29f   : > { %v5893_v18 = vmax.f32 %v3444_v4, %v3452_v29  ;;  %v5891_v39 = vmax.f32 %v3405_v43, %v3388_v53  ;;  %v3406_v24 = vcombine.high %v3402_v31, %v3402_v31  ;;  %v3463_v23 = vrot.slane %v934_v21, %v11288_v42 }
 0x2a0   : > { %v6106_v62 = vmax.f32 %v5890_v56, %v3403_v55  ;;  %v3453_v15 = vcombine.high %v3437_v25, %v3437_v25  ;;  %v5894_v3 = vmax.f32 %v3437_v25, %v3451_v34  ;;  %v3470_v41 = vrot.slane %v3456_v35, %v11288_v42 }
 0x2a1   : > { %v6109_v22 = vmax.f32 %v5893_v18, %v3454_v28  ;;  %v6107_v2 = vmax.f32 %v5891_v39, %v3402_v31  ;;  %v5892_v19 = vmax.f32 %v3404_v8, %v3406_v24  ;;  %v3471_v61 = vcombine.high %v3463_v23, %v3463_v23 }
 0x2a2   : > { %v6310_v37 = vmax.f32 %v12335_v17, %v6106_v62  ;;  %v6110_v57 = vmax.f32 %v5894_v3, %v3453_v15  ;;  %v3472_v0 = vcombine.high %v3470_v41, %v3470_v41  ;;  %v6105_v30 = vmax.f32 %v5889_v7, %v3357_v16 }
 0x2a3   : > { %v6313_v20 = vmax.f32 %v6241_v38, %v6109_v22  ;;  %v6311_v53 = vmax.f32 %v12333_v33, %v6107_v2  ;;  %v6108_v4 = vmax.f32 %v5892_v19, %v3430_v63  ;;  %v3455_v29 = vcombine.high %v3451_v34, %v3451_v34 }
 0x2a4   : > { %v6314_v55 = vmax.f32 %v6242_v59, %v6110_v57  ;;  %v3479_v21 = vrot.slane %v3463_v23, %v11288_v42  ;;  %v12371_v25 = vrot.slane %v3470_v41, %v11288_v42  ;;  %v3493_v35 = vrot.slane %v3471_v61, %v11288_v42  ;;  %v12403_v23 = vpop.f32.mrb[132].mxu0 }
 0x2a5   : > { %v12374_v31 = vmax.f32 %v6310_v37, 0.0  ;;  %v12376_v17 = vmax.f32 %v6311_v53, 0.0  ;;  %v6312_v15 = vmax.f32 %v6240_v27, %v6108_v4  ;;  %v12378_v22 = vmax.f32 %v6313_v20, 0.0  ;;  %v10139_v61 = vpop.f32.mrb[133].mxu0 }
 0x2a6   : > { %v3500_v38 = vrot.slane %v3472_v0, %v11288_v42  ;;  %v3503_v33 = vcombine.high %v3493_v35, %v3493_v35  ;;  %v5895_v16 = vmax.f32 %v3455_v29, %v3479_v21  ;;  %v3502_v7 = vcombine.high %v12371_v25, %v12371_v25 }
 0x2a7   : > { %14275 = vst [vmem:[#allocation49_spill] sm:$0xff] %v12374_v31  ;;  %14276 = vst [vmem:[#allocation50_spill] sm:$0xff] %v12376_v17  ;;  %v6688_v19 = vcombine.low %v12374_v31, %v12376_v17  ;;  %v12383_v2 = vmax.f32 %v6312_v15, 0.0  ;;  %v14279_v59 = vmax.f32 %v12319_v54, %v12315_v36  ;;  %v3501_v20 = vcombine.high %v3479_v21, %v3479_v21  ;;  %v12418_v15 = vpop.f32.mrb[134].mxu0 }
 0x2a8   : > { %14277 = vst [vmem:[#allocation51_spill] sm:$0xff] %v12378_v22  ;;  %v12392_v43 = vmax.f32 %v6314_v55, 0.0  ;;  %v3504_v56 = vcombine.high %v3500_v38, %v3500_v38  ;;  %v6111_v8 = vmax.f32 %v5895_v16, %v3493_v35  ;;  %v939_v34 = vadd.f32 %v12186_v58, %v12010_v10  ;;  %v10140_v16 = vpop.f32.mrb[135].mxu0 }
 0x2a9   : > { %14278 = vst [vmem:[#allocation52_spill] sm:$0xff] %v12383_v2  ;;  %v6243_v63 = vmax.f32 %v14279_v59, %v6105_v30  ;;  %v6689_v27 = vcombine.low %v12383_v2, %v12378_v22  ;;  %v6710_v28 = vrot.slane %v6688_v19, %v11288_v42  ;;  %v12398_v39 = vmax.f32 %v3501_v20, %v3503_v33  ;;  %v12445_v61 = vpop.f32.mrb[136].mxu0 }
 0x2aa   : > { %14280 = vst [vmem:[#allocation53_spill] sm:$0xff] %v12392_v43  ;;  %v942_v36 = vadd.f32 %v12186_v58, %v12023_v12  ;;  %v5897_v54 = vmax.f32 %v3500_v38, %v3502_v7  ;;  %v3505_v62 = vcombine.high %v939_v34, %v939_v34  ;;  %v3512_v24 = vrot.slane %v939_v34, %v11288_v42 }
 0x2ab   : > { %v6717_v18 = vrot.slane %v6689_v27, %v11288_v42  ;;  %v6315_v30 = vmax.f32 %v6243_v63, %v6111_v8  ;;  %v947_v37 = vadd.f32 %v12186_v58, %v12032_v32  ;;  %v14282_v4 = vcombine.low %v12267_v6, %v12277_v13 }
 0x2ac   : > { %v3554_v41 = vcombine.high %v942_v36, %v942_v36  ;;  %v3561_v10 = vrot.slane %v942_v36, %v11288_v42  ;;  %v3519_v0 = vrot.slane %v3505_v62, %v11288_v42  ;;  %v3520_v12 = vcombine.high %v3512_v24, %v3512_v24 }
 0x2ad   : > { %v6719_v3 = vcombine.low %v6710_v28, %v6717_v18  ;;  %v12408_v57 = vmax.f32 %v6315_v30, 0.0  ;;  %v3528_v53 = vrot.slane %v3512_v24, %v11288_v42  ;;  %v6726_v29 = vrot.slane %v14282_v4, %v11288_v42 }
 0x2ae   : > { %v3568_v21 = vrot.slane %v3554_v41, %v11288_v42  ;;  %v3569_v35 = vcombine.high %v3561_v10, %v3561_v10  ;;  %v3521_v38 = vcombine.high %v3519_v0, %v3519_v0  ;;  %v3535_v19 = vrot.slane %v3519_v0, %v11288_v42 }
 0x2af   : > { %14281 = vst [vmem:[#allocation54_spill] sm:$0xff] %v12408_v57  ;;  %v6733_v55 = vrot.slane %v6719_v3, %v11288_v42  ;;  %v12424_v33 = vrot.slane %v3561_v10, %v11288_v42  ;;  %v3542_v13 = vrot.slane %v3520_v12, %v11288_v42  ;;  %v3550_v27 = vcombine.high %v3528_v53, %v3528_v53 }
 0x2b0   : > { %v3570_v59 = vcombine.high %v3568_v21, %v3568_v21  ;;  %v12432_v63 = vrot.slane %v3521_v38, %v11288_v42  ;;  %v3603_v20 = vcombine.high %v947_v37, %v947_v37  ;;  %v6113_v8 = vmax.f32 %v5897_v54, %v3504_v56 }
 0x2b1   : > { %v12426_v7 = vcombine.low %v6726_v29, %v6733_v55  ;;  %v3552_v34 = vcombine.high %v3542_v13, %v3542_v13  ;;  %v5898_v28 = vmax.f32 %v3528_v53, %v3542_v13  ;;  %v3584_v18 = vrot.slane %v3568_v21, %v11288_v42  ;;  %v10143_v29 = vpop.f32.mrb[137].mxu0 }
 0x2b2   : > { %v3591_v36 = vrot.slane %v3569_v35, %v11288_v42  ;;  %v3551_v30 = vcombine.high %v3535_v19, %v3535_v19  ;;  %v3553_v62 = vcombine.high %v12432_v63, %v12432_v63  ;;  %v3598_v24 = vrot.slane %v3570_v59, %v11288_v42 }
 0x2b3   : > { %14283 = vst [vmem:[#allocation55_spill] sm:$0xff] %v12426_v7  ;;  %v3599_v3 = vcombine.high %v12424_v33, %v12424_v33  ;;  %v12441_v41 = vmax.f32 %v3552_v34, %v3535_v19  ;;  %v12443_v10 = vmax.f32 %v5898_v28, %v3550_v27  ;;  %v3600_v56 = vcombine.high %v3584_v18, %v3584_v18  ;;  %v12455_v19 = vpop.f32.mrb[138].mxu0 }
 0x2b4   : > { %v3601_v54 = vcombine.high %v3591_v36, %v3591_v36  ;;  %v12447_v0 = vmax.f32 %v3551_v30, %v3553_v62  ;;  %v5902_v53 = vmax.f32 %v3584_v18, %v3598_v24  ;;  %v3602_v4 = vcombine.high %v3598_v24, %v3598_v24  ;;  %v10144_v34 = vpop.f32.mrb[139].mxu0 }
 0x2b5   : > { %v5901_v12 = vmax.f32 %v3591_v36, %v3599_v3  ;;  %v3610_v21 = vrot.slane %v947_v37, %v11288_v42  ;;  %v3617_v35 = vrot.slane %v3603_v20, %v11288_v42  ;;  %v950_v38 = vadd.f32 %v12186_v58, %v12052_v50  ;;  %v12465_v24 = vpop.f32.mrb[140].mxu0 }
 0x2b6   : > { %v6116_v16 = vmax.f32 %v12447_v0, %v12424_v33  ;;  %v6118_v59 = vmax.f32 %v5902_v53, %v3600_v56  ;;  %v955_v27 = vadd.f32 %v12186_v58, %v12059_v48 }
 0x2b7   : > { %v6117_v13 = vmax.f32 %v5901_v12, %v3601_v54  ;;  %v3618_v28 = vcombine.high %v3610_v21, %v3610_v21  ;;  %v3619_v18 = vcombine.high %v3617_v35, %v3617_v35  ;;  %v3626_v37 = vrot.slane %v3610_v21, %v11288_v42  ;;  %v10147_v54 = vpop.f32.mrb[141].mxu0 }
 0x2b8   : > { %v3633_v20 = vrot.slane %v3617_v35, %v11288_v42  ;;  %v3652_v36 = vcombine.high %v950_v38, %v950_v38  ;;  %v3659_v50 = vrot.slane %v950_v38, %v11288_v42  ;;  %v3701_v30 = vcombine.high %v955_v27, %v955_v27 }
 0x2b9   : > { %v3708_v62 = vrot.slane %v955_v27, %v11288_v42  ;;  %v3640_v33 = vrot.slane %v3618_v28, %v11288_v42  ;;  %v3647_v3 = vrot.slane %v3619_v18, %v11288_v42  ;;  %v3648_v48 = vcombine.high %v3626_v37, %v3626_v37 }
 0x2ba   : > { %v3649_v56 = vcombine.high %v3633_v20, %v3633_v20  ;;  %v5903_v0 = vmax.f32 %v3602_v4, %v3626_v37  ;;  %v3666_v12 = vrot.slane %v3652_v36, %v11288_v42  ;;  %v3667_v53 = vcombine.high %v3659_v50, %v3659_v50  ;;  %v12474_v37 = vpop.f32.mrb[142].mxu0 }
 0x2bb   : > { %v3675_v29 = vrot.slane %v3659_v50, %v11288_v42  ;;  %v3650_v21 = vcombine.high %v3640_v33, %v3640_v33  ;;  %v3651_v35 = vcombine.high %v3647_v3, %v3647_v3  ;;  %v3715_v27 = vrot.slane %v3701_v30, %v11288_v42 }
 0x2bc   : > { %v5905_v38 = vmax.f32 %v3647_v3, %v3649_v56  ;;  %v6119_v34 = vmax.f32 %v5903_v0, %v3640_v33  ;;  %v3668_v32 = vcombine.high %v3666_v12, %v3666_v12  ;;  %v3682_v28 = vrot.slane %v3666_v12, %v11288_v42  ;;  %v10148_v3 = vpop.f32.mrb[143].mxu0 }
 0x2bd   : > { %v3689_v18 = vrot.slane %v3667_v53, %v11288_v42  ;;  %v5904_v55 = vmax.f32 %v3648_v48, %v3650_v21  ;;  %v3697_v54 = vcombine.high %v3675_v29, %v3675_v29  ;;  %v3716_v4 = vcombine.high %v3708_v62, %v3708_v62 }
 0x2be   : > { %v6121_v6 = vmax.f32 %v5905_v38, %v3651_v35  ;;  %v6245_v36 = vmax.f32 %v6113_v8, %v6119_v34  ;;  %v3696_v50 = vrot.slane %v3668_v32, %v11288_v42  ;;  %v3698_v22 = vcombine.high %v3682_v28, %v3682_v28 }
 0x2bf   : > { %v3699_v17 = vcombine.high %v3689_v18, %v3689_v18  ;;  %v6120_v56 = vmax.f32 %v5904_v55, %v3633_v20  ;;  %v5906_v30 = vmax.f32 %v3675_v29, %v3689_v18  ;;  %v3717_v33 = vcombine.high %v3715_v27, %v3715_v27 }
 0x2c0   : > { %v3724_v0 = vrot.slane %v3708_v62, %v11288_v42  ;;  %v3700_v2 = vcombine.high %v3696_v50, %v3696_v50  ;;  %v3731_v48 = vrot.slane %v3715_v27, %v11288_v42  ;;  %v3738_v53 = vrot.slane %v3716_v4, %v11288_v42 }
 0x2c1   : > { %v5907_v12 = vmax.f32 %v3699_v17, %v3682_v28  ;;  %v12481_v21 = vmax.f32 %v12443_v10, %v6120_v56  ;;  %v6122_v8 = vmax.f32 %v5906_v30, %v3697_v54  ;;  %v3745_v32 = vrot.slane %v3717_v33, %v11288_v42  ;;  %v12487_v28 = vpop.f32.mrb[144].mxu0 }
 0x2c2   : > { %v3746_v35 = vcombine.high %v3724_v0, %v3724_v0  ;;  %v3747_v34 = vcombine.high %v3731_v48, %v3731_v48  ;;  %v3748_v55 = vcombine.high %v3738_v53, %v3738_v53  ;;  %v5908_v20 = vmax.f32 %v3698_v22, %v3700_v2  ;;  %v10151_v3 = vpop.f32.mrb[145].mxu0 }
 0x2c3   : > { %v6123_v38 = vmax.f32 %v5907_v12, %v3696_v50  ;;  %v6248_v29 = vmax.f32 %v6116_v16, %v6122_v8  ;;  %v5910_v62 = vmax.f32 %v3731_v48, %v3745_v32  ;;  %v14284_v17 = vmax.f32 %v12398_v39, %v12371_v25  ;;  %v12496_v30 = vpop.f32.mrb[146].mxu0 }
 0x2c4   : > { %v5909_v18 = vmax.f32 %v3738_v53, %v3746_v35  ;;  %v6124_v10 = vmax.f32 %v5908_v20, %v3724_v0  ;;  %v958_v54 = vadd.f32 %v12186_v58, %v12094_v52  ;;  %v14285_v22 = vmax.f32 %v12441_v41, %v12432_v63 }
 0x2c5   : > { %v6244_v27 = vmax.f32 %v14284_v17, %v6118_v59  ;;  %v6249_v4 = vmax.f32 %v6117_v13, %v6123_v38  ;;  %v6126_v50 = vmax.f32 %v5910_v62, %v3747_v34  ;;  %v963_v16 = vadd.f32 %v12186_v58, %v12165_v44  ;;  %v10152_v59 = vpop.f32.mrb[147].mxu0 }
 0x2c6   : > { %v6125_v56 = vmax.f32 %v5909_v18, %v3748_v55  ;;  %v6247_v2 = vmax.f32 %v14285_v22, %v6121_v6  ;;  %v3750_v39 = vcombine.high %v958_v54, %v958_v54  ;;  %v3757_v13 = vrot.slane %v958_v54, %v11288_v42  ;;  %v12512_v34 = vpop.f32.mrb[148].mxu0 }
 0x2c7   : > { %v6316_v25 = vmax.f32 %v6244_v27, %v6124_v10  ;;  %v6318_v52 = vmax.f32 %v12481_v21, %v6126_v50  ;;  %v3799_v0 = vcombine.high %v963_v16, %v963_v16  ;;  %v3749_v44 = vcombine.high %v3745_v32, %v3745_v32  ;;  %v10155_v32 = vpop.f32.mrb[149].mxu0 }
 0x2c8   : > { %v6317_v33 = vmax.f32 %v6245_v36, %v6125_v56  ;;  %v3764_v12 = vrot.slane %v3750_v39, %v11288_v42  ;;  %v3765_v48 = vcombine.high %v3757_v13, %v3757_v13  ;;  %v3773_v63 = vrot.slane %v3757_v13, %v11288_v42  ;;  %v12520_v56 = vpop.f32.mrb[150].mxu0 }
 0x2c9   : > { %v12502_v6 = vmax.f32 %v6316_v25, 0.0  ;;  %v3806_v53 = vrot.slane %v963_v16, %v11288_v42  ;;  %v3813_v38 = vrot.slane %v3799_v0, %v11288_v42  ;;  %v14288_v17 = vcombine.low %v12392_v43, %v12408_v57  ;;  %v10156_v25 = vpop.f32.mrb[151].mxu0 }
 0x2ca   : > { %v12504_v41 = vmax.f32 %v6317_v33, 0.0  ;;  %v3766_v8 = vcombine.high %v3764_v12, %v3764_v12  ;;  %v3780_v35 = vrot.slane %v3764_v12, %v11288_v42  ;;  %v3787_v36 = vrot.slane %v3765_v48, %v11288_v42 }
 0x2cb   : > { %14286 = vst [vmem:[#allocation56_spill] sm:$0xff] %v12502_v6  ;;  %v3795_v20 = vcombine.high %v3773_v63, %v3773_v63  ;;  %v6745_v27 = vrot.slane %v14288_v17, %v11288_v42  ;;  %v5911_v54 = vmax.f32 %v3749_v44, %v3773_v63  ;;  %v3814_v3 = vcombine.high %v3806_v53, %v3806_v53 }
 0x2cc   : > { %14287 = vst [vmem:[#allocation57_spill] sm:$0xff] %v12504_v41  ;;  %v6736_v21 = vcombine.low %v12502_v6, %v12504_v41  ;;  %v3794_v55 = vrot.slane %v3766_v8, %v11288_v42  ;;  %v3796_v18 = vcombine.high %v3780_v35, %v3780_v35  ;;  %v3797_v62 = vcombine.high %v3787_v36, %v3787_v36 }
 0x2cd   : > { %v6127_v13 = vmax.f32 %v5911_v54, %v3787_v36  ;;  %v966_v59 = vadd.f32 %v12186_v58, %v12172_v45  ;;  %v3815_v12 = vcombine.high %v3813_v38, %v3813_v38  ;;  %v3822_v48 = vrot.slane %v3806_v53, %v11288_v42 }
 0x2ce   : > { %v6752_v10 = vrot.slane %v6736_v21, %v11288_v42  ;;  %v3798_v50 = vcombine.high %v3794_v55, %v3794_v55  ;;  %v5912_v22 = vmax.f32 %v3795_v20, %v3797_v62  ;;  %v5913_v16 = vmax.f32 %v3794_v55, %v3796_v18 }
 0x2cf   : > { %v6319_v8 = vmax.f32 %v6247_v2, %v6127_v13  ;;  %v3829_v63 = vrot.slane %v3813_v38, %v11288_v42  ;;  %v3836_v44 = vrot.slane %v3814_v3, %v11288_v42  ;;  %v12527_v21 = vmax.f32 %v6318_v52, 0.0 }
 0x2d0   : > { %v6767_v39 = vcombine.low %v6745_v27, %v6752_v10  ;;  %v6128_v33 = vmax.f32 %v5912_v22, %v3780_v35  ;;  %v6129_v0 = vmax.f32 %v5913_v16, %v3798_v50  ;;  %v12530_v18 = vrot.slane %v3815_v12, %v11288_v42  ;;  %v8734_v12 = vld [vmem:[#allocation8 + $0x250] sm:$0xff] }
 0x2d1   : > { %14289 = vst [vmem:[#allocation58_spill] sm:$0xff] %v12527_v21  ;;  %v12532_v36 = vmax.f32 %v6319_v8, 0.0  ;;  %v3844_v45 = vcombine.high %v3822_v48, %v3822_v48  ;;  %v3846_v35 = vcombine.high %v3836_v44, %v3836_v44  ;;  %v5914_v62 = vmax.f32 %v3822_v48, %v3836_v44 }
 0x2d2   : > { %v6320_v20 = vmax.f32 %v6248_v29, %v6128_v33  ;;  %v6321_v55 = vmax.f32 %v6249_v4, %v6129_v0  ;;  %v3847_v2 = vcombine.high %v12530_v18, %v12530_v18  ;;  %v3848_v38 = vcombine.high %v966_v59, %v966_v59 }
 0x2d3   : > { %14290 = vst [vmem:[#allocation59_spill] sm:$0xff] %v12532_v36  ;;  %v6775_v52 = vrot.slane %v6767_v39, %v11288_v42  ;;  %v6737_v29 = vcombine.low %v12527_v21, %v12532_v36  ;;  %v3845_v4 = vcombine.high %v3829_v63, %v3829_v63  ;;  %v12543_v17 = vmax.f32 %v3846_v35, %v3829_v63 }
 0x2d4   : > { %v12534_v32 = vmax.f32 %v6320_v20, 0.0  ;;  %v12536_v53 = vmax.f32 %v6321_v55, 0.0  ;;  %v12547_v10 = vmax.f32 %v5914_v62, %v3844_v45  ;;  %v3855_v54 = vrot.slane %v966_v59, %v11288_v42  ;;  %v12573_v20 = vpop.f32.mrb[152].mxu0 }
 0x2d5   : > { %v3862_v3 = vrot.slane %v3848_v38, %v11288_v42  ;;  %v6759_v50 = vrot.slane %v6737_v29, %v11288_v42  ;;  %v12554_v16 = vmax.f32 %v3845_v4, %v3847_v2  ;;  %v7492_v25 = vrot.slane %v12256_v14, 7  ;;  %v8735_v2 = vld [vmem:[#allocation8 + $0x258] sm:$0xff]  ;;  %v10159_v38 = vpop.f32.mrb[153].mxu0 }
 0x2d6   : > { %14291 = vst [vmem:[#allocation60_spill] sm:$0xff] %v12534_v32  ;;  %14292 = vst [vmem:[#allocation61_spill] sm:$0xff] %v12536_v53  ;;  %v6738_v27 = vcombine.low %v12534_v32, %v12536_v53  ;;  %v3863_v13 = vcombine.high %v3855_v54, %v3855_v54  ;;  %v12559_v0 = vrot.slane %v3855_v54, %v11288_v42  ;;  %v14175_v48 = vrot.slane %v12426_v7, 7 }
 0x2d7   : > { %v3864_v33 = vcombine.high %v3862_v3, %v3862_v3  ;;  %v12562_v59 = vrot.slane %v3862_v3, %v11288_v42  ;;  %v14293_v8 = vrot.slane %v12002_v51, 7  ;;  %v971_v44 = vadd.f32 %v12186_v58, %v12180_v60 }
 0x2d8   : > { %v6766_v39 = vrot.slane %v6738_v27, %v11288_v42  ;;  %v3885_v45 = vrot.slane %v3863_v13, %v11288_v42  ;;  %v3893_v62 = vcombine.high %v12559_v0, %v12559_v0  ;;  %v12589_v60 = vsel %vm7498_vm5, %v7492_v25, %v14175_v48  ;;  %v12592_v27 = vpop.f32.mrb[154].mxu0 }
 0x2d9   : > { %v12569_v63 = vsel %vm7498_vm5, %v14293_v8, %v7492_v25  ;;  %v12577_v35 = vrot.slane %v3864_v33, %v11288_v42  ;;  %14295 = vst [vmem:[#allocation63_spill] sm:$0xff] %v12589_v60  ;;  %v10160_v13 = vpop.f32.mrb[155].mxu0  ;;  %v8744_v33 = vmul.f32 %v8735_v2, %v12589_v60  ;;  %v3897_v38 = vcombine.high %v971_v44, %v971_v44 }
 0x2da   : > { %14294 = vst [vmem:[#allocation62_spill] sm:$0xff] %v12569_v63  ;;  %v6768_v55 = vcombine.low %v6759_v50, %v6766_v39  ;;  %v8743_v58 = vmul.f32 %v8734_v12, %v12569_v63  ;;  %v3895_v3 = vcombine.high %v3885_v45, %v3885_v45  ;;  %v5917_v50 = vmax.f32 %v3885_v45, %v3893_v62 }
 0x2db   : > { %v3896_v8 = vcombine.high %v12577_v35, %v12577_v35  ;;  %v3904_v25 = vrot.slane %v971_v44, %v11288_v42  ;;  %v3911_v13 = vrot.slane %v3897_v38, %v11288_v42 }
 0x2dc   : > { %v6782_v54 = vrot.slane %v6768_v55, %v11288_v42  ;;  %v6133_v12 = vmax.f32 %v5917_v50, %v3895_v3  ;;  %v12606_v55 = vld [vmem:[%s14127_s2] ss:$0 sm:$0xff]  ;;  %v8751_v2 = vpack.c.bf16 %v8744_v33, %v8743_v58 }
 0x2dd   : > { %v974_v45 = vadd.f32 %v12606_v55, %v12202_v1  ;;  %v979_v62 = vadd.f32 %v12606_v55, %v12213_v26  ;;  %v3912_v22 = vcombine.high %v3904_v25, %v3904_v25  ;;  %v3920_v44 = vrot.slane %v3904_v25, %v11288_v42 }
 0x2de   : > { %v12601_v48 = vcombine.low %v6775_v52, %v6782_v54  ;;  %10478 = vmatmul.mubr.bf16.gmra.mrb[168].mxu0 %v8751_v2  ;;  %v3913_v39 = vcombine.high %v3911_v13, %v3911_v13  ;;  %v3927_v29 = vrot.slane %v3911_v13, %v11288_v42 }
 0x2df   : > { %v3946_v52 = vcombine.high %v974_v45, %v974_v45  ;;  %v3953_v54 = vrot.slane %v974_v45, %v11288_v42  ;;  %v3995_v3 = vcombine.high %v979_v62, %v979_v62  ;;  %v4002_v50 = vrot.slane %v979_v62, %v11288_v42 }
 0x2e0   : > { %v12618_v1 = vrot.slane %v3912_v22, %v11288_v42  ;;  %v3942_v26 = vcombine.high %v3920_v44, %v3920_v44  ;;  %v12620_v58 = vmax.f32 %v3896_v8, %v3920_v44  ;;  %v3941_v45 = vrot.slane %v3913_v39, %v11288_v42 }
 0x2e1   : > { %v3960_v33 = vrot.slane %v3946_v52, %v11288_v42  ;;  %v3961_v38 = vcombine.high %v3953_v54, %v3953_v54  ;;  %v3969_v25 = vrot.slane %v3953_v54, %v11288_v42  ;;  %v3943_v4 = vcombine.high %v3927_v29, %v3927_v29  ;;  %v12632_v52 = vpop.f32.mrb[156].mxu0 }
 0x2e2   : > { %v3944_v62 = vcombine.high %v12618_v1, %v12618_v1  ;;  %v4009_v2 = vrot.slane %v3995_v3, %v11288_v42  ;;  %v6135_v22 = vmax.f32 %v12620_v58, %v12618_v1  ;;  %v3945_v60 = vcombine.high %v3941_v45, %v3941_v45  ;;  %v10163_v53 = vpop.f32.mrb[157].mxu0 }
 0x2e3   : > { %v3962_v13 = vcombine.high %v3960_v33, %v3960_v33  ;;  %v3976_v8 = vrot.slane %v3960_v33, %v11288_v42  ;;  %v3983_v44 = vrot.slane %v3961_v38, %v11288_v42  ;;  %v5921_v63 = vmax.f32 %v3941_v45, %v3943_v4  ;;  %v12635_v41 = vpop.f32.mrb[158].mxu0 }
 0x2e4   : > { %v5920_v54 = vmax.f32 %v3942_v26, %v3944_v62  ;;  %v3991_v39 = vcombine.high %v3969_v25, %v3969_v25  ;;  %v4010_v6 = vcombine.high %v4002_v50, %v4002_v50  ;;  %v4011_v33 = vcombine.high %v4009_v2, %v4009_v2  ;;  %v10164_v57 = vpop.f32.mrb[159].mxu0 }
 0x2e5   : > { %v3990_v32 = vrot.slane %v3962_v13, %v11288_v42  ;;  %v3992_v36 = vcombine.high %v3976_v8, %v3976_v8  ;;  %v3993_v21 = vcombine.high %v3983_v44, %v3983_v44  ;;  %v5922_v3 = vmax.f32 %v3969_v25, %v3983_v44 }
 0x2e6   : > { %v6136_v1 = vmax.f32 %v5920_v54, %v3927_v29  ;;  %v6137_v58 = vmax.f32 %v5921_v63, %v3945_v60  ;;  %v4018_v26 = vrot.slane %v4002_v50, %v11288_v42  ;;  %v4025_v53 = vrot.slane %v4009_v2, %v11288_v42  ;;  %v12664_v54 = vpop.f32.mrb[160].mxu0 }
 0x2e7   : > { %v5923_v38 = vmax.f32 %v3993_v21, %v3976_v8  ;;  %v6138_v43 = vmax.f32 %v5922_v3, %v3991_v39  ;;  %v3994_v31 = vcombine.high %v3990_v32, %v3990_v32  ;;  %v4032_v45 = vrot.slane %v4010_v6, %v11288_v42  ;;  %v10167_v3 = vpop.f32.mrb[161].mxu0 }
 0x2e8   : > { %v12639_v4 = vmax.f32 %v12547_v10, %v6136_v1  ;;  %v4039_v25 = vrot.slane %v4011_v33, %v11288_v42  ;;  %v14296_v63 = vmax.f32 %v12554_v16, %v12559_v0  ;;  %v4040_v57 = vcombine.high %v4018_v26, %v4018_v26 }
 0x2e9   : > { %v6139_v62 = vmax.f32 %v5923_v38, %v3990_v32  ;;  %v5924_v21 = vmax.f32 %v3992_v36, %v3994_v31  ;;  %v4041_v60 = vcombine.high %v4025_v53, %v4025_v53  ;;  %v4042_v13 = vcombine.high %v4032_v45, %v4032_v45 }
 0x2ea   : > { %v12647_v29 = vmax.f32 %v14296_v63, %v6138_v43  ;;  %v5926_v50 = vmax.f32 %v4025_v53, %v4039_v25  ;;  %v14297_v10 = vcombine.high %v12562_v59, %v12562_v59  ;;  %v14298_v2 = vmax.f32 %v12562_v59, %v12577_v35 }
 0x2eb   : > { %v12655_v8 = vmax.f32 %v6133_v12, %v6139_v62  ;;  %v5925_v32 = vmax.f32 %v4032_v45, %v4040_v57  ;;  %v6140_v44 = vmax.f32 %v5924_v21, %v4018_v26  ;;  %v982_v43 = vadd.f32 %v12606_v55, %v12235_v46 }
 0x2ec   : > { %v6134_v6 = vmax.f32 %v14298_v2, %v14297_v10  ;;  %v6142_v16 = vmax.f32 %v5926_v50, %v4041_v60  ;;  %v14299_v31 = vmax.f32 %v12543_v17, %v12530_v18  ;;  %v987_v0 = vadd.f32 %v12606_v55, %v12289_v5  ;;  %v1069_v18 = vpop.f32.mrb[162].mxu0  ;;  %v10652_v50 = vld [vmem:[#allocation7 + $0x40] sm:$0xff]  }
 0x2ed   : > { %v6141_v39 = vmax.f32 %v5925_v32, %v4042_v13  ;;  %v4044_v35 = vcombine.high %v982_v43, %v982_v43  ;;  %v4051_v12 = vrot.slane %v982_v43, %v11288_v42  ;;  %v4043_v46 = vcombine.high %v4039_v25, %v4039_v25  ;;  %v10168_v53 = vpop.f32.mrb[163].mxu0  ;;  %10170 = vmatpush3.bf16.msra.mxu1 %v10652_v50 }
 0x2ee   : > { %v6251_v36 = vmax.f32 %v14299_v31, %v6137_v58  ;;  %v12666_v59 = vmax.f32 %v6134_v6, %v6140_v44  ;;  %v6322_v1 = vmax.f32 %v12639_v4, %v6142_v16  ;;  %v4093_v33 = vcombine.high %v987_v0, %v987_v0  ;;  %10171 = vmatprep.subr.bf16.mxu1 %v14263_v11 }
 0x2ef   : > { %v4100_v38 = vrot.slane %v987_v0, %v11288_v42  ;;  %v6255_v17 = vmax.f32 %v6135_v22, %v6141_v39  ;;  %v4058_v58 = vrot.slane %v4044_v35, %v11288_v42  ;;  %v4059_v5 = vcombine.high %v4051_v12, %v4051_v12 }
 0x2f0   : > { %v4067_v26 = vrot.slane %v4051_v12, %v11288_v42  ;;  %v4107_v45 = vrot.slane %v4093_v33, %v11288_v42  ;;  %v990_v25 = vadd.f32 %v12606_v55, %v12300_v47 }
 0x2f1   : > { %v4108_v62 = vcombine.high %v4100_v38, %v4100_v38  ;;  %v4060_v63 = vcombine.high %v4058_v58, %v4058_v58  ;;  %v4074_v57 = vrot.slane %v4058_v58, %v11288_v42  ;;  %v4081_v4 = vrot.slane %v4059_v5, %v11288_v42 }
 0x2f2   : > { %v4089_v21 = vcombine.high %v4067_v26, %v4067_v26  ;;  %v5927_v60 = vmax.f32 %v4043_v46, %v4067_v26  ;;  %v4109_v22 = vcombine.high %v4107_v45, %v4107_v45  ;;  %v4116_v13 = vrot.slane %v4100_v38, %v11288_v42  ;;  %v10653_v46 = vld [vmem:[#allocation7 + $0x48] sm:$0xff]  }
 0x2f3   : > { %v4088_v10 = vrot.slane %v4060_v63, %v11288_v42  ;;  %v4090_v2 = vcombine.high %v4074_v57, %v4074_v57  ;;  %v4091_v6 = vcombine.high %v4081_v4, %v4081_v4  ;;  %v4130_v32 = vrot.slane %v4108_v62, %v11288_v42  ;;  %10172 = vmatpush3.bf16.msra.mxu1 %v10653_v46  ;;  %v10656_v46 = vld [vmem:[#allocation7 + $0x60] sm:$0xff]  }
 0x2f4   : > { %v6143_v44 = vmax.f32 %v5927_v60, %v4081_v4  ;;  %v4123_v43 = vrot.slane %v4107_v45, %v11288_v42  ;;  %v4137_v47 = vrot.slane %v4109_v22, %v11288_v42  ;;  %v4138_v35 = vcombine.high %v4116_v13, %v4116_v13  ;;  %10173 = vmatprep.subr.bf16.mxu1 %v14263_v11  ;;  %v10654_v60 = vld [vmem:[#allocation7 + $0x50] sm:$0xff]  }
 0x2f5   : > { %v4092_v16 = vcombine.high %v4088_v10, %v4088_v10  ;;  %v5928_v31 = vmax.f32 %v4089_v21, %v4091_v6  ;;  %v5929_v0 = vmax.f32 %v4088_v10, %v4090_v2  ;;  %v4140_v12 = vcombine.high %v4130_v32, %v4130_v32 }
 0x2f6   : > { %v6323_v39 = vmax.f32 %v6251_v36, %v6143_v44  ;;  %v5930_v3 = vmax.f32 %v4116_v13, %v4130_v32  ;;  %v4142_v18 = vcombine.high %v990_v25, %v990_v25  ;;  %v4149_v58 = vrot.slane %v990_v25, %v11288_v42  ;;  %v10655_v44 = vld [vmem:[#allocation7 + $0x58] sm:$0xff]  }
 0x2f7   : > { %v6144_v33 = vmax.f32 %v5928_v31, %v4074_v57  ;;  %v6145_v38 = vmax.f32 %v5929_v0, %v4092_v16  ;;  %v12685_v5 = vmax.f32 %v6322_v1, 0.0  ;;  %v5931_v53 = vmax.f32 %v4140_v12, %v4123_v43  ;;  %10174 = vmatpush3.bf16.msra.mxu1 %v10654_v60 }
 0x2f8   : > { %v12687_v26 = vmax.f32 %v6323_v39, 0.0  ;;  %v6146_v45 = vmax.f32 %v5930_v3, %v4138_v35  ;;  %v4141_v63 = vcombine.high %v4137_v47, %v4137_v47  ;;  %v4156_v4 = vrot.slane %v4142_v18, %v11288_v42  ;;  %10175 = vmatprep.subr.bf16.mxu1 %v14263_v11 }
 0x2f9   : > { %14300 = vst [vmem:[#allocation64_spill] sm:$0xff] %v12685_v5  ;;  %v6324_v62 = vmax.f32 %v12647_v29, %v6144_v33  ;;  %v6325_v36 = vmax.f32 %v12655_v8, %v6145_v38  ;;  %v6147_v25 = vmax.f32 %v5931_v53, %v4137_v47  ;;  %v4157_v21 = vcombine.high %v4149_v58, %v4149_v58 }
 0x2fa   : > { %v6784_v57 = vcombine.low %v12685_v5, %v12687_v26  ;;  %v6326_v1 = vmax.f32 %v12666_v59, %v6146_v45  ;;  %v4158_v29 = vcombine.high %v4156_v4, %v4156_v4  ;;  %v4139_v50 = vcombine.high %v4123_v43, %v4123_v43 }
 0x2fb   : > { %v12696_v22 = vmax.f32 %v6324_v62, 0.0  ;;  %v12698_v13 = vmax.f32 %v6325_v36, 0.0  ;;  %v6327_v8 = vmax.f32 %v6255_v17, %v6147_v25  ;;  %v12701_v10 = vrot.slane %v4149_v58, %v11288_v42  ;;  %10176 = vmatpush3.bf16.msra.mxu1 %v10655_v44  ;;  %v14303_v36 = vld [vmem:[#allocation47_spill] sm:$0xff] }
 0x2fc   : > { %v12706_v6 = vrot.slane %v6784_v57, %v11288_v42  ;;  %v4179_v59 = vrot.slane %v4157_v21, %v11288_v42  ;;  %v12710_v32 = vmax.f32 %v4139_v50, %v4141_v63  ;;  %v4172_v16 = vrot.slane %v4156_v4, %v11288_v42  ;;  %10177 = vmatprep.subr.bf16.mxu1 %v14263_v11  ;;  %v10657_v50 = vld [vmem:[#allocation7 + $0x68] sm:$0xff]  }
 0x2fd   : > { %14301 = vst [vmem:[#allocation65_spill] sm:$0xff] %v12698_v13  ;;  %v6785_v2 = vcombine.low %v12696_v22, %v12698_v13  ;;  %v12715_v17 = vmax.f32 %v6327_v8, 0.0  ;;  %v4186_v31 = vrot.slane %v4158_v29, %v11288_v42  ;;  %v4187_v0 = vcombine.high %v12701_v10, %v12701_v10 }
 0x2fe   : > { %v12723_v39 = vmax.f32 %v6326_v1, 0.0  ;;  %v4189_v35 = vcombine.high %v4179_v59, %v4179_v59  ;;  %v4188_v38 = vcombine.high %v4172_v16, %v4172_v16  ;;  %v995_v58 = vadd.f32 %v12606_v55, %v12308_v9  ;;  %v14304_v1 = vld [vmem:[#allocation48_spill] sm:$0xff] }
 0x2ff   : > { %v12713_v43 = vrot.slane %v6785_v2, %v11288_v42  ;;  %14302 = vst [vmem:[#allocation66_spill] sm:$0xff] %v12715_v17  ;;  %v5933_v12 = vmax.f32 %v4179_v59, %v4187_v0  ;;  %v5934_v3 = vmax.f32 %v4172_v16, %v4186_v31  ;;  %v4190_v45 = vcombine.high %v4186_v31, %v4186_v31 }
 0x300   : > { %v998_v62 = vadd.f32 %v12606_v55, %v12331_v49  ;;  %v1003_v63 = vadd.f32 %v12606_v55, %v14303_v36  ;;  %10178 = vmatpush3.bf16.msra.mxu1 %v10656_v46  ;;  %v4191_v4 = vcombine.high %v995_v58, %v995_v58  ;;  %v4198_v57 = vrot.slane %v995_v58, %v11288_v42 }
 0x301   : > { %v12732_v53 = vmax.f32 %v5933_v12, %v4189_v35  ;;  %v12739_v25 = vmax.f32 %v5934_v3, %v4188_v38  ;;  %v12743_v21 = vadd.f32 %v12606_v55, %v14304_v1  ;;  %10179 = vmatprep.subr.bf16.mxu1 %v14263_v11  ;;  %v12749_v49 = vadd.f32 %v12606_v55, %v12403_v23  ;;  %v10658_v12 = vld [vmem:[#allocation7 + $0x70] sm:$0xff]  }
 0x302   : > { %v4240_v9 = vcombine.high %v998_v62, %v998_v62  ;;  %v4247_v60 = vrot.slane %v998_v62, %v11288_v42  ;;  %v4289_v29 = vcombine.high %v1003_v63, %v1003_v63  ;;  %v4205_v8 = vrot.slane %v4191_v4, %v11288_v42 }
 0x303   : > { %v4206_v2 = vcombine.high %v4198_v57, %v4198_v57  ;;  %v4214_v59 = vrot.slane %v4198_v57, %v11288_v42  ;;  %v4296_v44 = vrot.slane %v1003_v63, %v11288_v42  ;;  %v4338_v35 = vcombine.high %v12743_v21, %v12743_v21 }
 0x304   : > { %v4254_v16 = vrot.slane %v4240_v9, %v11288_v42  ;;  %v4255_v31 = vcombine.high %v4247_v60, %v4247_v60  ;;  %v4263_v0 = vrot.slane %v4247_v60, %v11288_v42  ;;  %10180 = vmatpush3.bf16.msra.mxu1 %v10657_v50  ;;  %v4207_v23 = vcombine.high %v4205_v8, %v4205_v8 }
 0x305   : > { %v12759_v3 = vrot.slane %v4205_v8, %v11288_v42  ;;  %v4228_v46 = vrot.slane %v4206_v2, %v11288_v42  ;;  %v4303_v38 = vrot.slane %v4289_v29, %v11288_v42  ;;  %10181 = vmatprep.subr.bf16.mxu1 %v14263_v11  ;;  %v5935_v58 = vmax.f32 %v4190_v45, %v4214_v59  ;;  %v10659_v2 = vld [vmem:[#allocation7 + $0x78] sm:$0xff]  }
 0x306   : > { %v4256_v62 = vcombine.high %v4254_v16, %v4254_v16  ;;  %v4270_v36 = vrot.slane %v4254_v16, %v11288_v42  ;;  %v4277_v63 = vrot.slane %v4255_v31, %v11288_v42  ;;  %v4235_v4 = vrot.slane %v4207_v23, %v11288_v42 }
 0x307   : > { %v4236_v57 = vcombine.high %v4214_v59, %v4214_v59  ;;  %v4237_v1 = vcombine.high %v12759_v3, %v12759_v3  ;;  %v4238_v9 = vcombine.high %v4228_v46, %v4228_v46  ;;  %v6151_v60 = vmax.f32 %v5935_v58, %v4228_v46 }
 0x308   : > { %v4284_v50 = vrot.slane %v4256_v62, %v11288_v42  ;;  %v4285_v8 = vcombine.high %v4263_v0, %v4263_v0  ;;  %v4287_v29 = vcombine.high %v4277_v63, %v4277_v63  ;;  %10182 = vmatpush3.bf16.msra.mxu1 %v10658_v12  ;;  %v4239_v45 = vcombine.high %v4235_v4, %v4235_v4 }
 0x309   : > { %v12770_v47 = vmax.f32 %v4236_v57, %v4238_v9  ;;  %v4286_v16 = vcombine.high %v4270_v36, %v4270_v36  ;;  %v5938_v33 = vmax.f32 %v4263_v0, %v4277_v63  ;;  %10183 = vmatprep.subr.bf16.mxu1 %v14263_v11  ;;  %v4304_v23 = vcombine.high %v4296_v44, %v4296_v44 }
 0x30a   : > { %v5939_v31 = vmax.f32 %v4287_v29, %v4270_v36  ;;  %v4288_v59 = vcombine.high %v4284_v50, %v4284_v50  ;;  %v4305_v18 = vcombine.high %v4303_v38, %v4303_v38  ;;  %v5937_v5 = vmax.f32 %v4235_v4, %v4237_v1 }
 0x30b   : > { %v6154_v13 = vmax.f32 %v5938_v33, %v4285_v8  ;;  %v4312_v46 = vrot.slane %v4296_v44, %v11288_v42  ;;  %v4319_v58 = vrot.slane %v4303_v38, %v11288_v42  ;;  %v4326_v12 = vrot.slane %v4304_v23, %v11288_v42 }
 0x30c   : > { %v6155_v62 = vmax.f32 %v5939_v31, %v4284_v50  ;;  %v4333_v57 = vrot.slane %v4305_v18, %v11288_v42  ;;  %v5940_v9 = vmax.f32 %v4286_v16, %v4288_v59  ;;  %10184 = vmatpush3.bf16.msra.mxu1 %v10659_v2  ;;  %v6152_v0 = vmax.f32 %v12770_v47, %v12759_v3 }
 0x30d   : > { %v14305_v36 = vmax.f32 %v12710_v32, %v12701_v10  ;;  %v4334_v4 = vcombine.high %v4312_v46, %v4312_v46  ;;  %v4345_v33 = vrot.slane %v12743_v21, %v11288_v42  ;;  %10205 = vmatprep.subr.bf16.mxu1 %v14263_v11  ;;  %v4335_v38 = vcombine.high %v4319_v58, %v4319_v58 }
 0x30e   : > { %v6257_v44 = vmax.f32 %v12732_v53, %v6155_v62  ;;  %v4336_v1 = vcombine.high %v4326_v12, %v4326_v12  ;;  %v6156_v18 = vmax.f32 %v5940_v9, %v4312_v46  ;;  %v4337_v8 = vcombine.high %v4333_v57, %v4333_v57 }
 0x30f   : > { %v6256_v63 = vmax.f32 %v14305_v36, %v6154_v13  ;;  %v5941_v50 = vmax.f32 %v4326_v12, %v4334_v4  ;;  %v4352_v29 = vrot.slane %v4338_v35, %v11288_v42  ;;  %v4353_v47 = vcombine.high %v4345_v33, %v4345_v33 }
 0x310   : > { %v5942_v3 = vmax.f32 %v4319_v58, %v4333_v57  ;;  %v6258_v10 = vmax.f32 %v12739_v25, %v6156_v18  ;;  %v4361_v13 = vrot.slane %v4345_v33, %v11288_v42  ;;  %v6153_v32 = vmax.f32 %v5937_v5, %v4239_v45 }
 0x311   : > { %v6157_v2 = vmax.f32 %v5941_v50, %v4336_v1  ;;  %v4354_v21 = vcombine.high %v4352_v29, %v4352_v29  ;;  %v4368_v16 = vrot.slane %v4352_v29, %v11288_v42  ;;  %v4375_v53 = vrot.slane %v4353_v47, %v11288_v42 }
 0x312   : > { %v4383_v31 = vcombine.high %v4361_v13, %v4361_v13  ;;  %v5943_v59 = vmax.f32 %v4337_v8, %v4361_v13  ;;  %v4387_v23 = vcombine.high %v12749_v49, %v12749_v49  ;;  %v4394_v35 = vrot.slane %v12749_v49, %v11288_v42 }
 0x313   : > { %v6259_v46 = vmax.f32 %v6151_v60, %v6157_v2  ;;  %v4382_v25 = vrot.slane %v4354_v21, %v11288_v42  ;;  %v4384_v58 = vcombine.high %v4368_v16, %v4368_v16  ;;  %v4385_v62 = vcombine.high %v4375_v53, %v4375_v53 }
 0x314   : > { %v6159_v5 = vmax.f32 %v5943_v59, %v4375_v53  ;;  %v4401_v45 = vrot.slane %v4387_v23, %v11288_v42  ;;  %v4402_v12 = vcombine.high %v4394_v35, %v4394_v35  ;;  %v4410_v57 = vrot.slane %v4394_v35, %v11288_v42 }
 0x315   : > { %v4386_v9 = vcombine.high %v4382_v25, %v4382_v25  ;;  %v5944_v36 = vmax.f32 %v4383_v31, %v4385_v62  ;;  %v5945_v4 = vmax.f32 %v4382_v25, %v4384_v58  ;;  %v1014_v33 = vadd.f32 %v12606_v55, %v12418_v15 }
 0x316   : > { %v6158_v1 = vmax.f32 %v5942_v3, %v4335_v38  ;;  %v6261_v18 = vmax.f32 %v6153_v32, %v6159_v5  ;;  %v4403_v49 = vcombine.high %v4401_v45, %v4401_v45  ;;  %v4424_v60 = vrot.slane %v4402_v12, %v11288_v42 }
 0x317   : > { %v6160_v50 = vmax.f32 %v5944_v36, %v4368_v16  ;;  %v6161_v8 = vmax.f32 %v5945_v4, %v4386_v9  ;;  %v4417_v29 = vrot.slane %v4401_v45, %v11288_v42  ;;  %v4436_v47 = vcombine.high %v1014_v33, %v1014_v33 }
 0x318   : > { %v4431_v13 = vrot.slane %v4403_v49, %v11288_v42  ;;  %v4432_v2 = vcombine.high %v4410_v57, %v4410_v57  ;;  %v4434_v21 = vcombine.high %v4424_v60, %v4424_v60  ;;  %v5946_v53 = vmax.f32 %v4410_v57, %v4424_v60 }
 0x319   : > { %v6328_v31 = vmax.f32 %v6256_v63, %v6160_v50  ;;  %v6329_v59 = vmax.f32 %v6257_v44, %v6161_v8  ;;  %v4443_v23 = vrot.slane %v1014_v33, %v11288_v42  ;;  %v4450_v15 = vrot.slane %v4436_v47, %v11288_v42 }
 0x31a   : > { %v5947_v38 = vmax.f32 %v4434_v21, %v4417_v29  ;;  %v6162_v3 = vmax.f32 %v5946_v53, %v4432_v2  ;;  %v4435_v32 = vcombine.high %v4431_v13, %v4431_v13  ;;  %v6260_v35 = vmax.f32 %v6152_v0, %v6158_v1 }
 0x31b   : > { %v12805_v16 = vmax.f32 %v6328_v31, 0.0  ;;  %v12807_v25 = vmax.f32 %v6329_v59, 0.0  ;;  %v4433_v58 = vcombine.high %v4417_v29, %v4417_v29  ;;  %v4451_v62 = vcombine.high %v4443_v23, %v4443_v23 }
 0x31c   : > { %v6163_v5 = vmax.f32 %v5947_v38, %v4431_v13  ;;  %v6330_v45 = vmax.f32 %v6258_v10, %v6162_v3  ;;  %v4452_v12 = vcombine.high %v4450_v15, %v4450_v15  ;;  %v4459_v63 = vrot.slane %v4443_v23, %v11288_v42 }
 0x31d   : > { %14306 = vst [vmem:[#allocation47_spill] sm:$0xff] %v12805_v16  ;;  %14307 = vst [vmem:[#allocation48_spill] sm:$0xff] %v12807_v25  ;;  %v6787_v44 = vcombine.low %v12805_v16, %v12807_v25  ;;  %v4473_v57 = vrot.slane %v4451_v62, %v11288_v42  ;;  %v5948_v9 = vmax.f32 %v4433_v58, %v4435_v32 }
 0x31e   : > { %v6331_v36 = vmax.f32 %v6259_v46, %v6163_v5  ;;  %v6402_v4 = vmax.f32 %v6330_v45, 0.0  ;;  %v4481_v0 = vcombine.high %v4459_v63, %v4459_v63  ;;  %v14308_v33 = vcombine.low %v12723_v39, %v12715_v17  ;;  %v14350_v17 = vld [vmem:[#allocation17_spill] sm:$0xff] }
 0x31f   : > { %v6815_v49 = vrot.slane %v6787_v44, %v11288_v42  ;;  %v4483_v10 = vcombine.high %v4473_v57, %v4473_v57  ;;  %v6164_v60 = vmax.f32 %v5948_v9, %v4459_v63  ;;  %v4480_v8 = vrot.slane %v4452_v12, %v11288_v42 }
 0x320   : > { %v6808_v1 = vrot.slane %v14308_v33, %v11288_v42  ;;  %v6403_v50 = vmax.f32 %v6331_v36, 0.0  ;;  %v5949_v29 = vmax.f32 %v4473_v57, %v4481_v0  ;;  %v1019_v47 = vadd.f32 %v12606_v55, %v12445_v61 }
 0x321   : > { %v14309_v46 = vcombine.low %v12706_v6, %v12713_v43  ;;  %v7734_v21 = vpack.c.bf16 %v6402_v4, %v6402_v4  ;;  %v6332_v53 = vmax.f32 %v6260_v35, %v6164_v60  ;;  %v1022_v38 = vadd.f32 %v12606_v55, %v12455_v19 }
 0x322   : > { %v6817_v2 = vcombine.low %v6808_v1, %v6815_v49  ;;  %v6833_v31 = vcombine.low %v6402_v4, %v6403_v50  ;;  %v7735_v59 = vpack.c.bf16 %v6403_v50, %v6403_v50  ;;  %v6165_v23 = vmax.f32 %v5949_v29, %v4483_v10 }
 0x323   : > { %v6824_v13 = vrot.slane %v14309_v46, %v11288_v42  ;;  %v4466_v32 = vrot.slane %v4450_v15, %v11288_v42  ;;  %v4485_v58 = vcombine.high %v1019_v47, %v1019_v47  ;;  %v4492_v61 = vrot.slane %v1019_v47, %v11288_v42 }
 0x324   : > { %v6831_v3 = vrot.slane %v6817_v2, %v11288_v42  ;;  %v7896_v62 = vunpack.c.l.b16 %v7735_v59  ;;  %v6333_v5 = vmax.f32 %v6261_v18, %v6165_v23  ;;  %v12830_v6 = vmax.f32 %v6332_v53, 0.0 }
 0x325   : > { %v4484_v43 = vcombine.high %v4480_v8, %v4480_v8  ;;  %v7895_v35 = vunpack.c.l.b16 %v7734_v21  ;;  %v4499_v12 = vrot.slane %v4485_v58, %v11288_v42  ;;  %v4500_v63 = vcombine.high %v4492_v61, %v4492_v61 }
 0x326   : > { %v12832_v45 = vcombine.low %v6824_v13, %v6831_v3  ;;  %v8016_v44 = vrot.slane %v7896_v62, 7  ;;  %v12835_v19 = vmax.f32 %v6333_v5, 0.0  ;;  %v4508_v57 = vrot.slane %v4492_v61, %v11288_v42 }
 0x327   : > { %v4534_v15 = vcombine.high %v1022_v38, %v1022_v38  ;;  %v4501_v9 = vcombine.high %v4499_v12, %v4499_v12  ;;  %v12839_v36 = vrot.slane %v4499_v12, %v11288_v42  ;;  %v12842_v18 = vrot.slane %v4500_v63, %v11288_v42 }
 0x328   : > { %14310 = vst [vmem:[#allocation67_spill] sm:$0xff] %v12832_v45  ;;  %v4541_v4 = vrot.slane %v1022_v38, %v11288_v42  ;;  %v12846_v0 = vsel %vm7912_vm1, %v8016_v44, %v7895_v35  ;;  %v5950_v33 = vmax.f32 %v4466_v32, %v4480_v8  ;;  %v6834_v1 = vcombine.low %v12830_v6, %v12835_v19 }
 0x329   : > { %14311 = vst [vmem:[#allocation68_spill] sm:$0xff] %v12846_v0  ;;  %v4529_v49 = vrot.slane %v4501_v9, %v11288_v42  ;;  %v4530_v10 = vcombine.high %v4508_v57, %v4508_v57  ;;  %v4531_v60 = vcombine.high %v12839_v36, %v12839_v36  ;;  %v4532_v50 = vcombine.high %v12842_v18, %v12842_v18 }
 0x32a   : > { %v12856_v29 = vrot.slane %v6833_v31, %v11288_v42  ;;  %v12859_v47 = vrot.slane %v6834_v1, %v11288_v42  ;;  %v12861_v46 = vmax.f32 %v4484_v43, %v4508_v57  ;;  %v4548_v8 = vrot.slane %v4534_v15, %v11288_v42 }
 0x32b   : > { %v4482_v13 = vcombine.high %v4466_v32, %v4466_v32  ;;  %v12864_v2 = vmax.f32 %v4530_v10, %v4532_v50  ;;  %v4549_v21 = vcombine.high %v4541_v4, %v4541_v4  ;;  %v4533_v59 = vcombine.high %v4529_v49, %v4529_v49 }
 0x32c   : > { %v6167_v23 = vmax.f32 %v12861_v46, %v12842_v18  ;;  %v4550_v31 = vcombine.high %v4548_v8, %v4548_v8  ;;  %v5953_v38 = vmax.f32 %v4529_v49, %v4531_v60  ;;  %v4557_v3 = vrot.slane %v4541_v4, %v11288_v42 }
 0x32d   : > { %v4564_v58 = vrot.slane %v4548_v8, %v11288_v42  ;;  %v4571_v61 = vrot.slane %v4549_v21, %v11288_v42  ;;  %v1027_v5 = vadd.f32 %v12606_v55, %v12465_v24  ;;  %v6166_v43 = vmax.f32 %v5950_v33, %v4482_v13 }
 0x32e   : > { %v12876_v62 = vrot.slane %v4550_v31, %v11288_v42  ;;  %v4579_v12 = vcombine.high %v4557_v3, %v4557_v3  ;;  %v1030_v1 = vadd.f32 %v12606_v55, %v12474_v37  ;;  %v6169_v10 = vmax.f32 %v5953_v38, %v4533_v59 }
 0x32f   : > { %v4580_v63 = vcombine.high %v4564_v58, %v4564_v58  ;;  %v4581_v44 = vcombine.high %v4571_v61, %v4571_v61  ;;  %v5954_v57 = vmax.f32 %v4557_v3, %v4571_v61  ;;  %v4583_v18 = vcombine.high %v1027_v5, %v1027_v5 }
 0x330   : > { %v4582_v9 = vcombine.high %v12876_v62, %v12876_v62  ;;  %v4590_v4 = vrot.slane %v1027_v5, %v11288_v42  ;;  %v1035_v60 = vadd.f32 %v12606_v55, %v12487_v28  ;;  %v4632_v37 = vcombine.high %v1030_v1, %v1030_v1 }
 0x331   : > { %v12889_v24 = vmax.f32 %v4581_v44, %v4564_v58  ;;  %v6170_v33 = vmax.f32 %v5954_v57, %v4579_v12  ;;  %v4597_v46 = vrot.slane %v4583_v18, %v11288_v42  ;;  %v4639_v3 = vrot.slane %v1030_v1, %v11288_v42 }
 0x332   : > { %v4598_v8 = vcombine.high %v4590_v4, %v4590_v4  ;;  %v4606_v13 = vrot.slane %v4590_v4, %v11288_v42  ;;  %v5956_v21 = vmax.f32 %v4580_v63, %v4582_v9  ;;  %v4681_v58 = vcombine.high %v1035_v60, %v1035_v60 }
 0x333   : > { %v6171_v31 = vmax.f32 %v12889_v24, %v12876_v62  ;;  %v4599_v61 = vcombine.high %v4597_v46, %v4597_v46  ;;  %v4613_v59 = vrot.slane %v4597_v46, %v11288_v42  ;;  %v4646_v12 = vrot.slane %v4632_v37, %v11288_v42 }
 0x334   : > { %v4620_v38 = vrot.slane %v4598_v8, %v11288_v42  ;;  %v4628_v28 = vcombine.high %v4606_v13, %v4606_v13  ;;  %v6172_v5 = vmax.f32 %v5956_v21, %v4606_v13  ;;  %v4647_v44 = vcombine.high %v4639_v3, %v4639_v3 }
 0x335   : > { %v12880_v35 = vpop.f32.mrb[164].mxu0  ;;  %v4655_v57 = vrot.slane %v4639_v3, %v11288_v42  ;;  %v4627_v63 = vrot.slane %v4599_v61, %v11288_v42  ;;  %v4648_v4 = vcombine.high %v4646_v12, %v4646_v12  ;;  %v4662_v1 = vrot.slane %v4646_v12, %v11288_v42 }
 0x336   : > { %14312 = vst [vmem:[#allocation69_spill] sm:$0xff] %v12880_v35  ;;  %v10475_v15 = vpop.f32.mrb[165].mxu0  ;;  %v4630_v62 = vcombine.high %v4620_v38, %v4620_v38  ;;  %v5957_v9 = vmax.f32 %v4620_v38, %v4628_v28  ;;  %v12903_v18 = vmax.f32 %v6166_v43, %v6172_v5  ;;  %v4669_v24 = vrot.slane %v4647_v44, %v11288_v42 }
 0x337   : > { %v12887_v49 = vpop.f32.mrb[166].mxu0  ;;  %v4629_v15 = vcombine.high %v4613_v59, %v4613_v59  ;;  %v4631_v8 = vcombine.high %v4627_v63, %v4627_v63  ;;  %v4677_v13 = vcombine.high %v4655_v57, %v4655_v57  ;;  %v4676_v21 = vrot.slane %v4648_v4, %v11288_v42 }
 0x338   : > { %14313 = vst [vmem:[#allocation70_spill] sm:$0xff] %v12887_v49  ;;  %v10476_v50 = vpop.f32.mrb[167].mxu0  ;;  %v6173_v46 = vmax.f32 %v5957_v9, %v4630_v62  ;;  %v4678_v37 = vcombine.high %v4662_v1, %v4662_v1  ;;  %v4679_v3 = vcombine.high %v4669_v24, %v4669_v24  ;;  %v4688_v61 = vrot.slane %v1035_v60, %v11288_v42 }
 0x339   : > { %v5958_v50 = vmax.f32 %v4613_v59, %v4627_v63  ;;  %v5959_v38 = vmax.f32 %v4631_v8, %v4655_v57  ;;  %v4695_v43 = vrot.slane %v4681_v58, %v11288_v42  ;;  %v4680_v28 = vcombine.high %v4676_v21, %v4676_v21 }
 0x33a   : > { %v6263_v32 = vmax.f32 %v6167_v23, %v6173_v46  ;;  %v5960_v5 = vmax.f32 %v4677_v13, %v4679_v3  ;;  %v5961_v12 = vmax.f32 %v4676_v21, %v4678_v37  ;;  %v4696_v49 = vcombine.high %v4688_v61, %v4688_v61 }
 0x33b   : > { %v6174_v53 = vmax.f32 %v5958_v50, %v4629_v15  ;;  %v6175_v44 = vmax.f32 %v5959_v38, %v4669_v24  ;;  %v4697_v59 = vcombine.high %v4695_v43, %v4695_v43  ;;  %v4704_v63 = vrot.slane %v4688_v61, %v11288_v42 }
 0x33c   : > { %v4711_v62 = vrot.slane %v4695_v43, %v11288_v42  ;;  %v6176_v9 = vmax.f32 %v5960_v5, %v4662_v1  ;;  %v6177_v4 = vmax.f32 %v5961_v12, %v4680_v28  ;;  %v4718_v35 = vrot.slane %v4696_v49, %v11288_v42 }
 0x33d   : > { %v1038_v23 = vadd.f32 %v12606_v55, %v12496_v30  ;;  %v6265_v60 = vmax.f32 %v6169_v10, %v6175_v44  ;;  %v4725_v58 = vrot.slane %v4697_v59, %v11288_v42  ;;  %v4726_v57 = vcombine.high %v4704_v63, %v4704_v63 }
 0x33e   : > { %v4727_v15 = vcombine.high %v4711_v62, %v4711_v62  ;;  %v6266_v50 = vmax.f32 %v6170_v33, %v6176_v9  ;;  %v4728_v46 = vcombine.high %v4718_v35, %v4718_v35  ;;  %v5962_v24 = vmax.f32 %v4704_v63, %v4718_v35 }
 0x33f   : > { %v4730_v8 = vcombine.high %v1038_v23, %v1038_v23  ;;  %v4729_v13 = vcombine.high %v4725_v58, %v4725_v58  ;;  %v4737_v21 = vrot.slane %v1038_v23, %v11288_v42  ;;  %v14314_v1 = vmax.f32 %v12864_v2, %v12839_v36 }
 0x340   : > { %v1043_v49 = vadd.f32 %v12606_v55, %v12512_v34  ;;  %v5963_v30 = vmax.f32 %v4728_v46, %v4711_v62  ;;  %v6178_v10 = vmax.f32 %v5962_v24, %v4726_v57  ;;  %v6267_v61 = vmax.f32 %v6171_v31, %v6177_v4 }
 0x341   : > { %v6264_v37 = vmax.f32 %v14314_v1, %v6174_v53  ;;  %v4744_v3 = vrot.slane %v4730_v8, %v11288_v42  ;;  %v4745_v38 = vcombine.high %v4737_v21, %v4737_v21  ;;  %v4753_v33 = vrot.slane %v4737_v21, %v11288_v42 }
 0x342   : > { %v5964_v35 = vmax.f32 %v4727_v15, %v4729_v13  ;;  %v4779_v43 = vcombine.high %v1043_v49, %v1043_v49  ;;  %v6179_v28 = vmax.f32 %v5963_v30, %v4725_v58  ;;  %v6334_v5 = vmax.f32 %v12903_v18, %v6178_v10 }
 0x343   : > { %v4746_v12 = vcombine.high %v4744_v3, %v4744_v3  ;;  %v4760_v36 = vrot.slane %v4744_v3, %v11288_v42  ;;  %v4767_v2 = vrot.slane %v4745_v38, %v11288_v42  ;;  %v4775_v53 = vcombine.high %v4753_v33, %v4753_v33 }
 0x344   : > { %v6180_v34 = vmax.f32 %v5964_v35, %v4753_v33  ;;  %v4786_v44 = vrot.slane %v1043_v49, %v11288_v42  ;;  %v6335_v59 = vmax.f32 %v6263_v32, %v6179_v28  ;;  %v4793_v4 = vrot.slane %v4779_v43, %v11288_v42 }
 0x345   : > { %v4774_v31 = vrot.slane %v4746_v12, %v11288_v42  ;;  %v4777_v63 = vcombine.high %v4767_v2, %v4767_v2  ;;  %v5965_v62 = vmax.f32 %v4767_v2, %v4775_v53  ;;  %v4776_v18 = vcombine.high %v4760_v36, %v4760_v36 }
 0x346   : > { %v6336_v9 = vmax.f32 %v6264_v37, %v6180_v34  ;;  %v12930_v23 = vmax.f32 %v6335_v59, 0.0  ;;  %v12932_v57 = vmax.f32 %v6334_v5, 0.0  ;;  %v4794_v46 = vcombine.high %v4786_v44, %v4786_v44 }
 0x347   : > { %v5966_v58 = vmax.f32 %v4760_v36, %v4774_v31  ;;  %v6181_v15 = vmax.f32 %v5965_v62, %v4777_v63  ;;  %v4778_v8 = vcombine.high %v4774_v31, %v4774_v31  ;;  %v4795_v13 = vcombine.high %v4793_v4, %v4793_v4 }
 0x348   : > { %14315 = vst [vmem:[#allocation71_spill] sm:$0xff] %v12930_v23  ;;  %v4802_v32 = vrot.slane %v4786_v44, %v11288_v42  ;;  %v12935_v1 = vmax.f32 %v6336_v9, 0.0  ;;  %v12938_v37 = vrot.slane %v4793_v4, %v11288_v42  ;;  %v6835_v49 = vcombine.low %v12932_v57, %v12930_v23 }
 0x349   : > { %v6182_v24 = vmax.f32 %v5966_v58, %v4776_v18  ;;  %v6337_v21 = vmax.f32 %v6265_v60, %v6181_v15  ;;  %v4816_v10 = vrot.slane %v4794_v46, %v11288_v42  ;;  %v14317_v38 = vcombine.low %v12856_v29, %v12859_v47 }
 0x34a   : > { %v4823_v60 = vrot.slane %v4795_v13, %v11288_v42  ;;  %v5967_v35 = vmax.f32 %v4778_v8, %v4802_v32  ;;  %v4825_v28 = vcombine.high %v12938_v37, %v12938_v37  ;;  %v1051_v5 = vadd.f32 %v12606_v55, %v12573_v20 }
 0x34b   : > { %v6338_v30 = vmax.f32 %v6266_v50, %v6182_v24  ;;  %v12943_v3 = vmax.f32 %v6337_v21, 0.0  ;;  %v6873_v33 = vrot.slane %v14317_v38, %v11288_v42  ;;  %v1046_v50 = vadd.f32 %v12606_v55, %v12520_v56 }
 0x34c   : > { %v6857_v12 = vrot.slane %v6835_v49, %v11288_v42  ;;  %v4824_v29 = vcombine.high %v4802_v32, %v4802_v32  ;;  %v6183_v47 = vmax.f32 %v5967_v35, %v4816_v10  ;;  %v4877_v44 = vcombine.high %v1051_v5, %v1051_v5 }
 0x34d   : > { %14316 = vst [vmem:[#allocation72_spill] sm:$0xff] %v12943_v3  ;;  %v6836_v43 = vcombine.low %v12935_v1, %v12943_v3  ;;  %v12959_v36 = vmax.f32 %v6338_v30, 0.0  ;;  %v4828_v53 = vcombine.high %v1046_v50, %v1046_v50  ;;  %v4835_v34 = vrot.slane %v1046_v50, %v11288_v42 }
 0x34e   : > { %v4826_v59 = vcombine.high %v4816_v10, %v4816_v10  ;;  %v4827_v31 = vcombine.high %v4823_v60, %v4823_v60  ;;  %v6339_v63 = vmax.f32 %v6267_v61, %v6183_v47  ;;  %v4884_v56 = vrot.slane %v1051_v5, %v11288_v42 }
 0x34f   : > { %v6864_v2 = vrot.slane %v6836_v43, %v11288_v42  ;;  %v5969_v9 = vmax.f32 %v4823_v60, %v4825_v28  ;;  %v4842_v20 = vrot.slane %v4828_v53, %v11288_v42  ;;  %v4843_v4 = vcombine.high %v4835_v34, %v4835_v34 }
 0x350   : > { %v12965_v18 = vmax.f32 %v6339_v63, 0.0  ;;  %v4851_v58 = vrot.slane %v4835_v34, %v11288_v42  ;;  %v4891_v15 = vrot.slane %v4877_v44, %v11288_v42  ;;  %v4892_v46 = vcombine.high %v4884_v56, %v4884_v56 }
 0x351   : > { %v6866_v62 = vcombine.low %v6857_v12, %v6864_v2  ;;  %v4844_v8 = vcombine.high %v4842_v20, %v4842_v20  ;;  %v4858_v13 = vrot.slane %v4842_v20, %v11288_v42  ;;  %v4865_v61 = vrot.slane %v4843_v4, %v11288_v42 }
 0x352   : > { %v5968_v32 = vmax.f32 %v4824_v29, %v4826_v59  ;;  %v6882_v21 = vcombine.low %v12959_v36, %v12965_v18  ;;  %v4893_v49 = vcombine.high %v4891_v15, %v4891_v15  ;;  %v12975_v30 = vrot.slane %v4884_v56, %v11288_v42 }
 0x353   : > { %v6880_v24 = vrot.slane %v6866_v62, %v11288_v42  ;;  %v12980_v38 = vrot.slane %v4844_v8, %v11288_v42  ;;  %v4875_v60 = vcombine.high %v4865_v61, %v4865_v61  ;;  %v1054_v35 = vadd.f32 %v12606_v55, %v12592_v27 }
 0x354   : > { %v4873_v43 = vcombine.high %v4851_v58, %v4851_v58  ;;  %v4874_v28 = vcombine.high %v4858_v13, %v4858_v13  ;;  %v5970_v50 = vmax.f32 %v4851_v58, %v4865_v61  ;;  %v4907_v5 = vrot.slane %v4891_v15, %v11288_v42 }
 0x355   : > { %v12977_v10 = vcombine.low %v6873_v33, %v6880_v24  ;;  %v12985_v12 = vmax.f32 %v4875_v60, %v4858_v13  ;;  %v4876_v29 = vcombine.high %v12980_v38, %v12980_v38  ;;  %v4914_v33 = vrot.slane %v4892_v46, %v11288_v42  ;;  %v10719_v46 = vld [vmem:[%s14127_s2] ss:$0 sm:$0xff] }
 0x356   : > { %v4921_v47 = vrot.slane %v4893_v49, %v11288_v42  ;;  %v6184_v2 = vmax.f32 %v5968_v32, %v12938_v37  ;;  %v6186_v53 = vmax.f32 %v5970_v50, %v4873_v43  ;;  %v4922_v27 = vcombine.high %v12975_v30, %v12975_v30 }
 0x357   : > { %v4923_v55 = vcombine.high %v4907_v5, %v4907_v5  ;;  %v6187_v34 = vmax.f32 %v12985_v12, %v12980_v38  ;;  %v4924_v44 = vcombine.high %v4914_v33, %v4914_v33  ;;  %v5972_v59 = vmax.f32 %v4874_v28, %v4876_v29 }
 0x358   : > { %v5974_v63 = vmax.f32 %v4907_v5, %v4921_v47  ;;  %v5973_v56 = vmax.f32 %v4914_v33, %v4922_v27  ;;  %v4925_v62 = vcombine.high %v4921_v47, %v4921_v47  ;;  %v4926_v20 = vcombine.high %v1054_v35, %v1054_v35 }
 0x359   : > { %v4933_v4 = vrot.slane %v1054_v35, %v11288_v42  ;;  %v6188_v58 = vmax.f32 %v5972_v59, %v12975_v30  ;;  %v6185_v37 = vmax.f32 %v5969_v9, %v4827_v31  ;;  %v1059_v24 = vadd.f32 %v10719_v46, %v12632_v52 }
 0x35a   : > { %v6190_v15 = vmax.f32 %v5974_v63, %v4923_v55  ;;  %v6189_v8 = vmax.f32 %v5973_v56, %v4924_v44  ;;  %v4940_v13 = vrot.slane %v4926_v20, %v11288_v42  ;;  %v1062_v35 = vadd.f32 %v10719_v46, %v12635_v41 }
 0x35b   : > { %v4941_v61 = vcombine.high %v4933_v4, %v4933_v4  ;;  %v4949_v32 = vrot.slane %v4933_v4, %v11288_v42  ;;  %v4975_v49 = vcombine.high %v1059_v24, %v1059_v24  ;;  %v4982_v60 = vrot.slane %v1059_v24, %v11288_v42 }
 0x35c   : > { %v6268_v30 = vmax.f32 %v6184_v2, %v6190_v15  ;;  %v4942_v43 = vcombine.high %v4940_v13, %v4940_v13  ;;  %v4956_v31 = vrot.slane %v4940_v13, %v11288_v42  ;;  %v5024_v55 = vcombine.high %v1062_v35, %v1062_v35 }
 0x35d   : > { %v4963_v9 = vrot.slane %v4941_v61, %v11288_v42  ;;  %v4971_v28 = vcombine.high %v4949_v32, %v4949_v32  ;;  %v5975_v50 = vmax.f32 %v4925_v62, %v4949_v32  ;;  %v4989_v52 = vrot.slane %v4975_v49, %v11288_v42 }
 0x35e   : > { %v4990_v5 = vcombine.high %v4982_v60, %v4982_v60  ;;  %v4998_v29 = vrot.slane %v4982_v60, %v11288_v42  ;;  %v4970_v33 = vrot.slane %v4942_v43, %v11288_v42  ;;  %v4972_v47 = vcombine.high %v4956_v31, %v4956_v31 }
 0x35f   : > { %v4973_v27 = vcombine.high %v4963_v9, %v4963_v9  ;;  %v6191_v44 = vmax.f32 %v5975_v50, %v4963_v9  ;;  %v4991_v41 = vcombine.high %v4989_v52, %v4989_v52  ;;  %v5005_v2 = vrot.slane %v4989_v52, %v11288_v42 }
 0x360   : > { %v5012_v59 = vrot.slane %v4990_v5, %v11288_v42  ;;  %v4974_v63 = vcombine.high %v4970_v33, %v4970_v33  ;;  %v5977_v20 = vmax.f32 %v4970_v33, %v4972_v47  ;;  %v5020_v62 = vcombine.high %v4998_v29, %v4998_v29 }
 0x361   : > { %v5976_v56 = vmax.f32 %v4971_v28, %v4973_v27  ;;  %v6269_v4 = vmax.f32 %v6185_v37, %v6191_v44  ;;  %v5019_v15 = vrot.slane %v4991_v41, %v11288_v42  ;;  %v5021_v24 = vcombine.high %v5005_v2, %v5005_v2 }
 0x362   : > { %v5022_v13 = vcombine.high %v5012_v59, %v5012_v59  ;;  %v6193_v32 = vmax.f32 %v5977_v20, %v4974_v63  ;;  %v5978_v49 = vmax.f32 %v4998_v29, %v5012_v59  ;;  %v5031_v60 = vrot.slane %v1062_v35, %v11288_v42 }
 0x363   : > { %v6192_v61 = vmax.f32 %v5976_v56, %v4956_v31  ;;  %v5023_v9 = vcombine.high %v5019_v15, %v5019_v15  ;;  %v5038_v50 = vrot.slane %v5024_v55, %v11288_v42  ;;  %v1067_v52 = vadd.f32 %v10719_v46, %v12664_v54 }
 0x364   : > { %v5979_v43 = vmax.f32 %v5022_v13, %v5005_v2  ;;  %v6194_v28 = vmax.f32 %v5978_v49, %v5020_v62  ;;  %v5039_v33 = vcombine.high %v5031_v60, %v5031_v60  ;;  %v5047_v37 = vrot.slane %v5031_v60, %v11288_v42 }
 0x365   : > { %v6270_v5 = vmax.f32 %v6186_v53, %v6192_v61  ;;  %v5040_v27 = vcombine.high %v5038_v50, %v5038_v50  ;;  %v5054_v44 = vrot.slane %v5038_v50, %v11288_v42  ;;  %v5980_v31 = vmax.f32 %v5021_v24, %v5023_v9 }
 0x366   : > { %v6195_v47 = vmax.f32 %v5979_v43, %v5019_v15  ;;  %v6272_v41 = vmax.f32 %v6188_v58, %v6194_v28  ;;  %v5061_v29 = vrot.slane %v5039_v33, %v11288_v42  ;;  %v5069_v35 = vcombine.high %v5047_v37, %v5047_v37 }
 0x367   : > { %v5073_v2 = vcombine.high %v1067_v52, %v1067_v52  ;;  %v5068_v55 = vrot.slane %v5040_v27, %v11288_v42  ;;  %v5070_v63 = vcombine.high %v5054_v44, %v5054_v44  ;;  %v6196_v54 = vmax.f32 %v5980_v31, %v5047_v37 }
 0x368   : > { %v6273_v59 = vmax.f32 %v6189_v8, %v6195_v47  ;;  %v5071_v53 = vcombine.high %v5061_v29, %v5061_v29  ;;  %v5981_v46 = vmax.f32 %v5061_v29, %v5069_v35  ;;  %v5080_v56 = vrot.slane %v1067_v52, %v11288_v42 }
 0x369   : > { %v5087_v20 = vrot.slane %v5073_v2, %v11288_v42  ;;  %v5982_v62 = vmax.f32 %v5054_v44, %v5068_v55  ;;  %v6340_v15 = vmax.f32 %v6268_v30, %v6196_v54  ;;  %v5072_v13 = vcombine.high %v5068_v55, %v5068_v55 }
 0x36a   : > { %v6271_v58 = vmax.f32 %v6187_v34, %v6193_v32  ;;  %v6197_v24 = vmax.f32 %v5981_v46, %v5071_v53  ;;  %v5088_v61 = vcombine.high %v5080_v56, %v5080_v56  ;;  %v5096_v49 = vrot.slane %v5080_v56, %v11288_v42 }
 0x36b   : > { %v5089_v8 = vcombine.high %v5087_v20, %v5087_v20  ;;  %v6198_v60 = vmax.f32 %v5982_v62, %v5070_v63  ;;  %v5103_v43 = vrot.slane %v5087_v20, %v11288_v42  ;;  %v13028_v50 = vmax.f32 %v6340_v15, 0.0  ;;  %v14321_v15 = vld [vmem:[#allocation16_spill] sm:$0xff] }
 0x36c   : > { %v6341_v9 = vmax.f32 %v6269_v4, %v6197_v24  ;;  %v5110_v52 = vrot.slane %v5088_v61, %v11288_v42  ;;  %v5983_v37 = vmax.f32 %v5072_v13, %v5096_v49  ;;  %v5118_v12 = vcombine.high %v5096_v49, %v5096_v49  ;;  %v14323_v61 = vld [vmem:[#allocation26_spill] sm:$0xff]  ;;  %v14324_v49 = vld [vmem:[#allocation20_spill] sm:$0xff] }
 0x36d   : > { %v5117_v30 = vrot.slane %v5089_v8, %v11288_v42  ;;  %v6342_v28 = vmax.f32 %v6270_v5, %v6198_v60  ;;  %v5119_v33 = vcombine.high %v5103_v43, %v5103_v43  ;;  %v6892_v5 = vrot.slane %v6882_v21, %v11288_v42 }
 0x36e   : > { %v13032_v38 = vmax.f32 %v6341_v9, 0.0  ;;  %v5120_v34 = vcombine.high %v5110_v52, %v5110_v52  ;;  %v6199_v27 = vmax.f32 %v5983_v37, %v5110_v52  ;;  %v7683_v21 = vpack.c.bf16 %v14321_v15, %v14321_v15  ;;  %v14325_v9 = vld [vmem:[#allocation18_spill] sm:$0xff] }
 0x36f   : > { %v5121_v32 = vcombine.high %v5117_v30, %v5117_v30  ;;  %v5985_v47 = vmax.f32 %v5117_v30, %v5119_v33  ;;  %v13041_v55 = vmax.f32 %v6342_v28, 0.0  ;;  %v6941_v8 = vrot.slane %v14323_v61, 1  ;;  %v14326_v33 = vld [vmem:[#allocation21_spill] sm:$0xff] }
 0x370   : > { %v6883_v44 = vcombine.low %v13028_v50, %v13032_v38  ;;  %v5984_v4 = vmax.f32 %v5118_v12, %v5120_v34  ;;  %v6343_v29 = vmax.f32 %v6271_v58, %v6199_v27  ;;  %v14322_v58 = vld [vmem:[#allocation19_spill] sm:$0xff]  ;;  %v14193_v60 = vrot.slane %v14324_v49, 1 }
 0x371   : > { %v6201_v31 = vmax.f32 %v5985_v47, %v5121_v32  ;;  %v7685_v52 = vpack.c.bf16 %v14325_v9, %v14325_v9  ;;  %v7691_v37 = vpack.c.bf16 %v14326_v33, %v14326_v33  ;;  %v14192_v34 = vrot.slane %v12002_v51, 1  ;;  %v8184_v32 = vld [vmem:[#allocation8 + $0x168] sm:$0xff]  ;;  %v8185_v47 = vld [vmem:[#allocation8 + $0x170] sm:$0xff]  ;;  %v14327_v27 = vld [vmem:[#allocation23_spill] sm:$0xff] }
 0x372   : > { %v6899_v35 = vrot.slane %v6883_v44, %v11288_v42  ;;  %v6200_v2 = vmax.f32 %v5984_v4, %v5103_v43  ;;  %v13043_v54 = vmax.f32 %v6343_v29, 0.0  ;;  %v13062_v43 = vunpack.c.l.b16 %v7683_v21  ;;  %v7020_v9 = vld [vmem:[#allocation8 + $0x48] sm:$0xff] }
 0x373   : > { %v6345_v63 = vmax.f32 %v6273_v59, %v6201_v31  ;;  %v7684_v59 = vpack.c.bf16 %v14322_v58, %v14322_v58  ;;  %v13074_v12 = vsel %vm6951_vm6, %v14193_v60, %v6941_v8  ;;  %v7693_v44 = vpack.c.bf16 %v14327_v27, %v14327_v27  ;;  %v14333_v58 = vld [vmem:[#allocation27_spill] sm:$0xff]  ;;  %v14334_v27 = vld [vmem:[#allocation28_spill] sm:$0xff]  ;;  %v14340_v60 = vld [vmem:[#allocation38_spill] sm:$0xff] }
 0x374   : > { %14318 = vst [vmem:[#allocation73_spill] sm:$0xff] %v13043_v54  ;;  %v6914_v53 = vcombine.low %v6892_v5, %v6899_v35  ;;  %v6344_v46 = vmax.f32 %v6272_v41, %v6200_v2  ;;  %v6884_v20 = vcombine.low %v13041_v55, %v13043_v54  ;;  %v7001_v29 = vrot.slane %v14323_v61, 2  ;;  %v14328_v5 = vld [vmem:[#allocation22_spill] sm:$0xff]  ;;  %v14329_v2 = vld [vmem:[#allocation25_spill] sm:$0xff] }
 0x375   : > { %v13045_v56 = vmax.f32 %v6345_v63, 0.0  ;;  %v13066_v28 = vunpack.c.l.b16 %v7684_v59  ;;  %v7692_v35 = vpack.c.bf16 %v14328_v5, %v14328_v5  ;;  %v7694_v63 = vpack.c.bf16 %v14329_v2, %v14329_v2  ;;  %v14344_v61 = vld [vmem:[#allocation34_spill] sm:$0xff] }
 0x376   : > { %v13049_v62 = vmax.f32 %v6344_v46, 0.0  ;;  %v6906_v24 = vrot.slane %v6884_v20, %v11288_v42  ;;  %v6922_v4 = vrot.slane %v6914_v53, %v11288_v42  ;;  %v13091_v46 = vsel %vm6951_vm6, %v6941_v8, %v14192_v34 }
 0x377   : > { %14319 = vst [vmem:[#allocation74_spill] sm:$0xff] %v13045_v56  ;;  %14330 = vst [vmem:[#allocation16_spill] sm:$0xff] %v13091_v46  ;;  %v7000_v53 = vrot.slane %v14324_v49, 2  ;;  %v13097_v15 = vmul.f32 %v8184_v32, %v13074_v12  ;;  %v13100_v21 = vmul.f32 %v8185_v47, %v13091_v46  ;;  %v7695_v59 = vpack.c.bf16 %v14333_v58, %v14333_v58  ;;  %v10660_v32 = vld [vmem:[#allocation7] sm:$0xff]  }
 0x378   : > { %14320 = vst [vmem:[#allocation75_spill] sm:$0xff] %v13049_v62  ;;  %v6885_v13 = vcombine.low %v13049_v62, %v13045_v56  ;;  %v13114_v47 = vunpack.c.l.b16 %v7685_v52  ;;  %v7003_v2 = vrot.slane %v12256_v14, 2  ;;  %v14335_v52 = vld [vmem:[#allocation29_spill] sm:$0xff]  ;;  %v14341_v56 = vld [vmem:[#allocation44_spill] sm:$0xff]  ;;  %v14209_v25 = vrot.slane %v12977_v10, 2 }
 0x379   : > { %14331 = vst [vmem:[#allocation19_spill] sm:$0xff] %v13097_v15  ;;  %14332 = vst [vmem:[#allocation20_spill] sm:$0xff] %v13100_v21  ;;  %v7017_v8 = vsel %vm7009_vm7, %v7000_v53, %v7001_v29  ;;  %v13128_v58 = vunpack.c.l.b16 %v7695_v59  ;;  %v14337_v59 = vld [vmem:[#allocation35_spill] sm:$0xff]  ;;  %v7023_v21 = vld [vmem:[#allocation8 + $0x60] sm:$0xff] }
 0x37a   : > { %v6913_v41 = vrot.slane %v6885_v13, %v11288_v42  ;;  %v13102_v13 = vunpack.c.l.b16 %v7691_v37  ;;  %v13116_v37 = vunpack.c.l.b16 %v7692_v35  ;;  %v7697_v35 = vpack.c.bf16 %v14335_v52, %v14335_v52  ;;  %v10661_v62 = vld [vmem:[#allocation7 + $0x8] sm:$0xff]   ;;  %v7027_v46 = vld [vmem:[#allocation8 + $0x80] sm:$0xff] }
 0x37b   : > { %v7703_v15 = vpack.c.bf16 %v14337_v59, %v14337_v59 }
 0x37c   : > { %v6915_v30 = vcombine.low %v6906_v24, %v6913_v41  ;;  %v13106_v24 = vunpack.c.l.b16 %v7693_v44  ;;  %v7696_v44 = vpack.c.bf16 %v14334_v27, %v14334_v27 }
 0x37e   : > { %v6929_v31 = vrot.slane %v6915_v30, %v11288_v42  ;;  %v7021_v30 = vld [vmem:[#allocation8 + $0x50] sm:$0xff]  ;;  %v7002_v42 = vrot.slane %v12002_v51, 2 }
 0x37f   : > { %v7030_v34 = vmul.f32 %v7021_v30, %v7017_v8  ;;  %v14339_v30 = vld [vmem:[#allocation36_spill] sm:$0xff] }
 0x380   : > { %v13093_v20 = vcombine.low %v6922_v4, %v6929_v31  ;;  %v13121_v31 = vunpack.c.l.b16 %v7694_v63  ;;  %v14336_v63 = vld [vmem:[#allocation30_spill] sm:$0xff]  ;;  %v7015_v27 = vsel %vm7009_vm7, %v7002_v42, %v7003_v2 }
 0x381   : > { %v7698_v4 = vpack.c.bf16 %v14336_v63, %v14336_v63  ;;  %v7706_v63 = vpack.c.bf16 %v14340_v60, %v14340_v60 }
 0x382   : > { %v14196_v41 = vrot.slane %v13093_v20, 2 }
 0x384   : > { %v7018_v5 = vsel %vm7009_vm7, %v14196_v41, %v7000_v53  ;;  %v13138_v41 = vunpack.c.l.b16 %v7696_v44  ;;  %v13151_v53 = vunpack.c.l.b16 %v7697_v35  ;;  %v7016_v35 = vsel %vm7009_vm7, %v7001_v29, %v7002_v42  ;;  %v7022_v44 = vld [vmem:[#allocation8 + $0x58] sm:$0xff]  ;;  %v14349_v29 = vld [vmem:[#allocation56_spill] sm:$0xff] }
 0x385   : > { %v7029_v33 = vmul.f32 %v7020_v9, %v7018_v5  ;;  %v14338_v9 = vld [vmem:[#allocation37_spill] sm:$0xff]  ;;  %v7705_v5 = vpack.c.bf16 %v14339_v30, %v14339_v30  ;;  %v14343_v30 = vld [vmem:[#allocation31_spill] sm:$0xff]  ;;  %v13177_v42 = vunpack.c.l.b16 %v7706_v63  ;;  %v7025_v63 = vld [vmem:[#allocation8 + $0x70] sm:$0xff] }
 0x386   : > { %v7704_v8 = vpack.c.bf16 %v14338_v9, %v14338_v9  ;;  %v13157_v9 = vunpack.c.l.b16 %v7698_v4  ;;  %v7699_v60 = vpack.c.bf16 %v14343_v30, %v14343_v30  ;;  %v7032_v4 = vmul.f32 %v7023_v21, %v7015_v27  ;;  %v14345_v27 = vld [vmem:[#allocation49_spill] sm:$0xff] }
 0x387   : > { %v7038_v52 = vpack.c.bf16 %v7030_v34, %v7029_v33  ;;  %v7712_v34 = vpack.c.bf16 %v14341_v56, %v14341_v56  ;;  %v14342_v33 = vld [vmem:[#allocation45_spill] sm:$0xff]  ;;  %v7005_v56 = vrot.slane %v12601_v48, 2  ;;  %v13175_v3 = vunpack.c.l.b16 %v7705_v5 }
 0x388   : > { %v7713_v59 = vpack.c.bf16 %v14342_v33, %v14342_v33  ;;  %v7702_v33 = vpack.c.bf16 %v14344_v61, %v14344_v61  ;;  %v13173_v0 = vunpack.c.l.b16 %v7704_v8  ;;  %v13185_v21 = vunpack.c.l.b16 %v7699_v60  ;;  %v10662_v8 = vld [vmem:[#allocation7 + $0x10] sm:$0xff]   ;;  %v7024_v60 = vld [vmem:[#allocation8 + $0x68] sm:$0xff] }
 0x389   : > { %10186 = vmatmul.mubr.bf16.vlgmr.msra.gmra.mrb[0].mxu1 %v7038_v52  ;;  %v13168_v52 = vunpack.c.l.b16 %v7703_v15  ;;  %v13180_v23 = vunpack.c.l.b16 %v7712_v34  ;;  %v7031_v15 = vmul.f32 %v7022_v44, %v7016_v35  ;;  %v7714_v30 = vpack.c.bf16 %v14345_v27, %v14345_v27  ;;  %v10663_v27 = vld [vmem:[#allocation7 + $0x18] sm:$0xff]  }
 0x38a   : > { %10206 = vmatpush3.bf16.msra.mxu1 %v10660_v32  ;;  %10189 = vmatprep.mubr.msk.bf16.mxu1 %vm10927_vm0, %v14263_v11  ;;  %v7004_v32 = vrot.slane %v12426_v7, 2  ;;  %v13182_v61 = vunpack.c.l.b16 %v7713_v59  ;;  %v13191_v16 = vunpack.c.l.b16 %v7702_v33  ;;  %v7494_v35 = vrot.slane %v12601_v48, 7 }
 0x38b   : > { %10207 = vmatprep.subr.bf16.mxu1 %v14263_v11  ;;  %v7039_v59 = vpack.c.bf16 %v7032_v4, %v7031_v15  ;;  %v7006_v15 = vrot.slane %v12832_v45, 2  ;;  %v13204_v34 = vunpack.c.l.b16 %v7714_v30  ;;  %v7929_v30 = vrot.slane %v13114_v47, 1 }
 0x38c   : > { %v7013_v5 = vsel %vm7009_vm7, %v7004_v32, %v7005_v56  ;;  %v7014_v44 = vsel %vm7009_vm7, %v7003_v2, %v7004_v32  ;;  %v14346_v2 = vld [vmem:[#allocation53_spill] sm:$0xff]  ;;  %v14348_v32 = vld [vmem:[#allocation54_spill] sm:$0xff]  ;;  %v14351_v47 = vrot.slane %v13062_v43, 3  ;;  %v14352_v33 = vrot.slane %v12426_v7, 7 }
 0x38d   : > { %v7034_v4 = vmul.f32 %v7025_v63, %v7013_v5  ;;  %v14347_v5 = vld [vmem:[#allocation52_spill] sm:$0xff] }
 0x38e   : > { %10208 = vmatpush3.bf16.msra.mxu1 %v10661_v62  ;;  %v7033_v62 = vmul.f32 %v7024_v60, %v7014_v44  ;;  %v7011_v44 = vsel %vm7009_vm7, %v7006_v15, %v14209_v25  ;;  %v7925_v63 = vsel %vm7924_vm8, %v14351_v47, %v14350_v17  ;;  %v13234_v54 = vsel %vm7498_vm5, %v14352_v33, %v7494_v35  ;;  %v14356_v17 = vld [vmem:[#allocation33_spill] sm:$0xff]  ;;  %v8736_v47 = vld [vmem:[#allocation8 + $0x260] sm:$0xff] }
 0x38f   : > { %10209 = vmatprep.subr.bf16.mxu1 %v14263_v11  ;;  %v14357_v25 = vrot.slane %v12832_v45, 7  ;;  %v14362_v45 = vld [vmem:[#allocation41_spill] sm:$0xff] }
 0x390   : > { %v7040_v60 = vpack.c.bf16 %v7034_v4, %v7033_v62  ;;  %v14353_v62 = vrot.slane %v13066_v28, 2  ;;  %v7707_v7 = vpack.c.bf16 %v14362_v45, %v14362_v45  ;;  %v10665_v45 = vld [vmem:[#allocation7 + $0x28] sm:$0xff]  }
 0x391   : > { %10190 = vmatmul.mubr.bf16.gmra.mrb[4].mxu1 %v7039_v59  ;;  %v7012_v59 = vsel %vm7009_vm7, %v7005_v56, %v7006_v15  ;;  %v14354_v56 = vld [vmem:[#allocation24_spill] sm:$0xff]  ;;  %v14355_v15 = vrot.slane %v13102_v13, 3  ;;  %v13250_v33 = vsel %vm7498_vm5, %v7494_v35, %v14357_v25  ;;  %v14363_v25 = vld [vmem:[#allocation43_spill] sm:$0xff] }
 0x392   : > { %10210 = vmatpush3.bf16.msra.mxu1 %v10662_v8  ;;  %10193 = vmatprep.mubr.msk.bf16.mxu1 %vm10927_vm0, %v14263_v11  ;;  %v10664_v8 = vld [vmem:[#allocation7 + $0x20] sm:$0xff]   ;;  %v7928_v4 = vsel %vm7927_vm9, %v14353_v62, %v7925_v63  ;;  %v14359_v63 = vrot.slane %v13116_v37, 2  ;;  %v7708_v35 = vpack.c.bf16 %v14363_v25, %v14363_v25  ;;  %v7026_v37 = vld [vmem:[#allocation8 + $0x78] sm:$0xff]  ;;  %v13280_v25 = vmul.f32 %v8736_v47, %v13234_v54 }
 0x393   : > { %10211 = vmatprep.subr.bf16.mxu1 %v14263_v11  ;;  %v7941_v43 = vsel %vm7924_vm8, %v14355_v15, %v14354_v56  ;;  %v13253_v28 = vsel %vm7930_vm10, %v7929_v30, %v7928_v4  ;;  %v14360_v62 = vld [vmem:[#allocation32_spill] sm:$0xff]  ;;  %v14361_v15 = vrot.slane %v13106_v24, 1  ;;  %v14364_v30 = vld [vmem:[#allocation42_spill] sm:$0xff] }
 0x394   : > { %14358 = vst [vmem:[#allocation18_spill] sm:$0xff] %v13253_v28  ;;  %v7943_v13 = vsel %vm7927_vm9, %v14359_v63, %v7941_v43  ;;  %v7701_v56 = vpack.c.bf16 %v14360_v62, %v14360_v62  ;;  %v7709_v4 = vpack.c.bf16 %v14364_v30, %v14364_v30  ;;  %v7036_v43 = vmul.f32 %v7027_v46, %v7011_v44  ;;  %v8737_v63 = vld [vmem:[#allocation8 + $0x268] sm:$0xff] }
 0x395   : > { %v13283_v46 = vmul.f32 %v8737_v63, %v13250_v33  ;;  %v7868_v44 = vunpack.c.l.b16 %v7707_v7  ;;  %v14367_v62 = vrot.slane %v13151_v53, 5 }
 0x396   : > { %10212 = vmatpush3.bf16.msra.mxu1 %v10663_v27  ;;  %v7700_v27 = vpack.c.bf16 %v14356_v17, %v14356_v17  ;;  %v13263_v17 = vsel %vm7930_vm10, %v14361_v15, %v7943_v13  ;;  %v14365_v13 = vrot.slane %v13128_v58, 7  ;;  %v7870_v30 = vunpack.c.l.b16 %v7709_v4 }
 0x397   : > { %10213 = vmatprep.subr.bf16.mxu1 %v14263_v11  ;;  %v14366_v58 = vrot.slane %v13138_v41, 6  ;;  %v14370_v4 = vrot.slane %v13168_v52, 7 }
 0x398   : > { %v7861_v24 = vunpack.c.l.b16 %v7700_v27  ;;  %v7947_v15 = vsel %vm7912_vm1, %v14365_v13, %v13121_v31  ;;  %v7862_v27 = vunpack.c.l.b16 %v7701_v56  ;;  %v7035_v13 = vmul.f32 %v7026_v37, %v7012_v59 }
 0x399   : > { %10194 = vmatmul.mubr.bf16.gmra.mrb[8].mxu1 %v7040_v60  ;;  %v7869_v60 = vunpack.c.l.b16 %v7708_v35  ;;  %v7949_v31 = vsel %vm7915_vm2, %v14366_v58, %v7947_v15  ;;  %v14368_v35 = vld [vmem:[#allocation57_spill] sm:$0xff]  ;;  %v14369_v56 = vrot.slane %v13157_v9, 4  ;;  %v7968_v59 = vrot.slane %v7868_v44, 3  ;;  %v10666_v15 = vld [vmem:[#allocation7 + $0x30] sm:$0xff]  }
 0x39a   : > { %10214 = vmatpush3.bf16.msra.mxu1 %v10664_v8  ;;  %10197 = vmatprep.mubr.msk.bf16.mxu1 %vm10927_vm0, %v14263_v11  ;;  %v7954_v8 = vrot.slane %v13185_v21, 3  ;;  %v7951_v63 = vsel %vm7918_vm3, %v14367_v62, %v7949_v31  ;;  %v7956_v7 = vrot.slane %v7861_v24, 2  ;;  %v7721_v28 = vpack.c.bf16 %v14368_v35, %v14368_v35 }
 0x39b   : > { %10215 = vmatprep.subr.bf16.mxu1 %v14263_v11  ;;  %v7953_v41 = vsel %vm7921_vm4, %v14369_v56, %v7951_v63  ;;  %v7961_v21 = vsel %vm7912_vm1, %v14370_v4, %v13191_v16  ;;  %v7041_v37 = vpack.c.bf16 %v7036_v43, %v7035_v13  ;;  %v14371_v62 = vrot.slane %v13173_v0, 6  ;;  %v14373_v16 = vld [vmem:[#allocation46_spill] sm:$0xff] }
 0x39c   : > { %v7955_v53 = vsel %vm7924_vm8, %v7954_v8, %v7953_v41  ;;  %v7970_v58 = vrot.slane %v7869_v60, 2  ;;  %v7958_v9 = vrot.slane %v7862_v27, 1  ;;  %v14372_v31 = vrot.slane %v13175_v3, 5  ;;  %v7028_v8 = vld [vmem:[#allocation8 + $0x88] sm:$0xff]  ;;  %v14380_v41 = vld [vmem:[#allocation58_spill] sm:$0xff] }
 0x39d   : > { %v7963_v24 = vsel %vm7915_vm2, %v14371_v62, %v7961_v21  ;;  %v7972_v63 = vrot.slane %v7870_v30, 1  ;;  %v14374_v43 = vrot.slane %v13180_v23, 6  ;;  %v14375_v44 = vrot.slane %v13093_v20, 2  ;;  %v10667_v62 = vld [vmem:[#allocation7 + $0x38] sm:$0xff]  }
 0x39e   : > { %10216 = vmatpush3.bf16.msra.mxu1 %v10665_v45  ;;  %v7965_v52 = vsel %vm7918_vm3, %v14372_v31, %v7963_v24  ;;  %v14376_v0 = vrot.slane %v12977_v10, 2  ;;  %v7957_v27 = vsel %vm7927_vm9, %v7956_v7, %v7955_v53  ;;  %v14377_v3 = vrot.slane %v13177_v42, 4  ;;  %v14382_v24 = vld [vmem:[#allocation65_spill] sm:$0xff] }
 0x39f   : > { %10217 = vmatprep.subr.bf16.mxu1 %v14263_v11  ;;  %v7977_v45 = vsel %vm7915_vm2, %v14374_v43, %v14373_v16  ;;  %v14378_v30 = vrot.slane %v13182_v61, 5  ;;  %v14379_v35 = vpack.c.bf16 %v14348_v32, %v14348_v32  ;;  %v7722_v4 = vpack.c.bf16 %v14380_v41, %v14380_v41 }
 0x3a0   : > { %v7010_v60 = vsel %vm7009_vm7, %v14376_v0, %v14375_v44  ;;  %v7967_v13 = vsel %vm7921_vm4, %v14377_v3, %v7965_v52  ;;  %v14381_v7 = vpack.c.bf16 %v14349_v29, %v14349_v29  ;;  %v13344_v61 = vunpack.c.l.b16 %v7721_v28 }
 0x3a1   : > { %v13329_v23 = vsel %vm7918_vm3, %v14378_v30, %v7977_v45  ;;  %v13334_v56 = vunpack.c.l.b16 %v14379_v35  ;;  %10198 = vmatmul.mubr.bf16.gmra.mrb[12].mxu1 %v7041_v37  ;;  %v7969_v42 = vsel %vm7924_vm8, %v7968_v59, %v7967_v13  ;;  %v7727_v53 = vpack.c.bf16 %v12687_v26, %v12687_v26  ;;  %v14386_v45 = vld [vmem:[#allocation64_spill] sm:$0xff] }
 0x3a2   : > { %v13341_v21 = vunpack.c.l.b16 %v14381_v7  ;;  %v7728_v32 = vpack.c.bf16 %v12696_v22, %v12696_v22  ;;  %10218 = vmatpush3.bf16.msra.mxu1 %v10666_v15  ;;  %10201 = vmatprep.mubr.msk.bf16.mxu1 %vm10927_vm0, %v14263_v11  ;;  %v7971_v29 = vsel %vm7927_vm9, %v7970_v58, %v7969_v42  ;;  %v7729_v37 = vpack.c.bf16 %v14382_v24, %v14382_v24  ;;  %v6961_v7 = vld [vmem:[#allocation8] sm:$0xff] }
 0x3a3   : > { %v7037_v31 = vmul.f32 %v7028_v8, %v7010_v60  ;;  %10219 = vmatprep.subr.bf16.mxu1 %v14263_v11  ;;  %v13357_v28 = vsel %vm7930_vm10, %v7958_v9, %v7957_v27  ;;  %v13360_v26 = vsel %vm7930_vm10, %v7972_v63, %v7971_v29  ;;  %v7980_v22 = vrot.slane %v13204_v34, 4  ;;  %v14385_v63 = vld [vmem:[#allocation59_spill] sm:$0xff]  ;;  %v14395_v27 = vld [vmem:[#allocation61_spill] sm:$0xff] }
 0x3a4   : > { %v14383_v59 = vpack.c.bf16 %v14346_v2, %v14346_v2  ;;  %v14215_v58 = vrot.slane %v13093_v20, 1  ;;  %v14384_v16 = vpack.c.bf16 %v14347_v5, %v14347_v5  ;;  %v13376_v43 = vunpack.c.l.b16 %v7722_v4 }
 0x3a5   : > { %v7723_v34 = vpack.c.bf16 %v14385_v63, %v14385_v63  ;;  %v7726_v2 = vpack.c.bf16 %v14386_v45, %v14386_v45  ;;  %v7988_v44 = vrot.slane %v13334_v56, 7  ;;  %v13383_v0 = vunpack.c.l.b16 %v7727_v53 }
 0x3a6   : > { %v13366_v15 = vunpack.c.l.b16 %v14383_v59  ;;  %v13374_v9 = vunpack.c.l.b16 %v14384_v16  ;;  %v13385_v60 = vunpack.c.l.b16 %v7728_v32  ;;  %v7730_v8 = vpack.c.bf16 %v12723_v39, %v12723_v39  ;;  %10220 = vmatpush3.bf16.msra.mxu1 %v10667_v62 }
 0x3a7   : > { %v7990_v5 = vrot.slane %v13341_v21, 6  ;;  %v13391_v3 = vunpack.c.l.b16 %v7729_v37  ;;  %v7042_v13 = vpack.c.bf16 %v7037_v31, %v7037_v31  ;;  %10241 = vmatprep.subr.bf16.mxu1 %v14263_v11  ;;  %v7736_v30 = vpack.c.bf16 %v12830_v6, %v12830_v6  ;;  %v6962_v37 = vld [vmem:[#allocation8 + $0x8] sm:$0xff]  ;;  %v6963_v31 = vld [vmem:[#allocation8 + $0x10] sm:$0xff] }
 0x3a8   : > { %v7737_v35 = vpack.c.bf16 %v12835_v19, %v12835_v19  ;;  %v7738_v41 = vpack.c.bf16 %v12932_v57, %v12932_v57  ;;  %v14387_v39 = vrot.slane %v14324_v49, 1  ;;  %v13409_v53 = vunpack.c.l.b16 %v7723_v34  ;;  %v14388_v19 = vld [vmem:[#allocation50_spill] sm:$0xff] }
 0x3a9   : > { %v13411_v6 = vunpack.c.l.b16 %v7726_v2  ;;  %10202 = vmatmul.mubr.bf16.gmra.mrb[16].mxu1 %v7042_v13  ;;  %v7715_v32 = vpack.c.bf16 %v14388_v19, %v14388_v19  ;;  %v13417_v29 = vunpack.c.l.b16 %v7730_v8  ;;  %v7743_v24 = vpack.c.bf16 %v12965_v18, %v12965_v18  ;;  %v14389_v19 = vld [vmem:[#allocation51_spill] sm:$0xff] }
 0x3aa   : > { %v13406_v4 = vsel %vm6951_vm6, %v14215_v58, %v14387_v39  ;;  %10221 = vmatprep.mubr.msk.bf16.mxu1 %vm10927_vm0, %v14263_v11  ;;  %v7744_v59 = vpack.c.bf16 %v13028_v50, %v13028_v50  ;;  %v13427_v34 = vunpack.c.l.b16 %v7736_v30  ;;  %v13429_v45 = vunpack.c.l.b16 %v7737_v35  ;;  %v14391_v58 = vld [vmem:[#allocation55_spill] sm:$0xff] }
 0x3ab   : > { %v6970_v16 = vmul.f32 %v6961_v7, %v13406_v4  ;;  %v7876_v63 = vunpack.c.l.b16 %v7715_v32  ;;  %v13431_v2 = vunpack.c.l.b16 %v7738_v41  ;;  %v6943_v18 = vrot.slane %v12256_v14, 1  ;;  %v10668_v32 = vld [vmem:[#allocation7 + $0x80] sm:$0xff]  }
 0x3ac   : > { %v6971_v13 = vmul.f32 %v6962_v37, %v13074_v12  ;;  %v7717_v47 = vpack.c.bf16 %v14389_v19, %v14389_v19  ;;  %v7981_v50 = vsel %vm7921_vm4, %v7980_v22, %v13329_v23  ;;  %v7740_v30 = vpack.c.bf16 %v12935_v1, %v12935_v1 }
 0x3ad   : > { %v7982_v7 = vrot.slane %v7876_v63, 3  ;;  %v7742_v35 = vpack.c.bf16 %v12959_v36, %v12959_v36  ;;  %v13445_v41 = vunpack.c.l.b16 %v7743_v24  ;;  %v14216_v52 = vrot.slane %v12601_v48, 1 }
 0x3ae   : > { %v13450_v37 = vunpack.c.l.b16 %v7744_v59  ;;  %v7984_v22 = vrot.slane %v13374_v9, 2  ;;  %v7745_v1 = vpack.c.bf16 %v13032_v38, %v13032_v38  ;;  %v7746_v36 = vpack.c.bf16 %v13041_v55, %v13041_v55  ;;  %v6964_v59 = vld [vmem:[#allocation8 + $0x18] sm:$0xff] }
 0x3af   : > { %v7983_v23 = vsel %vm7924_vm8, %v7982_v7, %v7981_v50  ;;  %v14390_v24 = vrot.slane %v12002_v51, 1  ;;  %v7878_v9 = vunpack.c.l.b16 %v7717_v47  ;;  %v6966_v47 = vld [vmem:[#allocation8 + $0x28] sm:$0xff]  ;;  %v14393_v50 = vld [vmem:[#allocation16_spill] sm:$0xff]  ;;  %v14397_v56 = vrot.slane %v13344_v61, 5  ;;  %v10671_v61 = vld [vmem:[#allocation7 + $0x98] sm:$0xff]  }
 0x3b0   : > { %v7985_v38 = vsel %vm7927_vm9, %v7984_v22, %v7983_v23  ;;  %v13480_v23 = vunpack.c.l.b16 %v7742_v35  ;;  %v13486_v55 = vunpack.c.l.b16 %v7745_v1  ;;  %v14392_v7 = vld [vmem:[#allocation73_spill] sm:$0xff]  ;;  %v6965_v35 = vld [vmem:[#allocation8 + $0x20] sm:$0xff]  ;;  %v6972_v22 = vmul.f32 %v6963_v31, %v14393_v50  ;;  %v10670_v1 = vld [vmem:[#allocation7 + $0x90] sm:$0xff]  }
 0x3b1   : > { %v13434_v8 = vpop.f32.mrb[168].mxu0  ;;  %v13462_v63 = vsel %vm6951_vm6, %v14390_v24, %v6943_v18  ;;  %v10669_v24 = vld [vmem:[#allocation7 + $0x88] sm:$0xff]   ;;  %v7747_v62 = vpack.c.bf16 %v14392_v7, %v14392_v7  ;;  %v7986_v42 = vrot.slane %v7878_v9, 1  ;;  %v7725_v7 = vpack.c.bf16 %v14395_v27, %v14395_v27  ;;  %v14396_v9 = vld [vmem:[#allocation67_spill] sm:$0xff] }
 0x3b2   : > { %v10479_v39 = vpop.f32.mrb[169].mxu0  ;;  %v7996_v31 = vrot.slane %v13409_v53, 3  ;;  %v14398_v53 = vrot.slane %v12977_v10, 1 }
 0x3b3   : > { %v13448_v12 = vpop.f32.mrb[170].mxu0  ;;  %v6979_v39 = vpack.c.bf16 %v6971_v13, %v6970_v16  ;;  %v6944_v16 = vrot.slane %v14391_v58, 1  ;;  %v13488_v13 = vunpack.c.l.b16 %v7746_v36  ;;  %v7886_v57 = vunpack.c.l.b16 %v7725_v7 }
 0x3b4   : > { %v10480_v19 = vpop.f32.mrb[171].mxu0  ;;  %v13526_v21 = vsel %vm7930_vm10, %v7986_v42, %v7985_v38  ;;  %v14401_v42 = vld [vmem:[#allocation47_spill] sm:$0xff] }
 0x3b5   : > { %10222 = vmatmul.mubr.bf16.vlgmr.msra.gmra.mrb[20].mxu1 %v6979_v39  ;;  %v13470_v19 = vunpack.c.l.b16 %v7740_v30  ;;  %v13478_v39 = vsel %vm6951_vm6, %v6944_v16, %v14216_v52  ;;  %v13494_v52 = vsel %vm6951_vm6, %v6943_v18, %v6944_v16  ;;  %v7989_v18 = vsel %vm7912_vm1, %v7988_v44, %v13366_v15 }
 0x3b6   : > { %10242 = vmatpush3.bf16.msra.mxu1 %v10668_v32  ;;  %10225 = vmatprep.mubr.msk.bf16.mxu1 %vm10927_vm0, %v14263_v11  ;;  %v6973_v32 = vmul.f32 %v6964_v59, %v13462_v63  ;;  %v6975_v30 = vmul.f32 %v6966_v47, %v13478_v39  ;;  %v14394_v59 = vld [vmem:[#allocation60_spill] sm:$0xff]  ;;  %v6974_v50 = vmul.f32 %v6965_v35, %v13494_v52  ;;  %v8000_v35 = vrot.slane %v7886_v57, 1 }
 0x3b7   : > { %10243 = vmatprep.subr.bf16.mxu1 %v14263_v11  ;;  %v7724_v36 = vpack.c.bf16 %v14394_v59, %v14394_v59  ;;  %v7991_v47 = vsel %vm7915_vm2, %v7990_v5, %v7989_v18  ;;  %v13514_v59 = vunpack.c.l.b16 %v7747_v62  ;;  %v14399_v5 = vrot.slane %v13376_v43, 4  ;;  %v14402_v43 = vld [vmem:[#allocation48_spill] sm:$0xff] }
 0x3b8   : > { %v6980_v16 = vpack.c.bf16 %v6973_v32, %v6972_v22  ;;  %v7993_v15 = vsel %vm7918_vm3, %v14397_v56, %v7991_v47  ;;  %v6981_v44 = vpack.c.bf16 %v6975_v30, %v6974_v50  ;;  %v7732_v38 = vpack.c.bf16 %v14401_v42, %v14401_v42  ;;  %v14404_v50 = vld [vmem:[#allocation72_spill] sm:$0xff] }
 0x3b9   : > { %v7885_v27 = vunpack.c.l.b16 %v7724_v36  ;;  %v7995_v62 = vsel %vm7921_vm4, %v14399_v5, %v7993_v15  ;;  %v14400_v36 = vld [vmem:[#allocation66_spill] sm:$0xff]  ;;  %v7733_v18 = vpack.c.bf16 %v14402_v43, %v14402_v43  ;;  %v7741_v47 = vpack.c.bf16 %v14404_v50, %v14404_v50  ;;  %v14406_v15 = vld [vmem:[#allocation68_spill] sm:$0xff]  ;;  %v6968_v50 = vld [vmem:[#allocation8 + $0x38] sm:$0xff] }
 0x3ba   : > { %10244 = vmatpush3.bf16.msra.mxu1 %v10669_v24  ;;  %v6946_v24 = vrot.slane %v14396_v9, 1  ;;  %v7997_v30 = vsel %vm7924_vm8, %v7996_v31, %v7995_v62  ;;  %v7731_v7 = vpack.c.bf16 %v14400_v36, %v14400_v36  ;;  %v7893_v36 = vunpack.c.l.b16 %v7732_v38 }
 0x3bb   : > { %10245 = vmatprep.subr.bf16.mxu1 %v14263_v11  ;;  %v7998_v32 = vrot.slane %v7885_v27, 2  ;;  %v14405_v27 = vrot.slane %v13383_v0, 7  ;;  %v7894_v42 = vunpack.c.l.b16 %v7733_v18  ;;  %v14408_v0 = vrot.slane %v13385_v60, 6 }
 0x3bc   : > { %v13523_v22 = vsel %vm6951_vm6, %v6946_v24, %v14398_v53  ;;  %v7892_v57 = vunpack.c.l.b16 %v7731_v7  ;;  %v14407_v53 = vrot.slane %v13427_v34, 6  ;;  %v8187_v34 = vld [vmem:[#allocation8 + $0x180] sm:$0xff]  ;;  %v8012_v18 = vrot.slane %v7893_v36, 2 }
 0x3bd   : > { %10226 = vmatmul.mubr.bf16.gmra.mrb[24].mxu1 %v6980_v16  ;;  %v7999_v31 = vsel %vm7927_vm9, %v7998_v32, %v7997_v30  ;;  %v8003_v56 = vsel %vm7912_vm1, %v14405_v27, %v13411_v6  ;;  %v7902_v32 = vunpack.c.l.b16 %v7741_v47  ;;  %v14411_v47 = vrot.slane %v13417_v29, 4 }
 0x3be   : > { %10246 = vmatpush3.bf16.msra.mxu1 %v10670_v1  ;;  %10229 = vmatprep.mubr.msk.bf16.mxu1 %vm10927_vm0, %v14263_v11  ;;  %v14403_v1 = vld [vmem:[#allocation71_spill] sm:$0xff]  ;;  %v8019_v5 = vsel %vm7915_vm2, %v14407_v53, %v14406_v15  ;;  %v13555_v62 = vsel %vm7930_vm10, %v8000_v35, %v7999_v31  ;;  %v8005_v6 = vsel %vm7915_vm2, %v14408_v0, %v8003_v56  ;;  %v8010_v7 = vrot.slane %v7892_v57, 3 }
 0x3bf   : > { %10247 = vmatprep.subr.bf16.mxu1 %v14263_v11  ;;  %v7739_v16 = vpack.c.bf16 %v14403_v1, %v14403_v1  ;;  %v10672_v1 = vld [vmem:[#allocation7 + $0xa0] sm:$0xff]   ;;  %v8046_v30 = vpack.c.b16 %v13555_v62, %v13526_v21  ;;  %v14409_v35 = vrot.slane %v13391_v3, 5  ;;  %v14412_v57 = vrot.slane %v13431_v2, 4  ;;  %v8186_v3 = vld [vmem:[#allocation8 + $0x178] sm:$0xff]  ;;  %v6967_v2 = vld [vmem:[#allocation8 + $0x30] sm:$0xff] }
 0x3c0   : > { %v8026_v15 = vrot.slane %v13470_v19, 2  ;;  %v8034_v53 = vrot.slane %v13486_v55, 5  ;;  %v14413_v36 = vrot.slane %v12601_v48, 1  ;;  %v6977_v19 = vmul.f32 %v6968_v50, %v13523_v22  ;;  %v10673_v55 = vld [vmem:[#allocation7 + $0xa8] sm:$0xff]   ;;  %v10699_v62 = vld [vmem:[#allocation7 + $0x178] sm:$0xff]  }
 0x3c1   : > { %v7900_v43 = vunpack.c.l.b16 %v7739_v16  ;;  %v8007_v38 = vsel %vm7918_vm3, %v14409_v35, %v8005_v6  ;;  %v14410_v16 = vrot.slane %v13429_v45, 5  ;;  %v8036_v0 = vrot.slane %v13488_v13, 4 }
 0x3c2   : > { %10248 = vmatpush3.bf16.msra.mxu1 %v10671_v61  ;;  %v8014_v61 = vrot.slane %v7894_v42, 1  ;;  %v8009_v60 = vsel %vm7921_vm4, %v14411_v47, %v8007_v38  ;;  %v13581_v45 = vsel %vm6951_vm6, %v14413_v36, %v6946_v24  ;;  %v13600_v6 = vmul.f32 %v8186_v3, %v13462_v63  ;;  %v10674_v38 = vld [vmem:[#allocation7 + $0xb0] sm:$0xff]   ;;  %v6969_v47 = vld [vmem:[#allocation8 + $0x40] sm:$0xff] }
 0x3c3   : > { %10249 = vmatprep.subr.bf16.mxu1 %v14263_v11  ;;  %v8021_v31 = vsel %vm7918_vm3, %v14410_v16, %v8019_v5  ;;  %v8024_v56 = vrot.slane %v7900_v43, 3  ;;  %v8011_v29 = vsel %vm7924_vm8, %v8010_v7, %v8009_v60  ;;  %v13585_v5 = vmul.f32 %v8187_v34, %v13494_v52  ;;  %v10675_v60 = vld [vmem:[#allocation7 + $0xb8] sm:$0xff]  }
 0x3c4   : > { %v8023_v27 = vsel %vm7921_vm4, %v14412_v57, %v8021_v31  ;;  %v8028_v43 = vrot.slane %v7902_v32, 1  ;;  %v14414_v52 = vrot.slane %v13445_v41, 7  ;;  %v14415_v32 = vrot.slane %v13450_v37, 6 }
 0x3c5   : > { %10230 = vmatmul.mubr.bf16.gmra.mrb[28].mxu1 %v6981_v44  ;;  %v8013_v44 = vsel %vm7927_vm9, %v8012_v18, %v8011_v29  ;;  %v8025_v42 = vsel %vm7924_vm8, %v8024_v56, %v8023_v27  ;;  %v8038_v35 = vrot.slane %v13514_v59, 3  ;;  %v6976_v41 = vmul.f32 %v6967_v2, %v13581_v45  ;;  %v7320_v29 = vld [vmem:[#allocation8 + $0x90] sm:$0xff] }
 0x3c6   : > { %10250 = vmatpush3.bf16.msra.mxu1 %v10672_v1  ;;  %10233 = vmatprep.mubr.msk.bf16.mxu1 %vm10927_vm0, %v14263_v11  ;;  %v8027_v24 = vsel %vm7927_vm9, %v8026_v15, %v8025_v42  ;;  %v8031_v1 = vsel %vm7912_vm1, %v14414_v52, %v13480_v23  ;;  %v13603_v7 = vsel %vm7930_vm10, %v8014_v61, %v8013_v44  ;;  %v14416_v59 = vrot.slane %v13093_v20, 1  ;;  %v14418_v15 = vld [vmem:[#allocation26_spill] sm:$0xff] }
 0x3c7   : > { %10251 = vmatprep.subr.bf16.mxu1 %v14263_v11  ;;  %v13606_v34 = vsel %vm7930_vm10, %v8028_v43, %v8027_v24  ;;  %v8033_v50 = vsel %vm7915_vm2, %v14415_v32, %v8031_v1  ;;  %v8203_v23 = vpack.c.bf16 %v13585_v5, %v13600_v6  ;;  %v6982_v61 = vpack.c.bf16 %v6977_v19, %v6976_v41  ;;  %v7321_v19 = vld [vmem:[#allocation8 + $0x98] sm:$0xff]  ;;  %v10676_v43 = vld [vmem:[#allocation7 + $0xc0] sm:$0xff]   ;;  %v10677_v32 = vld [vmem:[#allocation7 + $0xc8] sm:$0xff]  }
 0x3c8   : > { %v8047_v13 = vpack.c.b16 %v13606_v34, %v13603_v7  ;;  %v8035_v63 = vsel %vm7918_vm3, %v8034_v53, %v8033_v50  ;;  %v14417_v16 = vrot.slane %v12977_v10, 1  ;;  %v7308_v27 = vrot.slane %v13093_v20, 3  ;;  %v10700_v7 = vld [vmem:[#allocation7 + $0x180] sm:$0xff]  }
 0x3c9   : > { %v8037_v18 = vsel %vm7921_vm4, %v8036_v0, %v8035_v63  ;;  %v7300_v56 = vrot.slane %v14324_v49, 3  ;;  %v7301_v3 = vrot.slane %v14418_v15, 3  ;;  %v7303_v44 = vrot.slane %v12256_v14, 3  ;;  %v7323_v0 = vld [vmem:[#allocation8 + $0xa8] sm:$0xff]  ;;  %v14430_v34 = vld [vmem:[#allocation20_spill] sm:$0xff] }
 0x3ca   : > { %10252 = vmatpush3.bf16.msra.mxu1 %v10673_v55  ;;  %v13621_v37 = vsel %vm7924_vm8, %v8038_v35, %v8037_v18  ;;  %v13629_v31 = vsel %vm6951_vm6, %v14417_v16, %v14416_v59  ;;  %v7302_v24 = vrot.slane %v12002_v51, 3  ;;  %v7322_v35 = vld [vmem:[#allocation8 + $0xa0] sm:$0xff]  ;;  %v7305_v63 = vrot.slane %v12601_v48, 3  ;;  %v10678_v18 = vld [vmem:[#allocation7 + $0xd0] sm:$0xff]  }
 0x3cb   : > { %10253 = vmatprep.subr.bf16.mxu1 %v14263_v11  ;;  %v6978_v57 = vmul.f32 %v6969_v47, %v13629_v31  ;;  %v7318_v36 = vsel %vm7309_vm11, %v7308_v27, %v7300_v56  ;;  %v7317_v2 = vsel %vm7309_vm11, %v7300_v56, %v7301_v3  ;;  %v7325_v47 = vld [vmem:[#allocation8 + $0xb8] sm:$0xff]  ;;  %v7324_v56 = vld [vmem:[#allocation8 + $0xb0] sm:$0xff]  ;;  %v10704_v5 = vld [vmem:[#allocation7 + $0x1a0] sm:$0xff]  }
 0x3cc   : > { %v7329_v55 = vmul.f32 %v7320_v29, %v7318_v36  ;;  %v7330_v42 = vmul.f32 %v7321_v19, %v7317_v2  ;;  %v7315_v1 = vsel %vm7309_vm11, %v7302_v24, %v7303_v44  ;;  %v7316_v50 = vsel %vm7309_vm11, %v7301_v3, %v7302_v24  ;;  %v10680_v29 = vld [vmem:[#allocation7 + $0xe0] sm:$0xff]   ;;  %v10681_v24 = vld [vmem:[#allocation7 + $0xe8] sm:$0xff]  }
 0x3cd   : > { %10234 = vmatmul.mubr.bf16.gmra.mrb[32].mxu1 %v6982_v61  ;;  %v6983_v53 = vpack.c.bf16 %v6978_v57, %v6978_v57  ;;  %v7332_v41 = vmul.f32 %v7323_v0, %v7315_v1  ;;  %v7304_v61 = vrot.slane %v14391_v58, 3  ;;  %v7306_v2 = vrot.slane %v14396_v9, 3  ;;  %v10682_v0 = vld [vmem:[#allocation7 + $0xf0] sm:$0xff]  }
 0x3ce   : > { %10254 = vmatpush3.bf16.msra.mxu1 %v10674_v38  ;;  %10237 = vmatprep.mubr.msk.bf16.mxu1 %vm10927_vm0, %v14263_v11  ;;  %v7338_v52 = vpack.c.bf16 %v7330_v42, %v7329_v55  ;;  %v7331_v38 = vmul.f32 %v7322_v35, %v7316_v50  ;;  %v7327_v42 = vld [vmem:[#allocation8 + $0xc8] sm:$0xff]  ;;  %v7328_v35 = vld [vmem:[#allocation8 + $0xd0] sm:$0xff] }
 0x3cf   : > { %10255 = vmatprep.subr.bf16.mxu1 %v14263_v11  ;;  %v7313_v16 = vsel %vm7309_vm11, %v7304_v61, %v7305_v63  ;;  %v7314_v57 = vsel %vm7309_vm11, %v7303_v44, %v7304_v61  ;;  %v7312_v44 = vsel %vm7309_vm11, %v7305_v63, %v7306_v2  ;;  %v14419_v61 = vrot.slane %v14324_v49, 7 }
 0x3d0   : > { %v7339_v59 = vpack.c.bf16 %v7332_v41, %v7331_v38  ;;  %v7334_v3 = vmul.f32 %v7325_v47, %v7313_v16  ;;  %v7333_v36 = vmul.f32 %v7324_v56, %v7314_v57  ;;  %v10683_v41 = vld [vmem:[#allocation7 + $0xf8] sm:$0xff]   ;;  %v7497_v38 = vrot.slane %v13093_v20, 7  ;;  %v7510_v16 = vld [vmem:[#allocation8 + $0xe0] sm:$0xff] }
 0x3d1   : > { %v10684_v56 = vld [vmem:[#allocation7 + $0x100] sm:$0xff]  }
 0x3d2   : > { %10256 = vmatpush3.bf16.msra.mxu1 %v10675_v60  ;;  %v10679_v60 = vld [vmem:[#allocation7 + $0xd8] sm:$0xff]   ;;  %v7340_v19 = vpack.c.bf16 %v7334_v3, %v7333_v36  ;;  %v10685_v36 = vld [vmem:[#allocation7 + $0x108] sm:$0xff]  }
 0x3d3   : > { %10277 = vmatprep.subr.bf16.mxu1 %v14263_v11 }
 0x3d5   : > { %10238 = vmatmul.mubr.bf16.gmra.mrb[36].mxu1 %v6983_v53  ;;  %v7307_v53 = vrot.slane %v12977_v10, 3 }
 0x3d6   : > { %10257 = vmatprep.mubr.msk.bf16.mxu1 %vm10927_vm0, %v14263_v11 }
 0x3d7   : > { %v7311_v55 = vsel %vm7309_vm11, %v7306_v2, %v7307_v53  ;;  %v7310_v50 = vsel %vm7309_vm11, %v7307_v53, %v7308_v27  ;;  %v13691_v27 = vsel %vm7498_vm5, %v7497_v38, %v14419_v61  ;;  %v7512_v53 = vld [vmem:[#allocation8 + $0xf0] sm:$0xff] }
 0x3d8   : > { %v7337_v63 = vmul.f32 %v7328_v35, %v7310_v50  ;;  %v14421_v2 = vld [vmem:[#allocation62_spill] sm:$0xff]  ;;  %v14423_v50 = vld [vmem:[#allocation63_spill] sm:$0xff] }
 0x3dd   : > { %10258 = vmatmul.mubr.bf16.vlgmr.msra.gmra.mrb[40].mxu1 %v7338_v52  ;;  %v7336_v52 = vmul.f32 %v7327_v42, %v7311_v55  ;;  %v14422_v55 = vld [vmem:[#allocation39_spill] sm:$0xff] }
 0x3de   : > { %10278 = vmatpush3.bf16.msra.mxu1 %v10676_v43  ;;  %10261 = vmatprep.mubr.msk.bf16.mxu1 %vm10927_vm0, %v14263_v11  ;;  %v7326_v43 = vld [vmem:[#allocation8 + $0xc0] sm:$0xff] }
 0x3df   : > { %10279 = vmatprep.subr.bf16.mxu1 %v14263_v11  ;;  %v7335_v1 = vmul.f32 %v7326_v43, %v7312_v44  ;;  %v10686_v44 = vld [vmem:[#allocation7 + $0x110] sm:$0xff]  }
 0x3e2   : > { %10280 = vmatpush3.bf16.msra.mxu1 %v10677_v32  ;;  %v7341_v32 = vpack.c.bf16 %v7336_v52, %v7335_v1  ;;  %v10687_v52 = vld [vmem:[#allocation7 + $0x118] sm:$0xff]  }
 0x3e3   : > { %10281 = vmatprep.subr.bf16.mxu1 %v14263_v11  ;;  %v7513_v1 = vld [vmem:[#allocation8 + $0xf8] sm:$0xff] }
 0x3e4   : > { %v7522_v35 = vmul.f32 %v7513_v1, %v14423_v50  ;;  %v14429_v1 = vld [vmem:[#allocation74_spill] sm:$0xff] }
 0x3e5   : > { %10262 = vmatmul.mubr.bf16.gmra.mrb[44].mxu1 %v7339_v59  ;;  %v7509_v59 = vld [vmem:[#allocation8 + $0xd8] sm:$0xff] }
 0x3e6   : > { %10282 = vmatpush3.bf16.msra.mxu1 %v10678_v18  ;;  %10265 = vmatprep.mubr.msk.bf16.mxu1 %vm10927_vm0, %v14263_v11  ;;  %v7342_v18 = vpack.c.bf16 %v7337_v63, %v7337_v63  ;;  %v7518_v47 = vmul.f32 %v7509_v59, %v13691_v27  ;;  %v7516_v59 = vld [vmem:[#allocation8 + $0x110] sm:$0xff] }
 0x3e7   : > { %10283 = vmatprep.subr.bf16.mxu1 %v14263_v11 }
 0x3ea   : > { %10284 = vmatpush3.bf16.msra.mxu1 %v10679_v60  ;;  %v14420_v60 = vld [vmem:[#allocation40_spill] sm:$0xff] }
 0x3eb   : > { %10285 = vmatprep.subr.bf16.mxu1 %v14263_v11  ;;  %v7519_v57 = vmul.f32 %v7510_v16, %v14420_v60  ;;  %v10689_v16 = vld [vmem:[#allocation7 + $0x128] sm:$0xff]  }
 0x3ed   : > { %10266 = vmatmul.mubr.bf16.gmra.mrb[48].mxu1 %v7340_v19  ;;  %v7527_v3 = vpack.c.bf16 %v7519_v57, %v7518_v47  ;;  %v7521_v19 = vmul.f32 %v7512_v53, %v14421_v2  ;;  %v10690_v57 = vld [vmem:[#allocation7 + $0x130] sm:$0xff]   ;;  %v7517_v53 = vld [vmem:[#allocation8 + $0x118] sm:$0xff] }
 0x3ee   : > { %10286 = vmatpush3.bf16.msra.mxu1 %v10680_v29  ;;  %10269 = vmatprep.mubr.msk.bf16.mxu1 %vm10927_vm0, %v14263_v11  ;;  %v7511_v29 = vld [vmem:[#allocation8 + $0xe8] sm:$0xff]  ;;  %v14425_v2 = vld [vmem:[#allocation18_spill] sm:$0xff] }
 0x3ef   : > { %10287 = vmatprep.subr.bf16.mxu1 %v14263_v11  ;;  %v7520_v42 = vmul.f32 %v7511_v29, %v14422_v55  ;;  %v10693_v55 = vld [vmem:[#allocation7 + $0x148] sm:$0xff]  }
 0x3f1   : > { %v7528_v43 = vpack.c.bf16 %v7521_v19, %v7520_v42  ;;  %v14426_v19 = vpack.c.b16 %v13263_v17, %v14425_v2  ;;  %v10694_v42 = vld [vmem:[#allocation7 + $0x150] sm:$0xff]   ;;  %v10695_v17 = vld [vmem:[#allocation7 + $0x158] sm:$0xff]  }
 0x3f2   : > { %10288 = vmatpush3.bf16.msra.mxu1 %v10681_v24  ;;  %v7514_v24 = vld [vmem:[#allocation8 + $0x100] sm:$0xff] }
 0x3f3   : > { %10289 = vmatprep.subr.bf16.mxu1 %v14263_v11 }
 0x3f5   : > { %10270 = vmatmul.mubr.bf16.gmra.mrb[52].mxu1 %v7341_v32  ;;  %v7496_v32 = vrot.slane %v12977_v10, 7 }
 0x3f6   : > { %10290 = vmatpush3.bf16.msra.mxu1 %v10682_v0  ;;  %10273 = vmatprep.mubr.msk.bf16.mxu1 %vm10927_vm0, %v14263_v11  ;;  %v7523_v0 = vmul.f32 %v7514_v24, %v13234_v54  ;;  %v7515_v54 = vld [vmem:[#allocation8 + $0x108] sm:$0xff] }
 0x3f7   : > { %10291 = vmatprep.subr.bf16.mxu1 %v14263_v11  ;;  %v7524_v60 = vmul.f32 %v7515_v54, %v13250_v33  ;;  %v8189_v54 = vld [vmem:[#allocation8 + $0x190] sm:$0xff] }
 0x3f8   : > { %v7529_v63 = vpack.c.bf16 %v7523_v0, %v7522_v35  ;;  %v7749_v0 = vpack.c.bf16 %v14429_v1, %v14429_v1  ;;  %v10698_v35 = vld [vmem:[#allocation7 + $0x170] sm:$0xff]  }
 0x3fa   : > { %10292 = vmatpush3.bf16.msra.mxu1 %v10683_v41  ;;  %v10688_v41 = vld [vmem:[#allocation7 + $0x120] sm:$0xff]  }
 0x3fb   : > { %10313 = vmatprep.subr.bf16.mxu1 %v14263_v11 }
 0x3fd   : > { %10274 = vmatmul.mubr.bf16.gmra.mrb[56].mxu1 %v7342_v18  ;;  %v14424_v18 = vrot.slane %v14396_v9, 7 }
 0x3fe   : > { %10293 = vmatprep.mubr.msk.bf16.mxu1 %vm10927_vm0, %v14263_v11 }
 0x3ff   : > { %v13714_v61 = vsel %vm7498_vm5, %v14424_v18, %v7496_v32  ;;  %v10701_v18 = vld [vmem:[#allocation7 + $0x188] sm:$0xff]  }
 0x400   : > { %v7525_v47 = vmul.f32 %v7516_v59, %v13714_v61  ;;  %v10702_v59 = vld [vmem:[#allocation7 + $0x190] sm:$0xff]  }
 0x405   : > { %10294 = vmatmul.mubr.bf16.vlgmr.msra.gmra.mrb[60].mxu1 %v7527_v3  ;;  %v13724_v3 = vsel %vm7498_vm5, %v7496_v32, %v7497_v38  ;;  %v10692_v38 = vld [vmem:[#allocation7 + $0x140] sm:$0xff]   ;;  %v7910_v32 = vunpack.c.l.b16 %v7749_v0 }
 0x406   : > { %10314 = vmatpush3.bf16.msra.mxu1 %v10684_v56  ;;  %10297 = vmatprep.mubr.msk.bf16.mxu1 %vm10927_vm0, %v14263_v11  ;;  %v7530_v56 = vpack.c.bf16 %v7525_v47, %v7524_v60  ;;  %v7526_v29 = vmul.f32 %v7517_v53, %v13724_v3  ;;  %v8188_v47 = vld [vmem:[#allocation8 + $0x188] sm:$0xff]  ;;  %v8198_v60 = vmul.f32 %v8189_v54, %v13581_v45  ;;  %v8190_v45 = vld [vmem:[#allocation8 + $0x198] sm:$0xff] }
 0x407   : > { %10315 = vmatprep.subr.bf16.mxu1 %v14263_v11  ;;  %v8197_v53 = vmul.f32 %v8188_v47, %v13478_v39  ;;  %v8376_v47 = vld [vmem:[#allocation8 + $0x1c8] sm:$0xff] }
 0x408   : > { %v7531_v33 = vpack.c.bf16 %v7526_v29, %v7526_v29  ;;  %v8191_v29 = vld [vmem:[#allocation8 + $0x1a0] sm:$0xff] }
 0x40a   : > { %10316 = vmatpush3.bf16.msra.mxu1 %v10685_v36  ;;  %v10691_v36 = vld [vmem:[#allocation7 + $0x138] sm:$0xff]  }
 0x40b   : > { %10317 = vmatprep.subr.bf16.mxu1 %v14263_v11 }
 0x40d   : > { %10298 = vmatmul.mubr.bf16.gmra.mrb[64].mxu1 %v7528_v43  ;;  %v14428_v43 = vld [vmem:[#allocation75_spill] sm:$0xff] }
 0x40e   : > { %10318 = vmatpush3.bf16.msra.mxu1 %v10686_v44  ;;  %10301 = vmatprep.mubr.msk.bf16.mxu1 %vm10927_vm0, %v14263_v11  ;;  %v14427_v44 = vpack.c.b16 %v13360_v26, %v13357_v28  ;;  %v7748_v24 = vpack.c.bf16 %v14428_v43, %v14428_v43  ;;  %v10697_v26 = vld [vmem:[#allocation7 + $0x168] sm:$0xff]  }
 0x40f   : > { %10319 = vmatprep.subr.bf16.mxu1 %v14263_v11  ;;  %v8192_v43 = vld [vmem:[#allocation8 + $0x1a8] sm:$0xff] }
 0x410   : > { %v7909_v28 = vunpack.c.l.b16 %v7748_v24  ;;  %v8201_v24 = vmul.f32 %v8192_v43, %v13406_v4  ;;  %v8353_v4 = vrot.slane %v14324_v49, 5  ;;  %v10711_v43 = vld [vmem:[#allocation7 + $0x1d8] sm:$0xff]  }
 0x412   : > { %10320 = vmatpush3.bf16.msra.mxu1 %v10687_v52  ;;  %v10696_v52 = vld [vmem:[#allocation7 + $0x160] sm:$0xff]   ;;  %v8040_v50 = vrot.slane %v7909_v28, 2  ;;  %v8354_v28 = vrot.slane %v14418_v15, 5 }
 0x413   : > { %10321 = vmatprep.subr.bf16.mxu1 %v14263_v11 }
 0x414   : > { %v8041_v21 = vsel %vm7927_vm9, %v8040_v50, %v13621_v37 }
 0x415   : > { %10302 = vmatmul.mubr.bf16.gmra.mrb[68].mxu1 %v7529_v63 }
 0x416   : > { %10322 = vmatpush3.bf16.msra.mxu1 %v10688_v41  ;;  %10305 = vmatprep.mubr.msk.bf16.mxu1 %vm10927_vm0, %v14263_v11  ;;  %v8042_v41 = vrot.slane %v7910_v32, 1  ;;  %v8206_v32 = vpack.c.bf16 %v8201_v24, %v8201_v24  ;;  %v8377_v24 = vld [vmem:[#allocation8 + $0x1d0] sm:$0xff] }
 0x417   : > { %10323 = vmatprep.subr.bf16.mxu1 %v14263_v11 }
 0x41a   : > { %10324 = vmatpush3.bf16.msra.mxu1 %v10689_v16  ;;  %v10703_v16 = vld [vmem:[#allocation7 + $0x198] sm:$0xff]  }
 0x41b   : > { %10325 = vmatprep.subr.bf16.mxu1 %v14263_v11 }
 0x41d   : > { %10306 = vmatmul.mubr.bf16.gmra.mrb[72].mxu1 %v7530_v56 }
 0x41e   : > { %10326 = vmatpush3.bf16.msra.mxu1 %v10690_v57  ;;  %10309 = vmatprep.mubr.msk.bf16.mxu1 %vm10927_vm0, %v14263_v11 }
 0x41f   : > { %10327 = vmatprep.subr.bf16.mxu1 %v14263_v11 }
 0x422   : > { %10328 = vmatpush3.bf16.msra.mxu1 %v10691_v36 }
 0x423   : > { %10349 = vmatprep.subr.bf16.mxu1 %v14263_v11 }
 0x425   : > { %10310 = vmatmul.mubr.bf16.gmra.mrb[76].mxu1 %v7531_v33  ;;  %v10705_v33 = vld [vmem:[#allocation7 + $0x1a8] sm:$0xff]  }
 0x426   : > { %10329 = vmatprep.mubr.msk.bf16.mxu1 %vm10927_vm0, %v14263_v11 }
 0x42d   : > { %10330 = vmatmul.mubr.bf16.vlgmr.msra.gmra.mrb[80].mxu1 %v14426_v19  ;;  %v8199_v19 = vmul.f32 %v8190_v45, %v13523_v22 }
 0x42e   : > { %10350 = vmatpush3.bf16.msra.mxu1 %v10692_v38  ;;  %10333 = vmatprep.mubr.msk.bf16.mxu1 %vm10927_vm0, %v14263_v11  ;;  %v8200_v38 = vmul.f32 %v8191_v29, %v13629_v31  ;;  %v10707_v31 = vld [vmem:[#allocation7 + $0x1b8] sm:$0xff]  }
 0x42f   : > { %10351 = vmatprep.subr.bf16.mxu1 %v14263_v11 }
 0x432   : > { %10352 = vmatpush3.bf16.msra.mxu1 %v10693_v55 }
 0x433   : > { %10353 = vmatprep.subr.bf16.mxu1 %v14263_v11 }
 0x435   : > { %10334 = vmatmul.mubr.bf16.gmra.mrb[84].mxu1 %v14427_v44 }
 0x436   : > { %10354 = vmatpush3.bf16.msra.mxu1 %v10694_v42  ;;  %10337 = vmatprep.mubr.msk.bf16.mxu1 %vm10927_vm0, %v14263_v11  ;;  %v10706_v42 = vld [vmem:[#allocation7 + $0x1b0] sm:$0xff]  }
 0x437   : > { %10355 = vmatprep.subr.bf16.mxu1 %v14263_v11 }
 0x43a   : > { %10356 = vmatpush3.bf16.msra.mxu1 %v10695_v17  ;;  %v8205_v17 = vpack.c.bf16 %v8200_v38, %v8199_v19  ;;  %v10710_v38 = vld [vmem:[#allocation7 + $0x1d0] sm:$0xff]  }
 0x43b   : > { %10357 = vmatprep.subr.bf16.mxu1 %v14263_v11 }
 0x43d   : > { %10338 = vmatmul.mubr.bf16.gmra.mrb[88].mxu1 %v8046_v30  ;;  %v8043_v30 = vsel %vm7930_vm10, %v8042_v41, %v8041_v21  ;;  %v8370_v41 = vsel %vm8362_vm12, %v8353_v4, %v8354_v28  ;;  %v8373_v21 = vld [vmem:[#allocation8 + $0x1b0] sm:$0xff] }
 0x43e   : > { %10358 = vmatpush3.bf16.msra.mxu1 %v10696_v52  ;;  %10341 = vmatprep.mubr.msk.bf16.mxu1 %vm10927_vm0, %v14263_v11  ;;  %v8048_v63 = vpack.c.b16 %v8043_v30, %v8043_v30  ;;  %v8355_v52 = vrot.slane %v12002_v51, 5 }
 0x43f   : > { %10359 = vmatprep.subr.bf16.mxu1 %v14263_v11 }
 0x440   : > { %v8369_v50 = vsel %vm8362_vm12, %v8354_v28, %v8355_v52  ;;  %v8361_v28 = vrot.slane %v13093_v20, 5 }
 0x442   : > { %10360 = vmatpush3.bf16.msra.mxu1 %v10697_v26 }
 0x443   : > { %10361 = vmatprep.subr.bf16.mxu1 %v14263_v11 }
 0x445   : > { %10342 = vmatmul.mubr.bf16.gmra.mrb[92].mxu1 %v8047_v13  ;;  %v14431_v13 = vld [vmem:[#allocation19_spill] sm:$0xff] }
 0x446   : > { %10362 = vmatpush3.bf16.msra.mxu1 %v10698_v35  ;;  %10345 = vmatprep.mubr.msk.bf16.mxu1 %vm10927_vm0, %v14263_v11  ;;  %v14432_v37 = vpack.c.bf16 %v14430_v34, %v14431_v13  ;;  %v8374_v35 = vld [vmem:[#allocation8 + $0x1b8] sm:$0xff]  ;;  %v8382_v34 = vmul.f32 %v8373_v21, %v8370_v41  ;;  %v10712_v41 = vld [vmem:[#allocation7 + $0x1e0] sm:$0xff]   ;;  %v8360_v21 = vrot.slane %v12977_v10, 5 }
 0x447   : > { %10363 = vmatprep.subr.bf16.mxu1 %v14263_v11 }
 0x44a   : > { %10364 = vmatpush3.bf16.msra.mxu1 %v10699_v62  ;;  %v8383_v62 = vmul.f32 %v8374_v35, %v8369_v50 }
 0x44b   : > { %10385 = vmatprep.subr.bf16.mxu1 %v14263_v11 }
 0x44c   : > { %v8391_v54 = vpack.c.bf16 %v8383_v62, %v8382_v34  ;;  %v8363_v34 = vsel %vm8362_vm12, %v8360_v21, %v8361_v28 }
 0x44d   : > { %10346 = vmatmul.mubr.bf16.gmra.mrb[96].mxu1 %v8048_v63  ;;  %v8357_v63 = vrot.slane %v14391_v58, 5 }
 0x44e   : > { %10365 = vmatprep.mubr.msk.bf16.mxu1 %vm10927_vm0, %v14263_v11 }
 0x455   : > { %10366 = vmatmul.mubr.bf16.vlgmr.msra.gmra.mrb[100].mxu1 %v14432_v37  ;;  %v10708_v37 = vld [vmem:[#allocation7 + $0x1c0] sm:$0xff]  }
 0x456   : > { %10386 = vmatpush3.bf16.msra.mxu1 %v10700_v7  ;;  %10369 = vmatprep.mubr.msk.bf16.mxu1 %vm10927_vm0, %v14263_v11 }
 0x457   : > { %10387 = vmatprep.subr.bf16.mxu1 %v14263_v11 }
 0x45a   : > { %10388 = vmatpush3.bf16.msra.mxu1 %v10701_v18  ;;  %v8356_v18 = vrot.slane %v12256_v14, 5 }
 0x45b   : > { %10389 = vmatprep.subr.bf16.mxu1 %v14263_v11 }
 0x45c   : > { %v13784_v57 = vpop.f32.mrb[0].mxu1 }
 0x45d   : > { %10370 = vmatmul.mubr.bf16.gmra.mrb[104].mxu1 %v8203_v23  ;;  %v10187_v56 = vpop.f32.mrb[1].mxu1  ;;  %v8204_v23 = vpack.c.bf16 %v8198_v60, %v8197_v53  ;;  %v10709_v60 = vld [vmem:[#allocation7 + $0x1c8] sm:$0xff]   ;;  %v8375_v53 = vld [vmem:[#allocation8 + $0x1c0] sm:$0xff] }
 0x45e   : > { %10390 = vmatpush3.bf16.msra.mxu1 %v10702_v59  ;;  %10373 = vmatprep.mubr.msk.bf16.mxu1 %vm10927_vm0, %v14263_v11  ;;  %v13787_v36 = vpop.f32.mrb[2].mxu1  ;;  %v8368_v56 = vsel %vm8362_vm12, %v8355_v52, %v8356_v18 }
 0x45f   : > { %10391 = vmatprep.subr.bf16.mxu1 %v14263_v11  ;;  %v10188_v6 = vpop.f32.mrb[3].mxu1  ;;  %v8384_v45 = vmul.f32 %v8375_v53, %v8368_v56  ;;  %v10714_v53 = vld [vmem:[#allocation7 + $0x1f0] sm:$0xff]  }
 0x462   : > { %10392 = vmatpush3.bf16.msra.mxu1 %v10703_v16  ;;  %v8367_v16 = vsel %vm8362_vm12, %v8356_v18, %v8357_v63  ;;  %v8379_v18 = vld [vmem:[#allocation8 + $0x1e0] sm:$0xff] }
 0x463   : > { %10393 = vmatprep.subr.bf16.mxu1 %v14263_v11 }
 0x464   : > { %v13794_v39 = vpop.f32.mrb[4].mxu1 }
 0x465   : > { %10374 = vmatmul.mubr.bf16.gmra.mrb[108].mxu1 %v8204_v23  ;;  %v10191_v2 = vpop.f32.mrb[5].mxu1  ;;  %v8359_v23 = vrot.slane %v14396_v9, 5 }
 0x466   : > { %10394 = vmatpush3.bf16.msra.mxu1 %v10704_v5  ;;  %10377 = vmatprep.mubr.msk.bf16.mxu1 %vm10927_vm0, %v14263_v11  ;;  %v13797_v55 = vpop.f32.mrb[6].mxu1  ;;  %v8385_v5 = vmul.f32 %v8376_v47, %v8367_v16  ;;  %v8358_v2 = vrot.slane %v12601_v48, 5 }
 0x467   : > { %10395 = vmatprep.subr.bf16.mxu1 %v14263_v11  ;;  %v10192_v44 = vpop.f32.mrb[7].mxu1 }
 0x468   : > { %v8365_v44 = vsel %vm8362_vm12, %v8358_v2, %v8359_v23 }
 0x46a   : > { %10396 = vmatpush3.bf16.msra.mxu1 %v10705_v33 }
 0x46b   : > { %10397 = vmatprep.subr.bf16.mxu1 %v14263_v11 }
 0x46c   : > { %v13804_v22 = vpop.f32.mrb[8].mxu1 }
 0x46d   : > { %10378 = vmatmul.mubr.bf16.gmra.mrb[112].mxu1 %v8205_v17  ;;  %v10195_v1 = vpop.f32.mrb[9].mxu1  ;;  %v8378_v17 = vld [vmem:[#allocation8 + $0x1d8] sm:$0xff] }
 0x46e   : > { %10398 = vmatpush3.bf16.msra.mxu1 %v10706_v42  ;;  %10381 = vmatprep.mubr.msk.bf16.mxu1 %vm10927_vm0, %v14263_v11  ;;  %v13807_v0 = vpop.f32.mrb[10].mxu1  ;;  %v8392_v42 = vpack.c.bf16 %v8385_v5, %v8384_v45  ;;  %v8387_v52 = vmul.f32 %v8378_v17, %v8365_v44 }
 0x46f   : > { %10399 = vmatprep.subr.bf16.mxu1 %v14263_v11  ;;  %v10196_v26 = vpop.f32.mrb[11].mxu1 }
 0x472   : > { %10400 = vmatpush3.bf16.msra.mxu1 %v10707_v31  ;;  %v8366_v31 = vsel %vm8362_vm12, %v8357_v63, %v8358_v2  ;;  %v8544_v2 = vrot.slane %v12002_v51, 6 }
 0x473   : > { %10421 = vmatprep.subr.bf16.mxu1 %v14263_v11  ;;  %v8386_v50 = vmul.f32 %v8377_v24, %v8366_v31  ;;  %v8542_v24 = vrot.slane %v14324_v49, 6 }
 0x474   : > { %v13821_v30 = vpop.f32.mrb[12].mxu1 }
 0x475   : > { %10382 = vmatmul.mubr.bf16.gmra.mrb[116].mxu1 %v8206_v32  ;;  %v10199_v7 = vpop.f32.mrb[13].mxu1 }
 0x476   : > { %10401 = vmatprep.mubr.msk.bf16.mxu1 %vm10927_vm0, %v14263_v11  ;;  %v13824_v13 = vpop.f32.mrb[14].mxu1  ;;  %v8393_v7 = vpack.c.bf16 %v8387_v52, %v8386_v50 }
 0x477   : > { %v10200_v59 = vpop.f32.mrb[15].mxu1 }
 0x478   : > { %v10713_v59 = vld [vmem:[#allocation7 + $0x1e8] sm:$0xff]  }
 0x47c   : > { %v13834_v6 = vpop.f32.mrb[16].mxu1 }
 0x47d   : > { %10402 = vmatmul.mubr.bf16.vlgmr.msra.gmra.mrb[120].mxu1 %v8391_v54  ;;  %v10203_v29 = vpop.f32.mrb[17].mxu1 }
 0x47e   : > { %10422 = vmatpush3.bf16.msra.mxu1 %v10708_v37  ;;  %10405 = vmatprep.mubr.msk.bf16.mxu1 %vm10927_vm0, %v14263_v11  ;;  %v7177_v33 = vpop.f32.mrb[18].mxu1  ;;  %v8380_v37 = vld [vmem:[#allocation8 + $0x1e8] sm:$0xff] }
 0x47f   : > { %10423 = vmatprep.subr.bf16.mxu1 %v14263_v11  ;;  %v10204_v19 = vpop.f32.mrb[19].mxu1  ;;  %v8381_v33 = vld [vmem:[#allocation8 + $0x1f0] sm:$0xff] }
 0x482   : > { %10424 = vmatpush3.bf16.msra.mxu1 %v10709_v60 }
 0x483   : > { %10425 = vmatprep.subr.bf16.mxu1 %v14263_v11 }
 0x485   : > { %10406 = vmatmul.mubr.bf16.gmra.mrb[124].mxu1 %v8392_v42 }
 0x486   : > { %10426 = vmatpush3.bf16.msra.mxu1 %v10710_v38  ;;  %10409 = vmatprep.mubr.msk.bf16.mxu1 %vm10927_vm0, %v14263_v11 }
 0x487   : > { %10427 = vmatprep.subr.bf16.mxu1 %v14263_v11 }
 0x488   : > { %v7262_v1 = vpop.f32.mrb[20].mxu1 }
 0x489   : > { %v13848_v26 = vadd.f32 %v7262_v1, %v13784_v57  ;;  %v10223_v32 = vpop.f32.mrb[21].mxu1  ;;  %v8364_v57 = vsel %vm8362_vm12, %v8359_v23, %v8360_v21  ;;  %v8371_v23 = vsel %vm8362_vm12, %v8361_v28, %v8353_v4  ;;  %v8543_v4 = vrot.slane %v14418_v15, 6 }
 0x48a   : > { %v7265_v35 = vpop.f32.mrb[22].mxu1  ;;  %10428 = vmatpush3.bf16.msra.mxu1 %v10711_v43  ;;  %v8388_v60 = vmul.f32 %v8379_v18, %v8364_v57  ;;  %v8390_v38 = vmul.f32 %v8381_v33, %v8371_v23  ;;  %v8546_v28 = vrot.slane %v14391_v58, 6  ;;  %v8545_v21 = vrot.slane %v12256_v14, 6  ;;  %v8565_v57 = vld [vmem:[#allocation8 + $0x210] sm:$0xff]  ;;  %v10720_v18 = vld [vmem:[#allocation7 + $0x200] sm:$0xff]  }
 0x48b   : > { %v13852_v62 = vadd.f32 %v7265_v35, %v13787_v36  ;;  %v10224_v63 = vpop.f32.mrb[23].mxu1  ;;  %10429 = vmatprep.subr.bf16.mxu1 %v14263_v11  ;;  %v8389_v36 = vmul.f32 %v8380_v37, %v8363_v34  ;;  %v8558_v51 = vsel %vm8551_vm13, %v8543_v4, %v8544_v2  ;;  %v8559_v15 = vsel %vm8551_vm13, %v8542_v24, %v8543_v4  ;;  %v8567_v33 = vld [vmem:[#allocation8 + $0x220] sm:$0xff] }
 0x48c   : > { %v8395_v31 = vpack.c.bf16 %v8390_v38, %v8390_v38  ;;  %v8556_v37 = vsel %vm8551_vm13, %v8545_v21, %v8546_v28  ;;  %v8557_v58 = vsel %vm8551_vm13, %v8544_v2, %v8545_v21  ;;  %v10725_v21 = vld [vmem:[#allocation7 + $0x228] sm:$0xff]  }
 0x48d   : > { %10410 = vmatmul.mubr.bf16.gmra.mrb[128].mxu1 %v8393_v7  ;;  %v8394_v45 = vpack.c.bf16 %v8389_v36, %v8388_v60  ;;  %v8574_v14 = vmul.f32 %v8565_v57, %v8556_v37 }
 0x48e   : > { %10430 = vmatpush3.bf16.msra.mxu1 %v10712_v41  ;;  %10413 = vmatprep.mubr.msk.bf16.mxu1 %vm10927_vm0, %v14263_v11 }
 0x48f   : > { %10431 = vmatprep.subr.bf16.mxu1 %v14263_v11 }
 0x490   : > { %v7270_v54 = vpop.f32.mrb[24].mxu1 }
 0x491   : > { %v13863_v16 = vadd.f32 %v7270_v54, %v13794_v39  ;;  %v10227_v47 = vpop.f32.mrb[25].mxu1  ;;  %v10715_v39 = vld [vmem:[#allocation7 + $0x1f8] sm:$0xff]  }
 0x492   : > { %v7273_v56 = vpop.f32.mrb[26].mxu1  ;;  %10432 = vmatpush3.bf16.msra.mxu1 %v10713_v59  ;;  %v8548_v59 = vrot.slane %v14396_v9, 6  ;;  %v10722_v9 = vld [vmem:[#allocation7 + $0x210] sm:$0xff]  }
 0x493   : > { %v13866_v5 = vadd.f32 %v7273_v56, %v13797_v55  ;;  %v10228_v29 = vpop.f32.mrb[27].mxu1  ;;  %10433 = vmatprep.subr.bf16.mxu1 %v14263_v11  ;;  %v10721_v56 = vld [vmem:[#allocation7 + $0x208] sm:$0xff]  }
 0x495   : > { %10414 = vmatmul.mubr.bf16.gmra.mrb[132].mxu1 %v8394_v45 }
 0x496   : > { %10434 = vmatpush3.bf16.msra.mxu1 %v10714_v53  ;;  %10417 = vmatprep.mubr.msk.bf16.mxu1 %vm10927_vm0, %v14263_v11  ;;  %v8547_v53 = vrot.slane %v12601_v48, 6 }
 0x497   : > { %10435 = vmatprep.subr.bf16.mxu1 %v14263_v11 }
 0x498   : > { %v7278_v55 = vpop.f32.mrb[28].mxu1  ;;  %v8554_v23 = vsel %vm8551_vm13, %v8547_v53, %v8548_v59 }
 0x499   : > { %v13878_v19 = vadd.f32 %v7278_v55, %v13804_v22  ;;  %v10231_v42 = vpop.f32.mrb[29].mxu1  ;;  %v8563_v22 = vld [vmem:[#allocation8 + $0x200] sm:$0xff]  ;;  %v8576_v48 = vmul.f32 %v8567_v33, %v8554_v23  ;;  %v8550_v55 = vrot.slane %v13093_v20, 6 }
 0x49a   : > { %v7281_v44 = vpop.f32.mrb[30].mxu1  ;;  %10436 = vmatpush3.bf16.msra.mxu1 %v10715_v39  ;;  %v8572_v52 = vmul.f32 %v8563_v22, %v8558_v51  ;;  %v8566_v39 = vld [vmem:[#allocation8 + $0x218] sm:$0xff] }
 0x49b   : > { %v13882_v17 = vadd.f32 %v7281_v44, %v13807_v0  ;;  %v10232_v43 = vpop.f32.mrb[31].mxu1  ;;  %10493 = vmatprep.subr.bf16.mxu1 %v14263_v11  ;;  %v8562_v0 = vld [vmem:[#allocation8 + $0x1f8] sm:$0xff]  ;;  %v8560_v57 = vsel %vm8551_vm13, %v8550_v55, %v8542_v24 }
 0x49c   : > { %v8571_v35 = vmul.f32 %v8562_v0, %v8559_v15  ;;  %v10723_v43 = vld [vmem:[#allocation7 + $0x218] sm:$0xff]   ;;  %v8569_v0 = vld [vmem:[#allocation8 + $0x230] sm:$0xff] }
 0x49d   : > { %10418 = vmatmul.mubr.bf16.gmra.mrb[136].mxu1 %v8395_v31  ;;  %v8549_v31 = vrot.slane %v12977_v10, 6 }
 0x49e   : > { %10437 = vmatprep.mubr.msk.bf16.mxu1 %vm10927_vm0, %v14263_v11  ;;  %v8580_v34 = vpack.c.bf16 %v8572_v52, %v8571_v35  ;;  %v8568_v52 = vld [vmem:[#allocation8 + $0x228] sm:$0xff] }
 0x49f   : > { %v8552_v20 = vsel %vm8551_vm13, %v8549_v31, %v8550_v55  ;;  %v8553_v10 = vsel %vm8551_vm13, %v8548_v59, %v8549_v31  ;;  %v10727_v59 = vld [vmem:[#allocation7 + $0x238] sm:$0xff]  }
 0x4a0   : > { %v7286_v1 = vpop.f32.mrb[32].mxu1  ;;  %v8577_v35 = vmul.f32 %v8568_v52, %v8553_v10 }
 0x4a1   : > { %v13897_v32 = vadd.f32 %v7286_v1, %v13821_v30  ;;  %v10235_v50 = vpop.f32.mrb[33].mxu1  ;;  %v8564_v30 = vld [vmem:[#allocation8 + $0x208] sm:$0xff] }
 0x4a2   : > { %v7289_v41 = vpop.f32.mrb[34].mxu1  ;;  %v8573_v47 = vmul.f32 %v8564_v30, %v8557_v58  ;;  %v10726_v58 = vld [vmem:[#allocation7 + $0x230] sm:$0xff]  }
 0x4a3   : > { %v13901_v63 = vadd.f32 %v7289_v41, %v13824_v13  ;;  %v10236_v7 = vpop.f32.mrb[35].mxu1 }
 0x4a4   : > { %v8581_v45 = vpack.c.bf16 %v8574_v14, %v8573_v47 }
 0x4a5   : > { %10438 = vmatmul.mubr.bf16.vlgmr.msra.gmra.mrb[140].mxu1 %v8580_v34 }
 0x4a6   : > { %10501 = vmatpush3.bf16.msra.mxu1 %v10720_v18  ;;  %10441 = vmatprep.mubr.msk.bf16.mxu1 %vm10927_vm0, %v14263_v11  ;;  %v8570_v18 = vld [vmem:[#allocation8 + $0x238] sm:$0xff] }
 0x4a7   : > { %10494 = vmatprep.subr.bf16.mxu1 %v14263_v11 }
 0x4a8   : > { %v7294_v13 = vpop.f32.mrb[36].mxu1 }
 0x4a9   : > { %v13912_v36 = vadd.f32 %v7294_v13, %v13834_v6  ;;  %v10239_v54 = vpop.f32.mrb[37].mxu1  ;;  %v8555_v6 = vsel %vm8551_vm13, %v8546_v28, %v8547_v53 }
 0x4aa   : > { %v7297_v60 = vpop.f32.mrb[38].mxu1  ;;  %10502 = vmatpush3.bf16.msra.mxu1 %v10721_v56  ;;  %v8575_v44 = vmul.f32 %v8566_v39, %v8555_v6 }
 0x4ab   : > { %v10240_v29 = vpop.f32.mrb[39].mxu1  ;;  %10495 = vmatprep.subr.bf16.mxu1 %v14263_v11 }
 0x4ac   : > { %v8582_v15 = vpack.c.bf16 %v8576_v48, %v8575_v44  ;;  %v8739_v29 = vld [vmem:[#allocation8 + $0x278] sm:$0xff] }
 0x4ad   : > { %10442 = vmatmul.mubr.bf16.gmra.mrb[144].mxu1 %v8581_v45  ;;  %v14433_v45 = vpack.c.bf16 %v13283_v46, %v13280_v25  ;;  %v8748_v23 = vmul.f32 %v8739_v29, %v13724_v3 }
 0x4ae   : > { %10503 = vmatpush3.bf16.msra.mxu1 %v10722_v9  ;;  %10445 = vmatprep.mubr.msk.bf16.mxu1 %vm10927_vm0, %v14263_v11 }
 0x4af   : > { %10496 = vmatprep.subr.bf16.mxu1 %v14263_v11 }
 0x4b0   : > { %v7442_v38 = vpop.f32.mrb[40].mxu1 }
 0x4b1   : > { %v13925_v2 = vadd.f32 %v7442_v38, %v13848_v26  ;;  %v10259_v42 = vpop.f32.mrb[41].mxu1  ;;  %v10724_v26 = vld [vmem:[#allocation7 + $0x220] sm:$0xff]  }
 0x4b2   : > { %v7445_v4 = vpop.f32.mrb[42].mxu1  ;;  %10504 = vmatpush3.bf16.msra.mxu1 %v10723_v43  ;;  %v8740_v38 = vld [vmem:[#allocation8 + $0x280] sm:$0xff] }
 0x4b3   : > { %v13929_v51 = vadd.f32 %v7445_v4, %v13852_v62  ;;  %v10260_v22 = vpop.f32.mrb[43].mxu1  ;;  %10497 = vmatprep.subr.bf16.mxu1 %v14263_v11  ;;  %v8578_v62 = vmul.f32 %v8569_v0, %v8552_v20  ;;  %v8749_v25 = vmul.f32 %v8740_v38, %v13691_v27 }
 0x4b5   : > { %10446 = vmatmul.mubr.bf16.gmra.mrb[148].mxu1 %v8582_v15  ;;  %v8583_v37 = vpack.c.bf16 %v8578_v62, %v8577_v35  ;;  %v8754_v4 = vpack.c.bf16 %v8749_v25, %v8749_v25 }
 0x4b6   : > { %10505 = vmatpush3.bf16.msra.mxu1 %v10724_v26  ;;  %10449 = vmatprep.mubr.msk.bf16.mxu1 %vm10927_vm0, %v14263_v11 }
 0x4b7   : > { %10498 = vmatprep.subr.bf16.mxu1 %v14263_v11 }
 0x4b8   : > { %v7450_v1 = vpop.f32.mrb[44].mxu1 }
 0x4b9   : > { %v7482_v28 = vadd.f32 %v7450_v1, %v13863_v16  ;;  %v10263_v50 = vpop.f32.mrb[45].mxu1  ;;  %v8579_v16 = vmul.f32 %v8570_v18, %v8560_v57 }
 0x4ba   : > { %v7453_v41 = vpop.f32.mrb[46].mxu1  ;;  %10506 = vmatpush3.bf16.msra.mxu1 %v10725_v21 }
 0x4bb   : > { %v7483_v7 = vadd.f32 %v7453_v41, %v13866_v5  ;;  %v10264_v34 = vpop.f32.mrb[47].mxu1  ;;  %10499 = vmatprep.subr.bf16.mxu1 %v14263_v11  ;;  %v8584_v24 = vpack.c.bf16 %v8579_v16, %v8579_v16 }
 0x4bd   : > { %10450 = vmatmul.mubr.bf16.gmra.mrb[152].mxu1 %v8583_v37 }
 0x4be   : > { %10507 = vmatpush3.bf16.msra.mxu1 %v10726_v58  ;;  %10453 = vmatprep.mubr.msk.bf16.mxu1 %vm10927_vm0, %v14263_v11 }
 0x4bf   : > { %10500 = vmatprep.subr.bf16.mxu1 %v14263_v11 }
 0x4c0   : > { %v7458_v5 = vpop.f32.mrb[48].mxu1 }
 0x4c1   : > { %v7484_v30 = vadd.f32 %v7458_v5, %v13878_v19  ;;  %v10267_v14 = vpop.f32.mrb[49].mxu1 }
 0x4c2   : > { %v7461_v13 = vpop.f32.mrb[50].mxu1  ;;  %10508 = vmatpush3.bf16.msra.mxu1 %v10727_v59 }
 0x4c3   : > { %v7485_v40 = vadd.f32 %v7461_v13, %v13882_v17  ;;  %v10268_v49 = vpop.f32.mrb[51].mxu1  ;;  %v8738_v17 = vld [vmem:[#allocation8 + $0x270] sm:$0xff] }
 0x4c4   : > { %v8747_v6 = vmul.f32 %v8738_v17, %v13714_v61 }
 0x4c5   : > { %10454 = vmatmul.mubr.bf16.gmra.mrb[156].mxu1 %v8584_v24 }
 0x4c6   : > { %10481 = vmatprep.mubr.msk.bf16.mxu1 %vm10927_vm0, %v14263_v11  ;;  %v8753_v48 = vpack.c.bf16 %v8748_v23, %v8747_v6 }
 0x4c8   : > { %v7466_v54 = vpop.f32.mrb[52].mxu1 }
 0x4c9   : > { %v7486_v47 = vadd.f32 %v7466_v54, %v13897_v32  ;;  %v10271_v60 = vpop.f32.mrb[53].mxu1 }
 0x4ca   : > { %v7469_v56 = vpop.f32.mrb[54].mxu1 }
 0x4cb   : > { %v7487_v53 = vadd.f32 %v7469_v56, %v13901_v63  ;;  %v10272_v19 = vpop.f32.mrb[55].mxu1 }
 0x4cd   : > { %10482 = vmatmul.mubr.bf16.vlgmr.msra.gmra.mrb[160].mxu1 %v14433_v45 }
 0x4ce   : > { %10485 = vmatprep.mubr.msk.bf16.mxu1 %vm10927_vm0, %v14263_v11 }
 0x4d0   : > { %v7474_v33 = vpop.f32.mrb[56].mxu1 }
 0x4d1   : > { %v7488_v9 = vadd.f32 %v7474_v33, %v13912_v36  ;;  %v10275_v32 = vpop.f32.mrb[57].mxu1 }
 0x4d2   : > { %v7477_v39 = vpop.f32.mrb[58].mxu1 }
 0x4d3   : > { %v10276_v63 = vpop.f32.mrb[59].mxu1 }
 0x4d5   : > { %10486 = vmatmul.mubr.bf16.gmra.mrb[164].mxu1 %v8753_v48 }
 0x4d6   : > { %10489 = vmatprep.mubr.msk.bf16.mxu1 %vm10927_vm0, %v14263_v11 }
 0x4d8   : > { %v7631_v46 = vpop.f32.mrb[60].mxu1 }
 0x4d9   : > { %v7669_v55 = vadd.f32 %v7631_v46, %v13925_v2  ;;  %v10295_v3 = vpop.f32.mrb[61].mxu1 }
 0x4da   : > { %v7634_v42 = vpop.f32.mrb[62].mxu1 }
 0x4db   : > { %v7670_v36 = vadd.f32 %v7634_v42, %v13929_v51  ;;  %v10296_v44 = vpop.f32.mrb[63].mxu1 }
 0x4dd   : > { %10490 = vmatmul.mubr.bf16.gmra.mrb[168].mxu1 %v8754_v4 }
 0x4e0   : > { %v7639_v61 = vpop.f32.mrb[64].mxu1 }
 0x4e1   : > { %v7671_v43 = vadd.f32 %v7639_v61, %v7482_v28  ;;  %v10299_v31 = vpop.f32.mrb[65].mxu1 }
 0x4e2   : > { %v7642_v22 = vpop.f32.mrb[66].mxu1 }
 0x4e3   : > { %v7672_v15 = vadd.f32 %v7642_v22, %v7483_v7  ;;  %v10300_v20 = vpop.f32.mrb[67].mxu1 }
 0x4e8   : > { %v7647_v0 = vpop.f32.mrb[68].mxu1 }
 0x4e9   : > { %v7673_v11 = vadd.f32 %v7647_v0, %v7484_v30  ;;  %v10303_v26 = vpop.f32.mrb[69].mxu1 }
 0x4ea   : > { %v7650_v27 = vpop.f32.mrb[70].mxu1 }
 0x4eb   : > { %v7674_v10 = vadd.f32 %v7650_v27, %v7485_v40  ;;  %v10304_v52 = vpop.f32.mrb[71].mxu1 }
 0x4f0   : > { %v7655_v2 = vpop.f32.mrb[72].mxu1 }
 0x4f1   : > { %v7675_v62 = vadd.f32 %v7655_v2, %v7486_v47  ;;  %v10307_v1 = vpop.f32.mrb[73].mxu1 }
 0x4f2   : > { %v7658_v50 = vpop.f32.mrb[74].mxu1 }
 0x4f3   : > { %v7676_v51 = vadd.f32 %v7658_v50, %v7487_v53  ;;  %v10308_v35 = vpop.f32.mrb[75].mxu1 }
 0x4f8   : > { %v7663_v41 = vpop.f32.mrb[76].mxu1 }
 0x4f9   : > { %v7677_v21 = vadd.f32 %v7663_v41, %v7488_v9  ;;  %v10311_v34 = vpop.f32.mrb[77].mxu1 }
 0x4fa   : > { %v7666_v28 = vpop.f32.mrb[78].mxu1 }
 0x4fb   : > { %v10312_v37 = vpop.f32.mrb[79].mxu1 }
 0x500   : > { %v8136_v57 = vpop.f32.mrb[80].mxu1 }
 0x501   : > { %v8174_v7 = vadd.f32 %v8136_v57, %v7669_v55  ;;  %v10331_v18 = vpop.f32.mrb[81].mxu1 }
 0x502   : > { %v8139_v58 = vpop.f32.mrb[82].mxu1 }
 0x503   : > { %v8175_v16 = vadd.f32 %v8139_v58, %v7670_v36  ;;  %v10332_v5 = vpop.f32.mrb[83].mxu1 }
 0x508   : > { %v8144_v30 = vpop.f32.mrb[84].mxu1 }
 0x509   : > { %v8176_v14 = vadd.f32 %v8144_v30, %v7671_v43  ;;  %v10335_v13 = vpop.f32.mrb[85].mxu1 }
 0x50a   : > { %v8147_v59 = vpop.f32.mrb[86].mxu1 }
 0x50b   : > { %v8177_v40 = vadd.f32 %v8147_v59, %v7672_v15  ;;  %v10336_v49 = vpop.f32.mrb[87].mxu1 }
 0x510   : > { %v8152_v24 = vpop.f32.mrb[88].mxu1 }
 0x511   : > { %v8178_v54 = vadd.f32 %v8152_v24, %v7673_v11  ;;  %v10339_v47 = vpop.f32.mrb[89].mxu1 }
 0x512   : > { %v8155_v60 = vpop.f32.mrb[90].mxu1 }
 0x513   : > { %v8179_v56 = vadd.f32 %v8155_v60, %v7674_v10  ;;  %v10340_v53 = vpop.f32.mrb[91].mxu1 }
 0x518   : > { %v8160_v19 = vpop.f32.mrb[92].mxu1 }
 0x519   : > { %v8180_v29 = vadd.f32 %v8160_v19, %v7675_v62  ;;  %v10343_v45 = vpop.f32.mrb[93].mxu1 }
 0x51a   : > { %v8163_v17 = vpop.f32.mrb[94].mxu1 }
 0x51b   : > { %v8181_v23 = vadd.f32 %v8163_v17, %v7676_v51  ;;  %v10344_v33 = vpop.f32.mrb[95].mxu1 }
 0x520   : > { %v8168_v9 = vpop.f32.mrb[96].mxu1 }
 0x521   : > { %v8182_v32 = vadd.f32 %v8168_v9, %v7677_v21  ;;  %v10347_v6 = vpop.f32.mrb[97].mxu1 }
 0x522   : > { %v8171_v39 = vpop.f32.mrb[98].mxu1 }
 0x523   : > { %v10348_v63 = vpop.f32.mrb[99].mxu1 }
 0x524   : > { %v13983_v63 = vld [vmem:[%s14129_s4] ss:$0 sm:$0xff] }
 0x528   : > { %v8306_v48 = vpop.f32.mrb[100].mxu1 }
 0x529   : > { %v8344_v38 = vadd.f32 %v8306_v48, %v8174_v7  ;;  %v10367_v25 = vpop.f32.mrb[101].mxu1 }
 0x52a   : > { %v8309_v46 = vpop.f32.mrb[102].mxu1 }
 0x52b   : > { %v8345_v55 = vadd.f32 %v8309_v46, %v8175_v16  ;;  %v10368_v3 = vpop.f32.mrb[103].mxu1 }
 0x530   : > { %v8314_v42 = vpop.f32.mrb[104].mxu1 }
 0x531   : > { %v8346_v36 = vadd.f32 %v8314_v42, %v8176_v14  ;;  %v10371_v44 = vpop.f32.mrb[105].mxu1  ;;  %v14435_v42 = vld [vmem:[#allocation70_spill] sm:$0xff] }
 0x532   : > { %v8317_v4 = vpop.f32.mrb[106].mxu1 }
 0x533   : > { %v8347_v61 = vadd.f32 %v8317_v4, %v8177_v40  ;;  %v10372_v43 = vpop.f32.mrb[107].mxu1  ;;  %v14436_v4 = vld [vmem:[#allocation15_spill] sm:$0xff] }
 0x538   : > { %v8322_v31 = vpop.f32.mrb[108].mxu1 }
 0x539   : > { %v8348_v22 = vadd.f32 %v8322_v31, %v8178_v54  ;;  %v10375_v15 = vpop.f32.mrb[109].mxu1 }
 0x53a   : > { %v8325_v20 = vpop.f32.mrb[110].mxu1 }
 0x53b   : > { %v8349_v0 = vadd.f32 %v8325_v20, %v8179_v56  ;;  %v10376_v11 = vpop.f32.mrb[111].mxu1 }
 0x540   : > { %v8330_v26 = vpop.f32.mrb[112].mxu1 }
 0x541   : > { %v8350_v27 = vadd.f32 %v8330_v26, %v8180_v29  ;;  %v10379_v10 = vpop.f32.mrb[113].mxu1 }
 0x542   : > { %v8333_v52 = vpop.f32.mrb[114].mxu1 }
 0x543   : > { %v8351_v2 = vadd.f32 %v8333_v52, %v8181_v23  ;;  %v10380_v62 = vpop.f32.mrb[115].mxu1 }
 0x548   : > { %v8338_v1 = vpop.f32.mrb[116].mxu1 }
 0x549   : > { %v8352_v50 = vadd.f32 %v8338_v1, %v8182_v32  ;;  %v10383_v51 = vpop.f32.mrb[117].mxu1 }
 0x54a   : > { %v8341_v35 = vpop.f32.mrb[118].mxu1 }
 0x54b   : > { %v10384_v41 = vpop.f32.mrb[119].mxu1 }
 0x550   : > { %v8495_v21 = vpop.f32.mrb[120].mxu1 }
 0x551   : > { %v8533_v34 = vadd.f32 %v8495_v21, %v8344_v38  ;;  %v10403_v28 = vpop.f32.mrb[121].mxu1  ;;  %v14434_v38 = vld [vmem:[#allocation69_spill] sm:$0xff] }
 0x552   : > { %v8498_v37 = vpop.f32.mrb[122].mxu1 }
 0x553   : > { %v8534_v57 = vadd.f32 %v8498_v37, %v8345_v55  ;;  %v10404_v7 = vpop.f32.mrb[123].mxu1 }
 0x558   : > { %v8503_v18 = vpop.f32.mrb[124].mxu1 }
 0x559   : > { %v8535_v58 = vadd.f32 %v8503_v18, %v8346_v36  ;;  %v10407_v16 = vpop.f32.mrb[125].mxu1 }
 0x55a   : > { %v8506_v5 = vpop.f32.mrb[126].mxu1 }
 0x55b   : > { %v13968_v30 = vadd.f32 %v8506_v5, %v8347_v61  ;;  %v10408_v14 = vpop.f32.mrb[127].mxu1 }
 0x560   : > { %v8511_v13 = vpop.f32.mrb[128].mxu1 }
 0x561   : > { %v13970_v59 = vadd.f32 %v8511_v13, %v8348_v22  ;;  %v10411_v40 = vpop.f32.mrb[129].mxu1 }
 0x562   : > { %v8514_v49 = vpop.f32.mrb[130].mxu1 }
 0x563   : > { %v13972_v24 = vadd.f32 %v8514_v49, %v8349_v0  ;;  %v10412_v54 = vpop.f32.mrb[131].mxu1 }
 0x568   : > { %v8519_v47 = vpop.f32.mrb[132].mxu1 }
 0x569   : > { %v13974_v60 = vadd.f32 %v8519_v47, %v8350_v27  ;;  %v10415_v56 = vpop.f32.mrb[133].mxu1 }
 0x56a   : > { %v8522_v53 = vpop.f32.mrb[134].mxu1 }
 0x56b   : > { %v13976_v19 = vadd.f32 %v8522_v53, %v8351_v2  ;;  %v10416_v29 = vpop.f32.mrb[135].mxu1 }
 0x570   : > { %v8527_v45 = vpop.f32.mrb[136].mxu1 }
 0x571   : > { %v13978_v17 = vadd.f32 %v8527_v45, %v8352_v50  ;;  %v10419_v23 = vpop.f32.mrb[137].mxu1 }
 0x572   : > { %v8530_v33 = vpop.f32.mrb[138].mxu1 }
 0x573   : > { %v10420_v9 = vpop.f32.mrb[139].mxu1 }
 0x578   : > { %v8684_v32 = vpop.f32.mrb[140].mxu1 }
 0x579   : > { %v8722_v6 = vadd.f32 %v8684_v32, %v8533_v34  ;;  %v10439_v39 = vpop.f32.mrb[141].mxu1 }
 0x57a   : > { %v8687_v48 = vpop.f32.mrb[142].mxu1 }
 0x57b   : > { %v8892_v25 = vadd.f32 %v14434_v38, %v8722_v6  ;;  %v8723_v46 = vadd.f32 %v8687_v48, %v8534_v57  ;;  %v10440_v55 = vpop.f32.mrb[143].mxu1 }
 0x57d   : > { %v8908_v3 = vadd.f32 %v13983_v63, %v8892_v25  ;;  %v8893_v36 = vadd.f32 %v14435_v42, %v8723_v46 }
 0x57f   : > { %v8926_v44 = vcombine.high %v8908_v3, %v8908_v3  ;;  %v8933_v61 = vrot.slane %v8908_v3, %v14436_v4  ;;  %v8909_v43 = vadd.f32 %v13983_v63, %v8893_v36 }
 0x580   : > { %v8692_v31 = vpop.f32.mrb[144].mxu1 }
 0x581   : > { %v8940_v22 = vrot.slane %v8926_v44, %v14436_v4  ;;  %v8941_v15 = vcombine.high %v8933_v61, %v8933_v61  ;;  %v8949_v20 = vrot.slane %v8933_v61, %v14436_v4  ;;  %v8975_v0 = vcombine.high %v8909_v43, %v8909_v43  ;;  %v10443_v11 = vpop.f32.mrb[145].mxu1 }
 0x582   : > { %v8982_v26 = vrot.slane %v8909_v43, %v14436_v4  ;;  %v8724_v27 = vadd.f32 %v8692_v31, %v8535_v58  ;;  %v8695_v10 = vpop.f32.mrb[146].mxu1 }
 0x583   : > { %v8942_v52 = vcombine.high %v8940_v22, %v8940_v22  ;;  %v8956_v2 = vrot.slane %v8940_v22, %v14436_v4  ;;  %v8963_v62 = vrot.slane %v8941_v15, %v14436_v4  ;;  %v8971_v1 = vcombine.high %v8949_v20, %v8949_v20  ;;  %v10444_v50 = vpop.f32.mrb[147].mxu1 }
 0x584   : > { %v8989_v51 = vrot.slane %v8975_v0, %v14436_v4  ;;  %v8990_v35 = vcombine.high %v8982_v26, %v8982_v26  ;;  %v8998_v41 = vrot.slane %v8982_v26, %v14436_v4  ;;  %v8894_v21 = vadd.f32 %v13434_v8, %v8724_v27 }
 0x585   : > { %v8970_v34 = vrot.slane %v8942_v52, %v14436_v4  ;;  %v8972_v28 = vcombine.high %v8956_v2, %v8956_v2  ;;  %v8973_v37 = vcombine.high %v8963_v62, %v8963_v62  ;;  %v9439_v57 = vmax.f32 %v8949_v20, %v8963_v62 }
 0x586   : > { %v8991_v7 = vcombine.high %v8989_v51, %v8989_v51  ;;  %v9005_v18 = vrot.slane %v8989_v51, %v14436_v4  ;;  %v9012_v58 = vrot.slane %v8990_v35, %v14436_v4  ;;  %v9020_v16 = vcombine.high %v8998_v41, %v8998_v41 }
 0x587   : > { %v9440_v5 = vmax.f32 %v8973_v37, %v8956_v2  ;;  %v9463_v14 = vmax.f32 %v9439_v57, %v8971_v1  ;;  %v8974_v13 = vcombine.high %v8970_v34, %v8970_v34  ;;  %v8910_v40 = vadd.f32 %v13983_v63, %v8894_v21 }
 0x588   : > { %v9019_v49 = vrot.slane %v8991_v7, %v14436_v4  ;;  %v9021_v54 = vcombine.high %v9005_v18, %v9005_v18  ;;  %v9022_v8 = vcombine.high %v9012_v58, %v9012_v58  ;;  %v9442_v47 = vmax.f32 %v9012_v58, %v9020_v16  ;;  %v8700_v56 = vpop.f32.mrb[148].mxu1 }
 0x589   : > { %v9464_v53 = vmax.f32 %v9440_v5, %v8970_v34  ;;  %v9441_v29 = vmax.f32 %v8972_v28, %v8974_v13  ;;  %v9024_v45 = vcombine.high %v8910_v40, %v8910_v40  ;;  %v9031_v23 = vrot.slane %v8910_v40, %v14436_v4  ;;  %v10447_v33 = vpop.f32.mrb[149].mxu1 }
 0x58a   : > { %v9443_v9 = vmax.f32 %v9005_v18, %v9019_v49  ;;  %v9466_v32 = vmax.f32 %v9442_v47, %v9022_v8  ;;  %v9023_v6 = vcombine.high %v9019_v49, %v9019_v49  ;;  %v8725_v39 = vadd.f32 %v8695_v10, %v13968_v30  ;;  %v8703_v48 = vpop.f32.mrb[150].mxu1 }
 0x58b   : > { %v9465_v38 = vmax.f32 %v9441_v29, %v8998_v41  ;;  %v9038_v25 = vrot.slane %v9024_v45, %v14436_v4  ;;  %v9039_v46 = vcombine.high %v9031_v23, %v9031_v23  ;;  %v9047_v55 = vrot.slane %v9031_v23, %v14436_v4  ;;  %v10448_v3 = vpop.f32.mrb[151].mxu1 }
 0x58c   : > { %v9467_v42 = vmax.f32 %v9443_v9, %v9021_v54  ;;  %v9488_v36 = vmax.f32 %v9464_v53, %v9466_v32  ;;  %v8895_v44 = vadd.f32 %v13448_v12, %v8725_v39  ;;  %v8726_v61 = vadd.f32 %v8700_v56, %v13970_v59 }
 0x58d   : > { %v9487_v43 = vmax.f32 %v9463_v14, %v9465_v38  ;;  %v9040_v31 = vcombine.high %v9038_v25, %v9038_v25  ;;  %v9054_v22 = vrot.slane %v9038_v25, %v14436_v4  ;;  %v9061_v30 = vrot.slane %v9039_v46, %v14436_v4 }
 0x58e   : > { %v9444_v15 = vmax.f32 %v9023_v6, %v9047_v55  ;;  %v8911_v20 = vadd.f32 %v13983_v63, %v8895_v44  ;;  %v8727_v0 = vadd.f32 %v8703_v48, %v13972_v24  ;;  %v9069_v26 = vcombine.high %v9047_v55, %v9047_v55 }
 0x58f   : > { %v9495_v11 = vmax.f32 %v9487_v43, %v9467_v42  ;;  %v9071_v27 = vcombine.high %v9061_v30, %v9061_v30  ;;  %v9068_v62 = vrot.slane %v9040_v31, %v14436_v4  ;;  %v9070_v1 = vcombine.high %v9054_v22, %v9054_v22 }
 0x590   : > { %v9468_v10 = vmax.f32 %v9444_v15, %v9061_v30  ;;  %v9073_v52 = vcombine.high %v8911_v20, %v8911_v20  ;;  %v9080_v12 = vrot.slane %v8911_v20, %v14436_v4  ;;  %v8708_v2 = vpop.f32.mrb[152].mxu1 }
 0x591   : > { %v9503_v59 = vmax.f32 %v9495_v11, 0.0  ;;  %v9445_v50 = vmax.f32 %v9069_v26, %v9071_v27  ;;  %v10451_v51 = vpop.f32.mrb[153].mxu1  ;;  %v14018_v28 = vadd.f32 %v8708_v2, %v13974_v60  ;;  %v9072_v16 = vcombine.high %v9068_v62, %v9068_v62 }
 0x592   : > { %v9496_v35 = vmax.f32 %v9488_v36, %v9468_v10  ;;  %v9087_v41 = vrot.slane %v9073_v52, %v14436_v4  ;;  %v9088_v21 = vcombine.high %v9080_v12, %v9080_v12  ;;  %v9096_v24 = vrot.slane %v9080_v12, %v14436_v4  ;;  %v8711_v34 = vpop.f32.mrb[154].mxu1 }
 0x593   : > { %v14021_v37 = vadd.f32 %v8711_v34, %v13976_v19  ;;  %v10452_v57 = vpop.f32.mrb[155].mxu1  ;;  %v9446_v5 = vmax.f32 %v9068_v62, %v9070_v1  ;;  %v9469_v14 = vmax.f32 %v9445_v50, %v9054_v22 }
 0x594   : > { %v9504_v7 = vmax.f32 %v9496_v35, 0.0  ;;  %v9089_v18 = vcombine.high %v9087_v41, %v9087_v41  ;;  %v9110_v58 = vrot.slane %v9088_v21, %v14436_v4  ;;  %v9103_v13 = vrot.slane %v9087_v41, %v14436_v4 }
 0x595   : > { %v9118_v49 = vcombine.high %v9096_v24, %v9096_v24  ;;  %v9470_v45 = vmax.f32 %v9446_v5, %v9072_v16 }
 0x596   : > { %v14025_v40 = vcombine.low %v9503_v59, %v9504_v7  ;;  %v9120_v54 = vcombine.high %v9110_v58, %v9110_v58  ;;  %v9447_v8 = vmax.f32 %v9096_v24, %v9110_v58  ;;  %v9117_v60 = vrot.slane %v9089_v18, %v14436_v4 }
 0x597   : > { %v9119_v43 = vcombine.high %v9103_v13, %v9103_v13 }
 0x598   : > { %v9448_v47 = vmax.f32 %v9120_v54, %v9103_v13  ;;  %v9471_v19 = vmax.f32 %v9447_v8, %v9118_v49  ;;  %v8716_v56 = vpop.f32.mrb[156].mxu1  ;;  %v9121_v42 = vcombine.high %v9117_v60, %v9117_v60 }
 0x599   : > { %v14029_v53 = vadd.f32 %v8716_v56, %v13978_v17  ;;  %v10455_v29 = vpop.f32.mrb[157].mxu1 }
 0x59a   : > { %v9472_v23 = vmax.f32 %v9448_v47, %v9117_v60  ;;  %v8719_v33 = vpop.f32.mrb[158].mxu1  ;;  %v9489_v9 = vmax.f32 %v9469_v14, %v9471_v19 }
 0x59b   : > { %v10456_v32 = vpop.f32.mrb[159].mxu1 }
 0x59c   : > { %v9490_v6 = vmax.f32 %v9470_v45, %v9472_v23 }
 0x5a0   : > { %v8870_v39 = vpop.f32.mrb[160].mxu1 }
 0x5a1   : > { %v8896_v48 = vadd.f32 %v8870_v39, %v8726_v61  ;;  %v10483_v38 = vpop.f32.mrb[161].mxu1  ;;  %v9449_v61 = vmax.f32 %v9119_v43, %v9121_v42 }
 0x5a2   : > { %v8873_v25 = vpop.f32.mrb[162].mxu1 }
 0x5a3   : > { %v8912_v46 = vadd.f32 %v13983_v63, %v8896_v48  ;;  %v8897_v55 = vadd.f32 %v8873_v25, %v8727_v0  ;;  %v10484_v3 = vpop.f32.mrb[163].mxu1 }
 0x5a5   : > { %v9122_v36 = vcombine.high %v8912_v46, %v8912_v46  ;;  %v9129_v17 = vrot.slane %v8912_v46, %v14436_v4  ;;  %v8913_v44 = vadd.f32 %v13983_v63, %v8897_v55 }
 0x5a7   : > { %v9136_v31 = vrot.slane %v9122_v36, %v14436_v4  ;;  %v9137_v22 = vcombine.high %v9129_v17, %v9129_v17  ;;  %v9145_v30 = vrot.slane %v9129_v17, %v14436_v4  ;;  %v9171_v15 = vcombine.high %v8913_v44, %v8913_v44 }
 0x5a8   : > { %v9178_v20 = vrot.slane %v8913_v44, %v14436_v4  ;;  %v8878_v11 = vpop.f32.mrb[164].mxu1 }
 0x5a9   : > { %v9138_v26 = vcombine.high %v9136_v31, %v9136_v31  ;;  %v9152_v0 = vrot.slane %v9136_v31, %v14436_v4  ;;  %v9159_v27 = vrot.slane %v9137_v22, %v14436_v4  ;;  %v9167_v10 = vcombine.high %v9145_v30, %v9145_v30  ;;  %v10487_v52 = vpop.f32.mrb[165].mxu1 }
 0x5aa   : > { %v9473_v12 = vmax.f32 %v9449_v61, %v9145_v30  ;;  %v9185_v2 = vrot.slane %v9171_v15, %v14436_v4  ;;  %v9186_v59 = vcombine.high %v9178_v20, %v9178_v20  ;;  %v9194_v62 = vrot.slane %v9178_v20, %v14436_v4  ;;  %v8881_v1 = vpop.f32.mrb[166].mxu1 }
 0x5ab   : > { %v9166_v50 = vrot.slane %v9138_v26, %v14436_v4  ;;  %v9169_v51 = vcombine.high %v9159_v27, %v9159_v27  ;;  %v9450_v35 = vmax.f32 %v9159_v27, %v9167_v10  ;;  %v10488_v41 = vpop.f32.mrb[167].mxu1  ;;  %v9168_v7 = vcombine.high %v9152_v0, %v9152_v0 }
 0x5ac   : > { %v9497_v21 = vmax.f32 %v9489_v9, %v9473_v12  ;;  %v9187_v24 = vcombine.high %v9185_v2, %v9185_v2  ;;  %v9201_v34 = vrot.slane %v9185_v2, %v14436_v4  ;;  %v9208_v57 = vrot.slane %v9186_v59, %v14436_v4 }
 0x5ad   : > { %v9451_v18 = vmax.f32 %v9152_v0, %v9166_v50  ;;  %v9474_v58 = vmax.f32 %v9450_v35, %v9169_v51  ;;  %v9170_v16 = vcombine.high %v9166_v50, %v9166_v50  ;;  %v9216_v14 = vcombine.high %v9194_v62, %v9194_v62 }
 0x5ae   : > { %v9215_v5 = vrot.slane %v9187_v24, %v14436_v4  ;;  %v9217_v13 = vcombine.high %v9201_v34, %v9201_v34  ;;  %v9218_v49 = vcombine.high %v9208_v57, %v9208_v57  ;;  %v9505_v8 = vmax.f32 %v9497_v21, 0.0 }
 0x5af   : > { %v9498_v54 = vmax.f32 %v9490_v6, %v9474_v58  ;;  %v9452_v60 = vmax.f32 %v9170_v16, %v9194_v62  ;;  %v8898_v47 = vadd.f32 %v8878_v11, %v14018_v28  ;;  %v8899_v45 = vadd.f32 %v8881_v1, %v14021_v37 }
 0x5b0   : > { %v9219_v19 = vcombine.high %v9215_v5, %v9215_v5  ;;  %v9453_v56 = vmax.f32 %v9216_v14, %v9218_v49  ;;  %v9454_v29 = vmax.f32 %v9215_v5, %v9217_v13  ;;  %v8886_v23 = vpop.f32.mrb[168].mxu1  ;;  %v9475_v38 = vmax.f32 %v9451_v18, %v9168_v7 }
 0x5b1   : > { %v9506_v33 = vmax.f32 %v9498_v54, 0.0  ;;  %v9476_v9 = vmax.f32 %v9452_v60, %v9208_v57  ;;  %v8914_v32 = vadd.f32 %v13983_v63, %v8898_v47  ;;  %v8900_v39 = vadd.f32 %v8886_v23, %v14029_v53  ;;  %v10491_v48 = vpop.f32.mrb[169].mxu1 }
 0x5b2   : > { %v9477_v25 = vmax.f32 %v9453_v56, %v9201_v34  ;;  %v9478_v6 = vmax.f32 %v9454_v29, %v9219_v19  ;;  %v8915_v46 = vadd.f32 %v13983_v63, %v8899_v45  ;;  %v8889_v55 = vpop.f32.mrb[170].mxu1  ;;  %v9529_v15 = vrot.slane %v14025_v40, %v14436_v4 }
 0x5b3   : > { %v9520_v28 = vcombine.low %v9505_v8, %v9506_v33  ;;  %v9220_v3 = vcombine.high %v8914_v32, %v8914_v32  ;;  %v9227_v42 = vrot.slane %v8914_v32, %v14436_v4  ;;  %v8916_v37 = vadd.f32 %v13983_v63, %v8900_v39  ;;  %v10492_v36 = vpop.f32.mrb[171].mxu1 }
 0x5b4   : > { %v9491_v17 = vmax.f32 %v9475_v38, %v9477_v25  ;;  %v9492_v44 = vmax.f32 %v9476_v9, %v9478_v6  ;;  %v9269_v43 = vcombine.high %v8915_v46, %v8915_v46  ;;  %v9276_v31 = vrot.slane %v8915_v46, %v14436_v4 }
 0x5b5   : > { %v9234_v53 = vrot.slane %v9220_v3, %v14436_v4  ;;  %v9235_v22 = vcombine.high %v9227_v42, %v9227_v42  ;;  %v9243_v30 = vrot.slane %v9227_v42, %v14436_v4  ;;  %v9536_v61 = vrot.slane %v9520_v28, %v14436_v4 }
 0x5b6   : > { %v9283_v20 = vrot.slane %v9269_v43, %v14436_v4  ;;  %v9284_v11 = vcombine.high %v9276_v31, %v9276_v31  ;;  %v9292_v63 = vrot.slane %v9276_v31, %v14436_v4  ;;  %v9318_v10 = vcombine.high %v8916_v37, %v8916_v37 }
 0x5b7   : > { %v9236_v26 = vcombine.high %v9234_v53, %v9234_v53  ;;  %v9250_v0 = vrot.slane %v9234_v53, %v14436_v4  ;;  %v9257_v27 = vrot.slane %v9235_v22, %v14436_v4  ;;  %v9265_v62 = vcombine.high %v9243_v30, %v9243_v30 }
 0x5b8   : > { %v9285_v52 = vcombine.high %v9283_v20, %v9283_v20  ;;  %v9299_v12 = vrot.slane %v9283_v20, %v14436_v4  ;;  %v9306_v2 = vrot.slane %v9284_v11, %v14436_v4  ;;  %v9314_v59 = vcombine.high %v9292_v63, %v9292_v63 }
 0x5b9   : > { %v9264_v40 = vrot.slane %v9236_v26, %v14436_v4  ;;  %v9267_v1 = vcombine.high %v9257_v27, %v9257_v27  ;;  %v9455_v50 = vmax.f32 %v9243_v30, %v9257_v27  ;;  %v9266_v51 = vcombine.high %v9250_v0, %v9250_v0 }
 0x5ba   : > { %v9313_v35 = vrot.slane %v9285_v52, %v14436_v4  ;;  %v9315_v41 = vcombine.high %v9299_v12, %v9299_v12  ;;  %v9316_v21 = vcombine.high %v9306_v2, %v9306_v2  ;;  %v9325_v7 = vrot.slane %v8916_v37, %v14436_v4 }
 0x5bb   : > { %v9456_v24 = vmax.f32 %v9267_v1, %v9250_v0  ;;  %v9479_v34 = vmax.f32 %v9455_v50, %v9265_v62  ;;  %v9268_v57 = vcombine.high %v9264_v40, %v9264_v40  ;;  %v9458_v18 = vmax.f32 %v9306_v2, %v9314_v59 }
 0x5bc   : > { %v9459_v58 = vmax.f32 %v9299_v12, %v9313_v35  ;;  %v9317_v16 = vcombine.high %v9313_v35, %v9313_v35  ;;  %v9332_v5 = vrot.slane %v9318_v10, %v14436_v4  ;;  %v9333_v54 = vcombine.high %v9325_v7, %v9325_v7 }
 0x5bd   : > { %v9480_v14 = vmax.f32 %v9456_v24, %v9264_v40  ;;  %v9499_v13 = vmax.f32 %v9491_v17, %v9479_v34  ;;  %v9457_v49 = vmax.f32 %v9266_v51, %v9268_v57  ;;  %v9341_v47 = vrot.slane %v9325_v7, %v14436_v4 }
 0x5be   : > { %v9483_v8 = vmax.f32 %v9459_v58, %v9315_v41  ;;  %v9334_v60 = vcombine.high %v9332_v5, %v9332_v5  ;;  %v9348_v19 = vrot.slane %v9332_v5, %v14436_v4  ;;  %v9355_v23 = vrot.slane %v9333_v54, %v14436_v4 }
 0x5bf   : > { %v9500_v56 = vmax.f32 %v9492_v44, %v9480_v14  ;;  %v9507_v29 = vmax.f32 %v9499_v13, 0.0  ;;  %v9481_v45 = vmax.f32 %v9457_v49, %v9292_v63  ;;  %v9363_v9 = vcombine.high %v9341_v47, %v9341_v47 }
 0x5c0   : > { %v9362_v33 = vrot.slane %v9334_v60, %v14436_v4  ;;  %v9364_v32 = vcombine.high %v9348_v19, %v9348_v19  ;;  %v9460_v39 = vmax.f32 %v9317_v16, %v9341_v47  ;;  %v9365_v25 = vcombine.high %v9355_v23, %v9355_v23 }
 0x5c1   : > { %v9508_v48 = vmax.f32 %v9500_v56, 0.0  ;;  %v9493_v38 = vmax.f32 %v9481_v45, %v9483_v8  ;;  %v9551_v6 = vcombine.low %v9529_v15, %v9536_v61  ;;  %v9482_v46 = vmax.f32 %v9458_v18, %v9316_v21 }
 0x5c2   : > { %v9366_v55 = vcombine.high %v9362_v33, %v9362_v33  ;;  %v9462_v28 = vmax.f32 %v9362_v33, %v9364_v32  ;;  %v9484_v3 = vmax.f32 %v9460_v39, %v9355_v23  ;;  %v9461_v37 = vmax.f32 %v9363_v9, %v9365_v25 }
 0x5c3   : > { %v9521_v42 = vcombine.low %v9507_v29, %v9508_v48  ;;  %v9559_v11 = vrot.slane %v9551_v6, %v14436_v4 }
 0x5c4   : > { %v9486_v36 = vmax.f32 %v9462_v28, %v9366_v55  ;;  %v9494_v17 = vmax.f32 %v9482_v46, %v9484_v3  ;;  %v9485_v44 = vmax.f32 %v9461_v37, %v9348_v19 }
 0x5c5   : > { %v9543_v15 = vrot.slane %v9521_v42, %v14436_v4 }
 0x5c6   : > { %v9502_v43 = vmax.f32 %v9494_v17, %v9486_v36  ;;  %v9501_v31 = vmax.f32 %v9493_v38, %v9485_v44 }
 0x5c8   : > { %v9510_v53 = vmax.f32 %v9502_v43, 0.0  ;;  %v9509_v22 = vmax.f32 %v9501_v31, 0.0 }
 0x5ca   : > { %v9522_v30 = vcombine.low %v9509_v22, %v9510_v53 }
 0x5cc   : > { %v9550_v61 = vrot.slane %v9522_v30, %v14436_v4 }
 0x5ce   : > { %v9552_v20 = vcombine.low %v9543_v15, %v9550_v61 }
 0x5d0   : > { %v9566_v63 = vrot.slane %v9552_v20, %v14436_v4 }
 0x5d2   : > { %v9567_v26 = vcombine.low %v9559_v11, %v9566_v63 }
 0x5d4   : > { %9569 = vst [vmem:[%s313_s27] sm:$0xff] %v9567_v26 }
 0x5d5   : > { %10855 = shalt.err (!%p10852_p4)
}
 0x5d6   : > { %s10856_s20 = scalar_lea.hbm %s14081_s13, 128  ;;  %s10860_s7 = scalar_lea.hbm %s14131_s6, 256 }
 0x5d7   : > { %p10857_p9 = scmp.ne.s32.totalorder %s14081_s13, %s10856_s20  ;;  %p10861_p8 = scmp.lt.u32.totalorder %s14081_s13, %s14131_s6 }
 0x5d8   : > { %p10862_p13 = scmp.lt.u32.totalorder %s10860_s7, %s10856_s20  ;;  %p10864_p10 = scmp.lt.u32.totalorder %s10856_s20, %s14081_s13 }
 0x5d9   : > { %p10858_p0 = pnand %p10857_p9, %p11116_p5 }
 0x5da   : > { %p10863_p6 = por %p10862_p13, %p10861_p8 }
 0x5db   : > { %p10859_p11 = pneg %p10858_p0 }
 0x5dc   : > { %p10865_p3 = por %p10864_p10, %p10863_p6 }
 0x5de   : > { %p10866_p7 = pnand %p10865_p3, %p10859_p11 }
 0x5e0   : > { %10869 = shalt.err (!%p10866_p7)
}
 0x5e1   : > { %10525 = dma.vmem_to_hbm [thread:$0]  (%p11116_p5), %s14083_s29, 128, %s14081_s13, %s9571_s15  }
 0x5e2 PF: > { %s9596_s27 = sand.u32 1, %s10904_s21   ;;  %p14437_p12 = scmp.ne.s32.totalorder %s14218_s28, 0 }
 0x5e3   : > { %p14438_p1 = scmp.ge.s32.totalorder %s10916_s24, 2  ;;  %s9597_s26 = scalar_lea.sflag [#allocation4], %s9596_s27 }
 0x5e5   : > { %p10542_p2 = pnand %p14438_p1, %p14437_p12 }
 0x5e7   : > { %10899 = dma.done.wait (!%p10542_p2), %s9597_s26, 128  }
 0x5e8   : > { %10901 = vsyncadd (!%p10542_p2), %s9597_s26, 4294967168  ;;  %p21_p4 = scmp.ge.s32.totalorder %s11102_s14, 4   ;;  %s14439_s21 = smov %s10908_s22 }
 0x5e9   : > { %s14440_s22 = smov %s10912_s23  ;;  %s14441_s23 = smov %s11112_s17 }
 0x5ea   : > { %s14442_s24 = smov %s11102_s14  ;;  %23 = sbr.rel (!%p21_p4) target bundleno = 7 (0x7), region = 116 }
 0x5f1   :  { %9602 = vsyncpa [#allocation3], 1 }
 0x5f2   :  { %9604 = vsyncpa [#allocation3 + $0x1], 1 }
 0x5f3   :  { %9605 = vsyncpa [#allocation6], 1 }
 0x5f4   :  { %9606 = vsyncpa [#allocation9], 1 }
 0x5f5   :  { %9607 = vsyncpa [#allocation4], 1 }
 0x5f6   :  { %9609 = vsyncpa [#allocation4 + $0x1], 1 }

</bundles_post_ra>
